<compile_context>
chip_gen: v5e
topology: v5e:2x2
jax: 0.10.0
libtpu: 0.0.40
codegen_flags: <defaults>
</compile_context>

<pallas_src>
import functools
import math

import jax
import jax.numpy as jnp
from jax.experimental import pallas as pl
from jax.experimental.pallas import tpu as pltpu

# ---------------- config (small synthetic LLaMa, lane-dense dims) ----------------
B = 2            # batch
N = 16           # sequence length
D = 128          # hidden size
H = 4            # attention heads
HD = D // H      # head dim (32)
F = 256          # MLP intermediate size
V = 256          # vocab size
L = 2            # number of layers
M = B * N        # token rows (32)
BHN = B * H * N  # expanded attention rows (128)
EPS = 1e-6
ACT_DTYPE = jnp.bfloat16
NEG_INF = -1e30


# ---------------- in-kernel helpers ----------------
def _rmsnorm(x_f32, w):
    """RMSNorm on an f32 tile, returning bf16 ready for the MXU."""
    var = jnp.mean(x_f32 * x_f32, axis=-1, keepdims=True)
    return (x_f32 * jax.lax.rsqrt(var + EPS) * w.astype(jnp.float32)).astype(ACT_DTYPE)


# ---------------- the single fused kernel (grid over layers) ----------------
def fused_llama_kernel(tok_oh_ref, tgt_oh_ref, embed_ref, cos_ref, sin_ref,
                       rot_ref, pexp_ref, pexp_t_ref, hmask_ref, bias_ref,
                       an_ref, wqkv_ref, wo_ref, mn_ref, wgu_ref, wd_ref,
                       fnorm_ref, wlm_ref,
                       logits_ref, loss_ref, x_ref, *, inv_denom):
    layer = pl.program_id(0)

    @pl.when(layer == 0)
    def _():
        # Embedding gather fused in-kernel as a one-hot MXU matmul; the f32
        # residual stream stays in VMEM scratch for the whole stack.
        x_ref[...] = jnp.dot(tok_oh_ref[...], embed_ref[...],
                             preferred_element_type=jnp.float32)

    x = x_ref[...]                                           # (M, D) f32 residual

    # ---- attention block ----
    h = _rmsnorm(x, an_ref[0])                               # (M, D) bf16
    qkv = jnp.dot(h, wqkv_ref[0],
                  preferred_element_type=jnp.float32)        # (M, 3D) f32
    q, k, v = qkv[:, :D], qkv[:, D:2 * D], qkv[:, 2 * D:]    # 128-aligned slices

    # RoPE in f32 (rotate_half(x) == x @ rot, block-diag +/-1 matrix on MXU);
    # bf16 only at MXU inputs.  1/sqrt(HD) is pre-folded into Wq.
    cos = cos_ref[...]
    sin = sin_ref[...]
    rot = rot_ref[...]
    q = q * cos + jnp.dot(q.astype(ACT_DTYPE), rot,
                          preferred_element_type=jnp.float32) * sin
    k = k * cos + jnp.dot(k.astype(ACT_DTYPE), rot,
                          preferred_element_type=jnp.float32) * sin

    # Lane-dense blocked attention: expand tokens to (B*H*N, D), one score
    # matmul, one full-vreg softmax (resident additive bias handles causal +
    # cross-(batch,head) masking), one PV matmul, one collapse matmul.
    pexp = pexp_ref[...]                                     # (BHN, M) bf16
    qf = jnp.dot(pexp, q.astype(ACT_DTYPE), preferred_element_type=jnp.float32)
    kf = jnp.dot(pexp, k.astype(ACT_DTYPE), preferred_element_type=jnp.float32)
    vf = (jnp.dot(pexp, v.astype(ACT_DTYPE), preferred_element_type=jnp.float32)
          * hmask_ref[...])                                  # per-head lane mask

    s = jnp.einsum('qd,kd->qk', qf.astype(ACT_DTYPE), kf.astype(ACT_DTYPE),
                   preferred_element_type=jnp.float32)       # (BHN, BHN)
    s = s + bias_ref[...]
    m_s = jnp.max(s, axis=-1, keepdims=True)
    p = jnp.exp(s - m_s)
    p = p * pl.reciprocal(jnp.sum(p, axis=-1, keepdims=True), approx=True)

    out_f = jnp.dot(p.astype(ACT_DTYPE), vf.astype(ACT_DTYPE),
                    preferred_element_type=jnp.float32)      # (BHN, D)
    attn_md = jnp.dot(pexp_t_ref[...], out_f.astype(ACT_DTYPE),
                      preferred_element_type=jnp.float32)    # (M, D) = concat over heads
    attn = jnp.dot(attn_md.astype(ACT_DTYPE), wo_ref[0],
                   preferred_element_type=jnp.float32)       # single K=128 Wo matmul
    x = x + attn

    # ---- MLP block (SwiGLU, fused gate+up matmul) ----
    h2 = _rmsnorm(x, mn_ref[0])
    gu = jnp.dot(h2, wgu_ref[0], preferred_element_type=jnp.float32)  # (M, 2F) f32
    g, u = gu[:, :F], gu[:, F:]
    act = (g * jax.nn.sigmoid(g)) * u
    x = x + jnp.dot(act.astype(ACT_DTYPE), wd_ref[0],
                    preferred_element_type=jnp.float32)
    x_ref[...] = x

    # ---- fused final RMSNorm + lm_head + cross-entropy epilogue ----
    @pl.when(layer == pl.num_programs(0) - 1)
    def _():
        hf = _rmsnorm(x, fnorm_ref[...])
        logits = jnp.dot(hf, wlm_ref[...],
                         preferred_element_type=jnp.float32)            # (M, V) f32
        logits_ref[...] = logits.astype(logits_ref.dtype)               # lane-dense bf16
        m_l = jnp.max(logits, axis=-1, keepdims=True)
        lse = jnp.log(jnp.sum(jnp.exp(logits - m_l), axis=-1, keepdims=True)) + m_l
        # target one-hot already carries the shifted-label validity mask
        nll = tgt_oh_ref[...] * (lse - logits)
        loss_ref[0, 0] = jnp.sum(nll) * inv_denom


def run_fused_model(tok_oh, tgt_oh, consts, params):
    cos, sin, rot, pexp, pexp_t, hmask, bias = consts
    kernel = functools.partial(fused_llama_kernel,
                               inv_denom=1.0 / float(B * (N - 1)))
    const2 = lambda l: (0, 0)
    per_layer = lambda l: (l, 0, 0)
    logits, loss = pl.pallas_call(
        kernel,
        out_shape=(jax.ShapeDtypeStruct((M, V), ACT_DTYPE),
                   jax.ShapeDtypeStruct((1, 1), jnp.float32)),
        grid=(L,),
        in_specs=[
            pl.BlockSpec((M, V), const2),          # input-token one-hot
            pl.BlockSpec((M, V), const2),          # masked target one-hot
            pl.BlockSpec((V, D), const2),          # embedding table
            pl.BlockSpec((M, D), const2),          # cos
            pl.BlockSpec((M, D), const2),          # sin
            pl.BlockSpec((D, D), const2),          # rotate_half matrix
            pl.BlockSpec((BHN, M), const2),        # token -> (b,h,n) expansion
            pl.BlockSpec((M, BHN), const2),        # (b,h,n) -> token collapse
            pl.BlockSpec((BHN, D), const2),        # per-head lane mask
            pl.BlockSpec((BHN, BHN), const2),      # causal + cross-(b,h) bias
            pl.BlockSpec((1, 1, D), per_layer),    # attn_norm
            pl.BlockSpec((1, D, 3 * D), per_layer),  # wqkv (fused)
            pl.BlockSpec((1, D, D), per_layer),    # wo
            pl.BlockSpec((1, 1, D), per_layer),    # mlp_norm
            pl.BlockSpec((1, D, 2 * F), per_layer),  # wgu (fused gate+up)
            pl.BlockSpec((1, F, D), per_layer),    # wd
            pl.BlockSpec((1, D), const2),          # final_norm
            pl.BlockSpec((D, V), const2),          # lm_head
        ],
        out_specs=(pl.BlockSpec((M, V), const2),
                   pl.BlockSpec(memory_space=pltpu.MemorySpace.SMEM)),
        scratch_shapes=[pltpu.VMEM((M, D), jnp.float32)],   # resident residual stream
        compiler_params=pltpu.CompilerParams(
            dimension_semantics=("arbitrary",)),             # sequential over layers
    )(tok_oh, tgt_oh, params["embed"], cos, sin, rot, pexp, pexp_t, hmask, bias,
      params["attn_norm"], params["wqkv"], params["wo"],
      params["mlp_norm"], params["wgu"], params["wd"],
      params["final_norm"], params["lm_head"])
    return logits, loss[0, 0]


# ---------------- constant tables (host/XLA side, constant-folded under jit) ----------------
def build_constants():
    # RoPE tables in the (M, D) token-major layout used inside the kernel.
    half = HD // 2
    inv_freq = 1.0 / (10000.0 ** (jnp.arange(0, HD, 2, dtype=jnp.float32) / HD))
    t = jnp.arange(N, dtype=jnp.float32)
    freqs = t[:, None] * inv_freq[None, :]                    # (N, HD/2)
    emb = jnp.concatenate([freqs, freqs], axis=-1)            # (N, HD)
    cos = jnp.tile(jnp.cos(emb), (B, H))                      # (M, D)
    sin = jnp.tile(jnp.sin(emb), (B, H))
    # rotate_half(x) == x @ r with r = [[0, I], [-I, 0]]; block-diag over heads.
    r = jnp.zeros((HD, HD), jnp.float32)
    r = r.at[half:, :half].set(-jnp.eye(half, dtype=jnp.float32))
    r = r.at[:half, half:].set(jnp.eye(half, dtype=jnp.float32))
    rot = jnp.kron(jnp.eye(H, dtype=jnp.float32), r).astype(ACT_DTYPE)   # (D, D)

    # Blocked attention layout helpers: expanded row rr = (b*H + h)*N + n.
    rr = jnp.arange(BHN)
    b_r = rr // (H * N)
    h_r = (rr // N) % H
    n_r = rr % N
    pexp = (jnp.arange(M)[None, :] == (b_r * N + n_r)[:, None]).astype(ACT_DTYPE)
    pexp_t = jnp.transpose(pexp)                               # (M, BHN)
    hmask = ((jnp.arange(D)[None, :] // HD) == h_r[:, None]).astype(jnp.float32)
    keep = ((b_r[:, None] == b_r[None, :]) &
            (h_r[:, None] == h_r[None, :]) &
            (n_r[None, :] <= n_r[:, None]))
    bias = jnp.where(keep, 0.0, NEG_INF).astype(jnp.float32)   # (BHN, BHN)
    return cos, sin, rot, pexp, pexp_t, hmask, bias


# ---------------- parameter init (deterministic, synthetic, pre-fused) ----------------
def init_params(key):
    def nrm(k, shape):
        return (0.02 * jax.random.normal(k, shape, jnp.float32)).astype(ACT_DTYPE)

    ks = jax.random.split(key, 6)
    wqkv = nrm(ks[2], (L, D, 3 * D))
    # Fold the 1/sqrt(head_dim) attention scale into Wq (RoPE is linear, so
    # this is exactly equivalent) -> no per-layer scale multiply in the kernel.
    wqkv = wqkv.at[:, :, :D].multiply(1.0 / math.sqrt(HD))
    return {
        "embed": nrm(ks[0], (V, D)),
        "lm_head": nrm(ks[1], (D, V)),
        "final_norm": jnp.ones((1, D), ACT_DTYPE),
        "attn_norm": jnp.ones((L, 1, D), ACT_DTYPE),
        "wqkv": wqkv,                           # fused q/k/v projection
        "wo": nrm(ks[3], (L, D, D)),
        "mlp_norm": jnp.ones((L, 1, D), ACT_DTYPE),
        "wgu": nrm(ks[4], (L, D, 2 * F)),       # fused gate/up projection
        "wd": nrm(ks[5], (L, F, D)),
    }


# ---------------- forward (mirrors LLaMa_reader.forward) ----------------
def llama_reader_forward(params, tokens, labels=None):
    """tokens: (B, N) int32 -> (lm_logits (B, N, V) bf16, loss scalar f32 | None)."""
    consts = build_constants()
    vocab = jnp.arange(V, dtype=jnp.int32)
    tok_oh = (tokens.reshape(M, 1) == vocab[None, :]).astype(ACT_DTYPE)   # (M, V)
    if labels is not None:
        tgt = jnp.concatenate([labels[:, 1:], jnp.zeros((B, 1), labels.dtype)], axis=1)
        msk = jnp.concatenate([jnp.ones((B, N - 1), jnp.float32),
                               jnp.zeros((B, 1), jnp.float32)], axis=1)
    else:
        tgt = jnp.zeros((B, N), jnp.int32)
        msk = jnp.zeros((B, N), jnp.float32)
    tgt_oh = ((tgt.reshape(M, 1).astype(jnp.int32) == vocab[None, :])
              .astype(jnp.float32) * msk.reshape(M, 1))                   # (M, V)

    logits2d, loss = run_fused_model(tok_oh, tgt_oh, consts, params)
    lm_logits = logits2d.reshape(B, N, V)
    return lm_logits, (loss if labels is not None else None)

# TODO(synk): tokenizer, HF checkpoint loading, and the sampling-based
# generate()/pseudo_generate() paths have no Pallas equivalent and are omitted.


# ---------------- pure-JAX f32 reference (validation only) ----------------
def ref_forward(params, tokens, labels):
    def rms(x, w):
        var = jnp.mean(x * x, axis=-1, keepdims=True)
        return x * jax.lax.rsqrt(var + EPS) * w.astype(jnp.float32)

    half = HD // 2
    inv_freq = 1.0 / (10000.0 ** (jnp.arange(0, HD, 2, dtype=jnp.float32) / HD))
    t = jnp.arange(N, dtype=jnp.float32)
    freqs = t[:, None] * inv_freq[None, :]
    emb = jnp.concatenate([freqs, freqs], axis=-1)             # (N, HD)
    cos_h, sin_h = jnp.cos(emb), jnp.sin(emb)

    def rope(xh):                                              # (B, H, N, HD)
        x1, x2 = xh[..., :half], xh[..., half:]
        return xh * cos_h + jnp.concatenate([-x2, x1], axis=-1) * sin_h

    x = params["embed"].astype(jnp.float32)[tokens.reshape(-1)]          # (M, D)
    causal = jnp.tril(jnp.ones((N, N), bool))
    for l in range(L):
        h = rms(x, params["attn_norm"][l, 0])
        qkv = h @ params["wqkv"][l].astype(jnp.float32)
        q, k, v = qkv[:, :D], qkv[:, D:2 * D], qkv[:, 2 * D:]
        sp = lambda z: z.reshape(B, N, H, HD).transpose(0, 2, 1, 3)
        qh, kh, vh = rope(sp(q)), rope(sp(k)), sp(v)
        s = jnp.einsum('bhqd,bhkd->bhqk', qh, kh)              # scale folded into Wq
        s = jnp.where(causal, s, NEG_INF)
        p = jax.nn.softmax(s, axis=-1)
        o = jnp.einsum('bhqk,bhkd->bhqd', p, vh)
        o = o.transpose(0, 2, 1, 3).reshape(M, D)
        x = x + o @ params["wo"][l].astype(jnp.float32)
        h2 = rms(x, params["mlp_norm"][l, 0])
        gu = h2 @ params["wgu"][l].astype(jnp.float32)
        g, u = gu[:, :F], gu[:, F:]
        x = x + (g * jax.nn.sigmoid(g) * u) @ params["wd"][l].astype(jnp.float32)
    hf = rms(x, params["final_norm"][0])
    logits = hf @ params["lm_head"].astype(jnp.float32)        # (M, V)
    lm = logits.reshape(B, N, V)
    shift_logits = lm[:, :-1, :].reshape(-1, V)
    shift_labels = labels[:, 1:].reshape(-1)
    lse = jax.nn.logsumexp(shift_logits, axis=-1)
    picked = shift_logits[jnp.arange(B * (N - 1)), shift_labels]
    loss = jnp.mean(lse - picked)
    return lm, loss


if __name__ == "__main__":
    key = jax.random.PRNGKey(0)
    pkey, tkey = jax.random.split(key)
    params = init_params(pkey)
    tokens = jax.random.randint(tkey, (B, N), 0, V, dtype=jnp.int32)
    labels = tokens  # teacher forcing: labels supplied alongside input_ids

    fwd = jax.jit(llama_reader_forward)
    lm_logits, loss = fwd(params, tokens, labels)
    jax.block_until_ready((lm_logits, loss))

    assert lm_logits.shape == (B, N, V) and lm_logits.dtype == ACT_DTYPE
    assert loss.shape == () and loss.dtype == jnp.float32
    assert bool(jnp.isfinite(loss))
    assert 0.0 < float(loss) < 20.0

    # Validate the fused blocked-attention / fused-epilogue formulation against
    # a straightforward pure-JAX f32 reference (loose tolerance: bf16 MXU +
    # approx reciprocal in the softmax).
    ref_logits, ref_loss = jax.jit(ref_forward)(params, tokens, labels)
    max_err = float(jnp.max(jnp.abs(lm_logits.astype(jnp.float32)
                                    - ref_logits.reshape(B, N, V))))
    assert max_err < 0.08, max_err
    assert abs(float(loss) - float(ref_loss)) < 0.05

    print("KERNEL_OK")
</pallas_src>

<mosaic_0001>
module attributes {stable_mosaic.version = 11 : i64} {
  func.func @fused_llama_kernel(%arg0: i32, %arg1: memref<32x256xbf16, #tpu.memory_space<vmem>>, %arg2: memref<32x256xf32, #tpu.memory_space<vmem>>, %arg3: memref<256x128xbf16, #tpu.memory_space<vmem>>, %arg4: memref<32x128xf32, #tpu.memory_space<vmem>>, %arg5: memref<32x128xf32, #tpu.memory_space<vmem>>, %arg6: memref<128x128xbf16, #tpu.memory_space<vmem>>, %arg7: memref<128x32xbf16, #tpu.memory_space<vmem>>, %arg8: memref<32x128xbf16, #tpu.memory_space<vmem>>, %arg9: memref<128x128xf32, #tpu.memory_space<vmem>>, %arg10: memref<128x128xf32, #tpu.memory_space<vmem>>, %arg11: memref<1x1x128xbf16, #tpu.memory_space<vmem>>, %arg12: memref<1x128x384xbf16, #tpu.memory_space<vmem>>, %arg13: memref<1x128x128xbf16, #tpu.memory_space<vmem>>, %arg14: memref<1x1x128xbf16, #tpu.memory_space<vmem>>, %arg15: memref<1x128x512xbf16, #tpu.memory_space<vmem>>, %arg16: memref<1x256x128xbf16, #tpu.memory_space<vmem>>, %arg17: memref<1x128xbf16, #tpu.memory_space<vmem>>, %arg18: memref<128x256xbf16, #tpu.memory_space<vmem>>, %arg19: memref<32x256xbf16, #tpu.memory_space<vmem>>, %arg20: memref<1x1xf32, #tpu.memory_space<smem>>, %arg21: memref<32x128xf32, #tpu.memory_space<vmem>>) attributes {dimension_semantics = [#tpu.dimension_semantics<arbitrary>], iteration_bounds = array<i64: 2>, scalar_prefetch = 0 : i64, scratch_operands = 1 : i64, tpu.core_type = #tpu.core_type<tc>, window_params = [{pipeline_mode = #tpu.pipeline_mode<synchronous>, transform_indices = @transform_0, window_bounds = array<i64: 32, 256>}, {pipeline_mode = #tpu.pipeline_mode<synchronous>, transform_indices = @transform_1, window_bounds = array<i64: 32, 256>}, {pipeline_mode = #tpu.pipeline_mode<synchronous>, transform_indices = @transform_2, window_bounds = array<i64: 256, 128>}, {pipeline_mode = #tpu.pipeline_mode<synchronous>, transform_indices = @transform_3, window_bounds = array<i64: 32, 128>}, {pipeline_mode = #tpu.pipeline_mode<synchronous>, transform_indices = @transform_4, window_bounds = array<i64: 32, 128>}, {pipeline_mode = #tpu.pipeline_mode<synchronous>, transform_indices = @transform_5, window_bounds = array<i64: 128, 128>}, {pipeline_mode = #tpu.pipeline_mode<synchronous>, transform_indices = @transform_6, window_bounds = array<i64: 128, 32>}, {pipeline_mode = #tpu.pipeline_mode<synchronous>, transform_indices = @transform_7, window_bounds = array<i64: 32, 128>}, {pipeline_mode = #tpu.pipeline_mode<synchronous>, transform_indices = @transform_8, window_bounds = array<i64: 128, 128>}, {pipeline_mode = #tpu.pipeline_mode<synchronous>, transform_indices = @transform_9, window_bounds = array<i64: 128, 128>}, {transform_indices = @transform_10, window_bounds = array<i64: 1, 1, 128>}, {transform_indices = @transform_11, window_bounds = array<i64: 1, 128, 384>}, {transform_indices = @transform_12, window_bounds = array<i64: 1, 128, 128>}, {transform_indices = @transform_13, window_bounds = array<i64: 1, 1, 128>}, {transform_indices = @transform_14, window_bounds = array<i64: 1, 128, 512>}, {transform_indices = @transform_15, window_bounds = array<i64: 1, 256, 128>}, {pipeline_mode = #tpu.pipeline_mode<synchronous>, transform_indices = @transform_16, window_bounds = array<i64: 1, 128>}, {pipeline_mode = #tpu.pipeline_mode<synchronous>, transform_indices = @transform_17, window_bounds = array<i64: 128, 256>}, {pipeline_mode = #tpu.pipeline_mode<synchronous>, transform_indices = @transform_18, window_bounds = array<i64: 32, 256>}, {transform_indices = @transform_19, window_bounds = array<i64: 1, 1>}]} {
    %c0_i32 = arith.constant 0 : i32
    %0 = arith.cmpi eq, %arg0, %c0_i32 : i32
    %1 = arith.extui %0 : i1 to i32
    %c0_i32_0 = arith.constant 0 : i32
    %2 = arith.cmpi ne, %1, %c0_i32_0 : i32
    scf.if %2 {
      %c0_57 = arith.constant 0 : index
      %c0_58 = arith.constant 0 : index
      %111 = vector.load %arg1[%c0_57, %c0_58] : memref<32x256xbf16, #tpu.memory_space<vmem>>, vector<32x256xbf16>
      %c0_59 = arith.constant 0 : index
      %c0_60 = arith.constant 0 : index
      %112 = vector.load %arg3[%c0_59, %c0_60] : memref<256x128xbf16, #tpu.memory_space<vmem>>, vector<256x128xbf16>
      %cst_61 = arith.constant dense<0.000000e+00> : vector<32x128xf32>
      %113 = tpu.matmul %111, %112, %cst_61 {dimension_numbers = #tpu.dot_dimension_numbers<[1], [0], [0], [1], [0, 0, 1, 1], [], []>} : vector<32x256xbf16>, vector<256x128xbf16>, vector<32x128xf32> -> vector<32x128xf32>
      %c0_62 = arith.constant 0 : index
      %c0_63 = arith.constant 0 : index
      %114 = vector.load %arg21[%c0_62, %c0_63] : memref<32x128xf32, #tpu.memory_space<vmem>>, vector<32x128xf32>
      tpu.vector_store %arg21[%c0_62, %c0_63], %113 {strides = array<i32>} : memref<32x128xf32, #tpu.memory_space<vmem>>, vector<32x128xf32>,
    } else {
    }
    %c0 = arith.constant 0 : index
    %c0_1 = arith.constant 0 : index
    %3 = vector.load %arg21[%c0, %c0_1] : memref<32x128xf32, #tpu.memory_space<vmem>>, vector<32x128xf32>
    %c0_2 = arith.constant 0 : index
    %c0_3 = arith.constant 0 : index
    %c0_4 = arith.constant 0 : index
    %4 = vector.load %arg11[%c0_2, %c0_3, %c0_4] : memref<1x1x128xbf16, #tpu.memory_space<vmem>>, vector<1x1x128xbf16>
    %5 = vector.shape_cast %4 : vector<1x1x128xbf16> to vector<1x128xbf16>
    %6 = arith.mulf %3, %3 : vector<32x128xf32>
    %cst = arith.constant dense<0.000000e+00> : vector<32xf32>
    %7 = vector.multi_reduction <add>, %6, %cst [1] : vector<32x128xf32> to vector<32xf32>
    %8 = vector.shape_cast %7 : vector<32xf32> to vector<32x1xf32>
    %cst_5 = arith.constant 1.280000e+02 : f32
    %9 = vector.broadcast %cst_5 : f32 to vector<32x1xf32>
    %10 = arith.divf %8, %9 : vector<32x1xf32>
    %cst_6 = arith.constant 9.99999997E-7 : f32
    %11 = vector.broadcast %cst_6 : f32 to vector<32x1xf32>
    %12 = arith.addf %10, %11 : vector<32x1xf32>
    %13 = math.rsqrt %12 : vector<32x1xf32>
    %14 = vector.broadcast %13 : vector<32x1xf32> to vector<32x128xf32>
    %15 = arith.mulf %3, %14 : vector<32x128xf32>
    %16 = arith.extf %5 : vector<1x128xbf16> to vector<1x128xf32>
    %17 = vector.broadcast %16 : vector<1x128xf32> to vector<32x128xf32>
    %18 = arith.mulf %15, %17 : vector<32x128xf32>
    %19 = arith.truncf %18 : vector<32x128xf32> to vector<32x128xbf16>
    %c0_7 = arith.constant 0 : index
    %c0_8 = arith.constant 0 : index
    %c0_9 = arith.constant 0 : index
    %20 = vector.load %arg12[%c0_7, %c0_8, %c0_9] : memref<1x128x384xbf16, #tpu.memory_space<vmem>>, vector<1x128x384xbf16>
    %21 = vector.shape_cast %20 : vector<1x128x384xbf16> to vector<128x384xbf16>
    %cst_10 = arith.constant dense<0.000000e+00> : vector<32x384xf32>
    %22 = tpu.matmul %19, %21, %cst_10 {dimension_numbers = #tpu.dot_dimension_numbers<[1], [0], [0], [1], [0, 0, 1, 1], [], []>} : vector<32x128xbf16>, vector<128x384xbf16>, vector<32x384xf32> -> vector<32x384xf32>
    %23 = vector.extract_strided_slice %22 {offsets = [0, 0], sizes = [32, 128], strides = [1, 1]} : vector<32x384xf32> to vector<32x128xf32>
    %24 = vector.extract_strided_slice %22 {offsets = [0, 128], sizes = [32, 128], strides = [1, 1]} : vector<32x384xf32> to vector<32x128xf32>
    %25 = vector.extract_strided_slice %22 {offsets = [0, 256], sizes = [32, 128], strides = [1, 1]} : vector<32x384xf32> to vector<32x128xf32>
    %c0_11 = arith.constant 0 : index
    %c0_12 = arith.constant 0 : index
    %26 = vector.load %arg4[%c0_11, %c0_12] : memref<32x128xf32, #tpu.memory_space<vmem>>, vector<32x128xf32>
    %c0_13 = arith.constant 0 : index
    %c0_14 = arith.constant 0 : index
    %27 = vector.load %arg5[%c0_13, %c0_14] : memref<32x128xf32, #tpu.memory_space<vmem>>, vector<32x128xf32>
    %c0_15 = arith.constant 0 : index
    %c0_16 = arith.constant 0 : index
    %28 = vector.load %arg6[%c0_15, %c0_16] : memref<128x128xbf16, #tpu.memory_space<vmem>>, vector<128x128xbf16>
    %29 = arith.mulf %23, %26 : vector<32x128xf32>
    %30 = arith.truncf %23 : vector<32x128xf32> to vector<32x128xbf16>
    %cst_17 = arith.constant dense<0.000000e+00> : vector<32x128xf32>
    %31 = tpu.matmul %30, %28, %cst_17 {dimension_numbers = #tpu.dot_dimension_numbers<[1], [0], [0], [1], [0, 0, 1, 1], [], []>} : vector<32x128xbf16>, vector<128x128xbf16>, vector<32x128xf32> -> vector<32x128xf32>
    %32 = arith.mulf %31, %27 : vector<32x128xf32>
    %33 = arith.addf %29, %32 : vector<32x128xf32>
    %34 = arith.mulf %24, %26 : vector<32x128xf32>
    %35 = arith.truncf %24 : vector<32x128xf32> to vector<32x128xbf16>
    %cst_18 = arith.constant dense<0.000000e+00> : vector<32x128xf32>
    %36 = tpu.matmul %35, %28, %cst_18 {dimension_numbers = #tpu.dot_dimension_numbers<[1], [0], [0], [1], [0, 0, 1, 1], [], []>} : vector<32x128xbf16>, vector<128x128xbf16>, vector<32x128xf32> -> vector<32x128xf32>
    %37 = arith.mulf %36, %27 : vector<32x128xf32>
    %38 = arith.addf %34, %37 : vector<32x128xf32>
    %c0_19 = arith.constant 0 : index
    %c0_20 = arith.constant 0 : index
    %39 = vector.load %arg7[%c0_19, %c0_20] : memref<128x32xbf16, #tpu.memory_space<vmem>>, vector<128x32xbf16>
    %40 = arith.truncf %33 : vector<32x128xf32> to vector<32x128xbf16>
    %cst_21 = arith.constant dense<0.000000e+00> : vector<128x128xf32>
    %41 = tpu.matmul %39, %40, %cst_21 {dimension_numbers = #tpu.dot_dimension_numbers<[1], [0], [0], [1], [0, 0, 1, 1], [], []>} : vector<128x32xbf16>, vector<32x128xbf16>, vector<128x128xf32> -> vector<128x128xf32>
    %42 = arith.truncf %38 : vector<32x128xf32> to vector<32x128xbf16>
    %cst_22 = arith.constant dense<0.000000e+00> : vector<128x128xf32>
    %43 = tpu.matmul %39, %42, %cst_22 {dimension_numbers = #tpu.dot_dimension_numbers<[1], [0], [0], [1], [0, 0, 1, 1], [], []>} : vector<128x32xbf16>, vector<32x128xbf16>, vector<128x128xf32> -> vector<128x128xf32>
    %44 = arith.truncf %25 : vector<32x128xf32> to vector<32x128xbf16>
    %cst_23 = arith.constant dense<0.000000e+00> : vector<128x128xf32>
    %45 = tpu.matmul %39, %44, %cst_23 {dimension_numbers = #tpu.dot_dimension_numbers<[1], [0], [0], [1], [0, 0, 1, 1], [], []>} : vector<128x32xbf16>, vector<32x128xbf16>, vector<128x128xf32> -> vector<128x128xf32>
    %c0_24 = arith.constant 0 : index
    %c0_25 = arith.constant 0 : index
    %46 = vector.load %arg9[%c0_24, %c0_25] : memref<128x128xf32, #tpu.memory_space<vmem>>, vector<128x128xf32>
    %47 = arith.mulf %45, %46 : vector<128x128xf32>
    %48 = arith.truncf %41 : vector<128x128xf32> to vector<128x128xbf16>
    %49 = arith.truncf %43 : vector<128x128xf32> to vector<128x128xbf16>
    "tpu.trace_start"() <{level = 10 : i32, message = "qd,kd->qk"}> : () -> ()
    %cst_26 = arith.constant dense<0.000000e+00> : vector<128x128xf32>
    %50 = tpu.matmul %48, %49, %cst_26 {dimension_numbers = #tpu.dot_dimension_numbers<[1], [1], [0], [0], [0, 0, 1, 0], [], []>} : vector<128x128xbf16>, vector<128x128xbf16>, vector<128x128xf32> -> vector<128x128xf32>
    "tpu.trace_stop"() : () -> ()
    %c0_27 = arith.constant 0 : index
    %c0_28 = arith.constant 0 : index
    %51 = vector.load %arg10[%c0_27, %c0_28] : memref<128x128xf32, #tpu.memory_space<vmem>>, vector<128x128xf32>
    %52 = arith.addf %50, %51 : vector<128x128xf32>
    %cst_29 = arith.constant dense<0xFF800000> : vector<128xf32>
    %53 = vector.multi_reduction <maximumf>, %52, %cst_29 [1] : vector<128x128xf32> to vector<128xf32>
    %54 = vector.shape_cast %53 : vector<128xf32> to vector<128x1xf32>
    %55 = vector.broadcast %54 : vector<128x1xf32> to vector<128x128xf32>
    %56 = arith.subf %52, %55 : vector<128x128xf32>
    %57 = math.exp %56 : vector<128x128xf32>
    %cst_30 = arith.constant dense<0.000000e+00> : vector<128xf32>
    %58 = vector.multi_reduction <add>, %57, %cst_30 [1] : vector<128x128xf32> to vector<128xf32>
    %59 = vector.shape_cast %58 : vector<128xf32> to vector<128x1xf32>
    %60 = tpu.reciprocal %59 {approx = true} : vector<128x1xf32> -> vector<128x1xf32>
    %61 = vector.broadcast %60 : vector<128x1xf32> to vector<128x128xf32>
    %62 = arith.mulf %57, %61 : vector<128x128xf32>
    %63 = arith.truncf %62 : vector<128x128xf32> to vector<128x128xbf16>
    %64 = arith.truncf %47 : vector<128x128xf32> to vector<128x128xbf16>
    %cst_31 = arith.constant dense<0.000000e+00> : vector<128x128xf32>
    %65 = tpu.matmul %63, %64, %cst_31 {dimension_numbers = #tpu.dot_dimension_numbers<[1], [0], [0], [1], [0, 0, 1, 1], [], []>} : vector<128x128xbf16>, vector<128x128xbf16>, vector<128x128xf32> -> vector<128x128xf32>
    %c0_32 = arith.constant 0 : index
    %c0_33 = arith.constant 0 : index
    %66 = vector.load %arg8[%c0_32, %c0_33] : memref<32x128xbf16, #tpu.memory_space<vmem>>, vector<32x128xbf16>
    %67 = arith.truncf %65 : vector<128x128xf32> to vector<128x128xbf16>
    %cst_34 = arith.constant dense<0.000000e+00> : vector<32x128xf32>
    %68 = tpu.matmul %66, %67, %cst_34 {dimension_numbers = #tpu.dot_dimension_numbers<[1], [0], [0], [1], [0, 0, 1, 1], [], []>} : vector<32x128xbf16>, vector<128x128xbf16>, vector<32x128xf32> -> vector<32x128xf32>
    %69 = arith.truncf %68 : vector<32x128xf32> to vector<32x128xbf16>
    %c0_35 = arith.constant 0 : index
    %c0_36 = arith.constant 0 : index
    %c0_37 = arith.constant 0 : index
    %70 = vector.load %arg13[%c0_35, %c0_36, %c0_37] : memref<1x128x128xbf16, #tpu.memory_space<vmem>>, vector<1x128x128xbf16>
    %71 = vector.shape_cast %70 : vector<1x128x128xbf16> to vector<128x128xbf16>
    %cst_38 = arith.constant dense<0.000000e+00> : vector<32x128xf32>
    %72 = tpu.matmul %69, %71, %cst_38 {dimension_numbers = #tpu.dot_dimension_numbers<[1], [0], [0], [1], [0, 0, 1, 1], [], []>} : vector<32x128xbf16>, vector<128x128xbf16>, vector<32x128xf32> -> vector<32x128xf32>
    %73 = arith.addf %3, %72 : vector<32x128xf32>
    %c0_39 = arith.constant 0 : index
    %c0_40 = arith.constant 0 : index
    %c0_41 = arith.constant 0 : index
    %74 = vector.load %arg14[%c0_39, %c0_40, %c0_41] : memref<1x1x128xbf16, #tpu.memory_space<vmem>>, vector<1x1x128xbf16>
    %75 = vector.shape_cast %74 : vector<1x1x128xbf16> to vector<1x128xbf16>
    %76 = arith.mulf %73, %73 : vector<32x128xf32>
    %cst_42 = arith.constant dense<0.000000e+00> : vector<32xf32>
    %77 = vector.multi_reduction <add>, %76, %cst_42 [1] : vector<32x128xf32> to vector<32xf32>
    %78 = vector.shape_cast %77 : vector<32xf32> to vector<32x1xf32>
    %cst_43 = arith.constant 1.280000e+02 : f32
    %79 = vector.broadcast %cst_43 : f32 to vector<32x1xf32>
    %80 = arith.divf %78, %79 : vector<32x1xf32>
    %cst_44 = arith.constant 9.99999997E-7 : f32
    %81 = vector.broadcast %cst_44 : f32 to vector<32x1xf32>
    %82 = arith.addf %80, %81 : vector<32x1xf32>
    %83 = math.rsqrt %82 : vector<32x1xf32>
    %84 = vector.broadcast %83 : vector<32x1xf32> to vector<32x128xf32>
    %85 = arith.mulf %73, %84 : vector<32x128xf32>
    %86 = arith.extf %75 : vector<1x128xbf16> to vector<1x128xf32>
    %87 = vector.broadcast %86 : vector<1x128xf32> to vector<32x128xf32>
    %88 = arith.mulf %85, %87 : vector<32x128xf32>
    %89 = arith.truncf %88 : vector<32x128xf32> to vector<32x128xbf16>
    %c0_45 = arith.constant 0 : index
    %c0_46 = arith.constant 0 : index
    %c0_47 = arith.constant 0 : index
    %90 = vector.load %arg15[%c0_45, %c0_46, %c0_47] : memref<1x128x512xbf16, #tpu.memory_space<vmem>>, vector<1x128x512xbf16>
    %91 = vector.shape_cast %90 : vector<1x128x512xbf16> to vector<128x512xbf16>
    %cst_48 = arith.constant dense<0.000000e+00> : vector<32x512xf32>
    %92 = tpu.matmul %89, %91, %cst_48 {dimension_numbers = #tpu.dot_dimension_numbers<[1], [0], [0], [1], [0, 0, 1, 1], [], []>} : vector<32x128xbf16>, vector<128x512xbf16>, vector<32x512xf32> -> vector<32x512xf32>
    %93 = vector.extract_strided_slice %92 {offsets = [0, 0], sizes = [32, 256], strides = [1, 1]} : vector<32x512xf32> to vector<32x256xf32>
    %94 = vector.extract_strided_slice %92 {offsets = [0, 256], sizes = [32, 256], strides = [1, 1]} : vector<32x512xf32> to vector<32x256xf32>
    %95 = arith.negf %93 : vector<32x256xf32>
    %96 = math.exp %95 : vector<32x256xf32>
    %cst_49 = arith.constant 1.000000e+00 : f32
    %97 = vector.broadcast %cst_49 : f32 to vector<32x256xf32>
    %98 = arith.addf %97, %96 : vector<32x256xf32>
    %99 = arith.divf %97, %98 : vector<32x256xf32>
    %100 = arith.mulf %93, %99 : vector<32x256xf32>
    %101 = arith.mulf %100, %94 : vector<32x256xf32>
    %102 = arith.truncf %101 : vector<32x256xf32> to vector<32x256xbf16>
    %c0_50 = arith.constant 0 : index
    %c0_51 = arith.constant 0 : index
    %c0_52 = arith.constant 0 : index
    %103 = vector.load %arg16[%c0_50, %c0_51, %c0_52] : memref<1x256x128xbf16, #tpu.memory_space<vmem>>, vector<1x256x128xbf16>
    %104 = vector.shape_cast %103 : vector<1x256x128xbf16> to vector<256x128xbf16>
    %cst_53 = arith.constant dense<0.000000e+00> : vector<32x128xf32>
    %105 = tpu.matmul %102, %104, %cst_53 {dimension_numbers = #tpu.dot_dimension_numbers<[1], [0], [0], [1], [0, 0, 1, 1], [], []>} : vector<32x256xbf16>, vector<256x128xbf16>, vector<32x128xf32> -> vector<32x128xf32>
    %106 = arith.addf %73, %105 : vector<32x128xf32>
    %c0_54 = arith.constant 0 : index
    %c0_55 = arith.constant 0 : index
    %107 = vector.load %arg21[%c0_54, %c0_55] : memref<32x128xf32, #tpu.memory_space<vmem>>, vector<32x128xf32>
    tpu.vector_store %arg21[%c0_54, %c0_55], %106 {strides = array<i32>} : memref<32x128xf32, #tpu.memory_space<vmem>>, vector<32x128xf32>,
    %c1_i32 = arith.constant 1 : i32
    %108 = arith.cmpi eq, %arg0, %c1_i32 : i32
    %109 = arith.extui %108 : i1 to i32
    %c0_i32_56 = arith.constant 0 : i32
    %110 = arith.cmpi ne, %109, %c0_i32_56 : i32
    scf.if %110 {
      %c0_57 = arith.constant 0 : index
      %c0_58 = arith.constant 0 : index
      %111 = vector.load %arg17[%c0_57, %c0_58] : memref<1x128xbf16, #tpu.memory_space<vmem>>, vector<1x128xbf16>
      %112 = arith.mulf %106, %106 : vector<32x128xf32>
      %cst_59 = arith.constant dense<0.000000e+00> : vector<32xf32>
      %113 = vector.multi_reduction <add>, %112, %cst_59 [1] : vector<32x128xf32> to vector<32xf32>
      %114 = vector.shape_cast %113 : vector<32xf32> to vector<32x1xf32>
      %cst_60 = arith.constant 1.280000e+02 : f32
      %115 = vector.broadcast %cst_60 : f32 to vector<32x1xf32>
      %116 = arith.divf %114, %115 : vector<32x1xf32>
      %cst_61 = arith.constant 9.99999997E-7 : f32
      %117 = vector.broadcast %cst_61 : f32 to vector<32x1xf32>
      %118 = arith.addf %116, %117 : vector<32x1xf32>
      %119 = math.rsqrt %118 : vector<32x1xf32>
      %120 = vector.broadcast %119 : vector<32x1xf32> to vector<32x128xf32>
      %121 = arith.mulf %106, %120 : vector<32x128xf32>
      %122 = arith.extf %111 : vector<1x128xbf16> to vector<1x128xf32>
      %123 = vector.broadcast %122 : vector<1x128xf32> to vector<32x128xf32>
      %124 = arith.mulf %121, %123 : vector<32x128xf32>
      %125 = arith.truncf %124 : vector<32x128xf32> to vector<32x128xbf16>
      %c0_62 = arith.constant 0 : index
      %c0_63 = arith.constant 0 : index
      %126 = vector.load %arg18[%c0_62, %c0_63] : memref<128x256xbf16, #tpu.memory_space<vmem>>, vector<128x256xbf16>
      %cst_64 = arith.constant dense<0.000000e+00> : vector<32x256xf32>
      %127 = tpu.matmul %125, %126, %cst_64 {dimension_numbers = #tpu.dot_dimension_numbers<[1], [0], [0], [1], [0, 0, 1, 1], [], []>} : vector<32x128xbf16>, vector<128x256xbf16>, vector<32x256xf32> -> vector<32x256xf32>
      %128 = arith.truncf %127 : vector<32x256xf32> to vector<32x256xbf16>
      %c0_65 = arith.constant 0 : index
      %c0_66 = arith.constant 0 : index
      %129 = vector.load %arg19[%c0_65, %c0_66] : memref<32x256xbf16, #tpu.memory_space<vmem>>, vector<32x256xbf16>
      tpu.vector_store %arg19[%c0_65, %c0_66], %128 {strides = array<i32>} : memref<32x256xbf16, #tpu.memory_space<vmem>>, vector<32x256xbf16>,
      %cst_67 = arith.constant dense<0xFF800000> : vector<32xf32>
      %130 = vector.multi_reduction <maximumf>, %127, %cst_67 [1] : vector<32x256xf32> to vector<32xf32>
      %131 = vector.shape_cast %130 : vector<32xf32> to vector<32x1xf32>
      %132 = vector.broadcast %131 : vector<32x1xf32> to vector<32x256xf32>
      %133 = arith.subf %127, %132 : vector<32x256xf32>
      %134 = math.exp %133 : vector<32x256xf32>
      %cst_68 = arith.constant dense<0.000000e+00> : vector<32xf32>
      %135 = vector.multi_reduction <add>, %134, %cst_68 [1] : vector<32x256xf32> to vector<32xf32>
      %136 = vector.shape_cast %135 : vector<32xf32> to vector<32x1xf32>
      %137 = math.log %136 : vector<32x1xf32>
      %138 = arith.addf %137, %131 : vector<32x1xf32>
      %c0_69 = arith.constant 0 : index
      %c0_70 = arith.constant 0 : index
      %139 = vector.load %arg2[%c0_69, %c0_70] : memref<32x256xf32, #tpu.memory_space<vmem>>, vector<32x256xf32>
      %140 = vector.broadcast %138 : vector<32x1xf32> to vector<32x256xf32>
      %141 = arith.subf %140, %127 : vector<32x256xf32>
      %142 = arith.mulf %139, %141 : vector<32x256xf32>
      %143 = vector.shape_cast %142 : vector<32x256xf32> to vector<1x32x256xf32>
      %cst_71 = arith.constant dense<0.000000e+00> : vector<1xf32>
      %144 = vector.multi_reduction <add>, %143, %cst_71 [1, 2] : vector<1x32x256xf32> to vector<1xf32>
      %145 = vector.shape_cast %144 : vector<1xf32> to vector<1x1x1xf32>
      %146 = vector.extract %145[0, 0, 0] : f32 from vector<1x1x1xf32>
      %cst_72 = arith.constant 0.0333333351 : f32
      %147 = arith.mulf %146, %cst_72 : f32
      %c0_73 = arith.constant 0 : index
      %c0_74 = arith.constant 0 : index
      %148 = memref.load %arg20[%c0_73, %c0_74] : memref<1x1xf32, #tpu.memory_space<smem>>
      memref.store %147, %arg20[%c0_73, %c0_74] : memref<1x1xf32, #tpu.memory_space<smem>>
    } else {
    }
    return
  }
  func.func @transform_0(%arg0: i32) -> (i32, i32) {
    %c0_i32 = arith.constant 0 : i32
    %c0_i32_0 = arith.constant 0 : i32
    %c0_i32_1 = arith.constant 0 : i32
    return %c0_i32, %c0_i32_0 : i32, i32
  }
  func.func @transform_1(%arg0: i32) -> (i32, i32) {
    %c0_i32 = arith.constant 0 : i32
    %c0_i32_0 = arith.constant 0 : i32
    %c0_i32_1 = arith.constant 0 : i32
    return %c0_i32, %c0_i32_0 : i32, i32
  }
  func.func @transform_2(%arg0: i32) -> (i32, i32) {
    %c0_i32 = arith.constant 0 : i32
    %c0_i32_0 = arith.constant 0 : i32
    %c0_i32_1 = arith.constant 0 : i32
    return %c0_i32, %c0_i32_0 : i32, i32
  }
  func.func @transform_3(%arg0: i32) -> (i32, i32) {
    %c0_i32 = arith.constant 0 : i32
    %c0_i32_0 = arith.constant 0 : i32
    %c0_i32_1 = arith.constant 0 : i32
    return %c0_i32, %c0_i32_0 : i32, i32
  }
  func.func @transform_4(%arg0: i32) -> (i32, i32) {
    %c0_i32 = arith.constant 0 : i32
    %c0_i32_0 = arith.constant 0 : i32
    %c0_i32_1 = arith.constant 0 : i32
    return %c0_i32, %c0_i32_0 : i32, i32
  }
  func.func @transform_5(%arg0: i32) -> (i32, i32) {
    %c0_i32 = arith.constant 0 : i32
    %c0_i32_0 = arith.constant 0 : i32
    %c0_i32_1 = arith.constant 0 : i32
    return %c0_i32, %c0_i32_0 : i32, i32
  }
  func.func @transform_6(%arg0: i32) -> (i32, i32) {
    %c0_i32 = arith.constant 0 : i32
    %c0_i32_0 = arith.constant 0 : i32
    %c0_i32_1 = arith.constant 0 : i32
    return %c0_i32, %c0_i32_0 : i32, i32
  }
  func.func @transform_7(%arg0: i32) -> (i32, i32) {
    %c0_i32 = arith.constant 0 : i32
    %c0_i32_0 = arith.constant 0 : i32
    %c0_i32_1 = arith.constant 0 : i32
    return %c0_i32, %c0_i32_0 : i32, i32
  }
  func.func @transform_8(%arg0: i32) -> (i32, i32) {
    %c0_i32 = arith.constant 0 : i32
    %c0_i32_0 = arith.constant 0 : i32
    %c0_i32_1 = arith.constant 0 : i32
    return %c0_i32, %c0_i32_0 : i32, i32
  }
  func.func @transform_9(%arg0: i32) -> (i32, i32) {
    %c0_i32 = arith.constant 0 : i32
    %c0_i32_0 = arith.constant 0 : i32
    %c0_i32_1 = arith.constant 0 : i32
    return %c0_i32, %c0_i32_0 : i32, i32
  }
  func.func @transform_10(%arg0: i32) -> (i32, i32, i32) {
    %c0_i32 = arith.constant 0 : i32
    %c0_i32_0 = arith.constant 0 : i32
    %c0_i32_1 = arith.constant 0 : i32
    return %arg0, %c0_i32, %c0_i32_0 : i32, i32, i32
  }
  func.func @transform_11(%arg0: i32) -> (i32, i32, i32) {
    %c0_i32 = arith.constant 0 : i32
    %c0_i32_0 = arith.constant 0 : i32
    %c0_i32_1 = arith.constant 0 : i32
    return %arg0, %c0_i32, %c0_i32_0 : i32, i32, i32
  }
  func.func @transform_12(%arg0: i32) -> (i32, i32, i32) {
    %c0_i32 = arith.constant 0 : i32
    %c0_i32_0 = arith.constant 0 : i32
    %c0_i32_1 = arith.constant 0 : i32
    return %arg0, %c0_i32, %c0_i32_0 : i32, i32, i32
  }
  func.func @transform_13(%arg0: i32) -> (i32, i32, i32) {
    %c0_i32 = arith.constant 0 : i32
    %c0_i32_0 = arith.constant 0 : i32
    %c0_i32_1 = arith.constant 0 : i32
    return %arg0, %c0_i32, %c0_i32_0 : i32, i32, i32
  }
  func.func @transform_14(%arg0: i32) -> (i32, i32, i32) {
    %c0_i32 = arith.constant 0 : i32
    %c0_i32_0 = arith.constant 0 : i32
    %c0_i32_1 = arith.constant 0 : i32
    return %arg0, %c0_i32, %c0_i32_0 : i32, i32, i32
  }
  func.func @transform_15(%arg0: i32) -> (i32, i32, i32) {
    %c0_i32 = arith.constant 0 : i32
    %c0_i32_0 = arith.constant 0 : i32
    %c0_i32_1 = arith.constant 0 : i32
    return %arg0, %c0_i32, %c0_i32_0 : i32, i32, i32
  }
  func.func @transform_16(%arg0: i32) -> (i32, i32) {
    %c0_i32 = arith.constant 0 : i32
    %c0_i32_0 = arith.constant 0 : i32
    %c0_i32_1 = arith.constant 0 : i32
    return %c0_i32, %c0_i32_0 : i32, i32
  }
  func.func @transform_17(%arg0: i32) -> (i32, i32) {
    %c0_i32 = arith.constant 0 : i32
    %c0_i32_0 = arith.constant 0 : i32
    %c0_i32_1 = arith.constant 0 : i32
    return %c0_i32, %c0_i32_0 : i32, i32
  }
  func.func @transform_18(%arg0: i32) -> (i32, i32) {
    %c0_i32 = arith.constant 0 : i32
    %c0_i32_0 = arith.constant 0 : i32
    %c0_i32_1 = arith.constant 0 : i32
    return %c0_i32, %c0_i32_0 : i32, i32
  }
  func.func @transform_19(%arg0: i32) -> (i32, i32) {
    %c0_i32 = arith.constant 0 : i32
    %c0_i32_0 = arith.constant 0 : i32
    %c0_i32_1 = arith.constant 0 : i32
    return %c0_i32, %c0_i32_0 : i32, i32
  }
}

</mosaic_0001>

<bundles_post_ra>
// kernel: tile.13
= control target key start
LH: loop header
LB: loop body
LE: loop exit
PB: predicated region body
PF: predicated region fallthrough
CT: control target
= control target key end

     0   :  { %s312_s0 = inlined_call_operand.vmem [shape: f32[16,32], index: 0, kind: input, shape index: {}]   ;;  %s313_s1 = inlined_call_operand.vmem [shape: f32[2,16,4,32], index: 1, kind: output, shape index: {}]  }
   0x1   :  { %v4_v0 = vld [vmem:[%s312_s0] ss:$0 sm:$0xff]  ;;  %v113_v1 = vld [vmem:[%s312_s0 + $0x1] ss:$0 sm:$0xff]  ;;  %v116_v2 = vld [vmem:[%s312_s0 + $0x2] ss:$0 sm:$0xff] }
   0x2   :  { %5 = vst [vmem:[%s313_s1] sm:$0xf] %v4_v0  ;;  %v119_v3 = vld [vmem:[%s312_s0 + $0x3] ss:$0 sm:$0xff]  ;;  %v122_v4 = vld [vmem:[%s312_s0 + $0x4] ss:$0 sm:$0xff] }
   0x3   :  { %112 = vst [vmem:[%s313_s1 + $0x40] sm:$0xf] %v4_v0  ;;  %v125_v5 = vld [vmem:[%s312_s0 + $0x5] ss:$0 sm:$0xff]  ;;  %v128_v6 = vld [vmem:[%s312_s0 + $0x6] ss:$0 sm:$0xff] }
   0x4   :  { %114 = vst [vmem:[%s313_s1 + $0x4] sm:$0xf] %v113_v1  ;;  %v131_v7 = vld [vmem:[%s312_s0 + $0x7] ss:$0 sm:$0xff]  ;;  %v134_v8 = vld [vmem:[%s312_s0 + $0x8] ss:$0 sm:$0xff] }
   0x5   :  { %115 = vst [vmem:[%s313_s1 + $0x44] sm:$0xf] %v113_v1  ;;  %v137_v9 = vld [vmem:[%s312_s0 + $0x9] ss:$0 sm:$0xff]  ;;  %v140_v10 = vld [vmem:[%s312_s0 + $0xa] ss:$0 sm:$0xff] }
   0x6   :  { %117 = vst [vmem:[%s313_s1 + $0x8] sm:$0xf] %v116_v2  ;;  %v143_v11 = vld [vmem:[%s312_s0 + $0xb] ss:$0 sm:$0xff]  ;;  %v146_v12 = vld [vmem:[%s312_s0 + $0xc] ss:$0 sm:$0xff] }
   0x7   :  { %118 = vst [vmem:[%s313_s1 + $0x48] sm:$0xf] %v116_v2  ;;  %v149_v13 = vld [vmem:[%s312_s0 + $0xd] ss:$0 sm:$0xff]  ;;  %v152_v14 = vld [vmem:[%s312_s0 + $0xe] ss:$0 sm:$0xff] }
   0x8   :  { %120 = vst [vmem:[%s313_s1 + $0xc] sm:$0xf] %v119_v3  ;;  %v155_v15 = vld [vmem:[%s312_s0 + $0xf] ss:$0 sm:$0xff] }
   0x9   :  { %121 = vst [vmem:[%s313_s1 + $0x4c] sm:$0xf] %v119_v3 }
   0xa   :  { %123 = vst [vmem:[%s313_s1 + $0x10] sm:$0xf] %v122_v4 }
   0xb   :  { %124 = vst [vmem:[%s313_s1 + $0x50] sm:$0xf] %v122_v4 }
   0xc   :  { %126 = vst [vmem:[%s313_s1 + $0x14] sm:$0xf] %v125_v5 }
   0xd   :  { %127 = vst [vmem:[%s313_s1 + $0x54] sm:$0xf] %v125_v5 }
   0xe   :  { %129 = vst [vmem:[%s313_s1 + $0x18] sm:$0xf] %v128_v6 }
   0xf   :  { %130 = vst [vmem:[%s313_s1 + $0x58] sm:$0xf] %v128_v6 }
  0x10   :  { %132 = vst [vmem:[%s313_s1 + $0x1c] sm:$0xf] %v131_v7 }
  0x11   :  { %133 = vst [vmem:[%s313_s1 + $0x5c] sm:$0xf] %v131_v7 }
  0x12   :  { %135 = vst [vmem:[%s313_s1 + $0x20] sm:$0xf] %v134_v8 }
  0x13   :  { %136 = vst [vmem:[%s313_s1 + $0x60] sm:$0xf] %v134_v8 }
  0x14   :  { %138 = vst [vmem:[%s313_s1 + $0x24] sm:$0xf] %v137_v9 }
  0x15   :  { %139 = vst [vmem:[%s313_s1 + $0x64] sm:$0xf] %v137_v9 }
  0x16   :  { %141 = vst [vmem:[%s313_s1 + $0x28] sm:$0xf] %v140_v10 }
  0x17   :  { %142 = vst [vmem:[%s313_s1 + $0x68] sm:$0xf] %v140_v10 }
  0x18   :  { %144 = vst [vmem:[%s313_s1 + $0x2c] sm:$0xf] %v143_v11 }
  0x19   :  { %145 = vst [vmem:[%s313_s1 + $0x6c] sm:$0xf] %v143_v11 }
  0x1a   :  { %147 = vst [vmem:[%s313_s1 + $0x30] sm:$0xf] %v146_v12 }
  0x1b   :  { %148 = vst [vmem:[%s313_s1 + $0x70] sm:$0xf] %v146_v12 }
  0x1c   :  { %150 = vst [vmem:[%s313_s1 + $0x34] sm:$0xf] %v149_v13 }
  0x1d   :  { %151 = vst [vmem:[%s313_s1 + $0x74] sm:$0xf] %v149_v13 }
  0x1e   :  { %153 = vst [vmem:[%s313_s1 + $0x38] sm:$0xf] %v152_v14 }
  0x1f   :  { %154 = vst [vmem:[%s313_s1 + $0x78] sm:$0xf] %v152_v14 }
  0x20   :  { %156 = vst [vmem:[%s313_s1 + $0x3c] sm:$0xf] %v155_v15 }
  0x21   :  { %157 = vst [vmem:[%s313_s1 + $0x7c] sm:$0xf] %v155_v15 }

// kernel: tile.14
= control target key start
LH: loop header
LB: loop body
LE: loop exit
PB: predicated region body
PF: predicated region fallthrough
CT: control target
= control target key end

     0   :  { %vm132_vm0 = vcmask 1047556   ;;  %s338_s15 = smov 96   ;;  %s339_s30 = smov 64   ;;  %vm134_vm1 = vcmask 261120   ;;  %vm171_vm2 = vcmask 1048320   ;;  %vm214_vm3 = vcmask 785920   ;;  %s535_s0 = inlined_call_operand.vmem [shape: f32[2,16,4,32], index: 0, kind: input, shape index: {}]   ;;  %s536_s1 = inlined_call_operand.vmem [shape: f32[32,128], index: 1, kind: output, shape index: {}]  }
   0x1   :  { %v316_v0 = vld [vmem:[%s535_s0 + $0x1c] sm:$0xf]  ;;  %v317_v1 = vld [vmem:[%s535_s0 + $0x18] sm:$0xf]  ;;  %v318_v2 = vld [vmem:[%s535_s0 + $0x14] sm:$0xf] }
   0x2   :  { %103 = vst [vmem:[#allocation0 + $0x38] sm:$0xf] %v316_v0  ;;  %v319_v3 = vld [vmem:[%s535_s0 + $0x10] sm:$0xf]  ;;  %v320_v4 = vld [vmem:[%s535_s0 + $0xc] sm:$0xf] }
   0x3   :  { %107 = vst [vmem:[#allocation0 + $0x30] sm:$0xf] %v317_v1  ;;  %v321_v5 = vld [vmem:[%s535_s0 + $0x8] sm:$0xf]  ;;  %v322_v6 = vld [vmem:[%s535_s0 + $0x4] sm:$0xf] }
   0x4   :  { %111 = vst [vmem:[#allocation0 + $0x28] sm:$0xf] %v318_v2  ;;  %v128_v7 = vld [vmem:[%s535_s0] sm:$0xf]  ;;  %v300_v8 = vld [vmem:[%s535_s0 + $0x5c] sm:$0xf] }
   0x5   :  { %115 = vst [vmem:[#allocation0 + $0x20] sm:$0xf] %v319_v3  ;;  %v301_v9 = vld [vmem:[%s535_s0 + $0x58] sm:$0xf]  ;;  %v302_v10 = vld [vmem:[%s535_s0 + $0x54] sm:$0xf] }
   0x6   :  { %119 = vst [vmem:[#allocation0 + $0x18] sm:$0xf] %v320_v4  ;;  %v303_v11 = vld [vmem:[%s535_s0 + $0x50] sm:$0xf]  ;;  %v304_v12 = vld [vmem:[%s535_s0 + $0x4c] sm:$0xf] }
   0x7   :  { %123 = vst [vmem:[#allocation0 + $0x10] sm:$0xf] %v321_v5  ;;  %v305_v13 = vld [vmem:[%s535_s0 + $0x48] sm:$0xf]  ;;  %v306_v14 = vld [vmem:[%s535_s0 + $0x44] sm:$0xf] }
   0x8   :  { %127 = vst [vmem:[#allocation0 + $0x8] sm:$0xf] %v322_v6  ;;  %v307_v15 = vld [vmem:[%s535_s0 + $0x40] sm:$0xf]  ;;  %v308_v17 = vld [vmem:[%s535_s0 + $0x3c] sm:$0xf] }
   0x9   :  { %129 = vst [vmem:[#allocation0] sm:$0xf] %v128_v7  ;;  %v309_v18 = vld [vmem:[%s535_s0 + $0x38] sm:$0xf]  ;;  %v310_v21 = vld [vmem:[%s535_s0 + $0x34] sm:$0xf] }
   0xa   :  { %39 = vst [vmem:[#allocation0 + $0xb8] sm:$0xf] %v300_v8  ;;  %v311_v22 = vld [vmem:[%s535_s0 + $0x30] sm:$0xf]  ;;  %v312_v23 = vld [vmem:[%s535_s0 + $0x2c] sm:$0xf] }
   0xb   :  { %43 = vst [vmem:[#allocation0 + $0xb0] sm:$0xf] %v301_v9  ;;  %v313_v24 = vld [vmem:[%s535_s0 + $0x28] sm:$0xf]  ;;  %v314_v25 = vld [vmem:[%s535_s0 + $0x24] sm:$0xf] }
   0xc   :  { %47 = vst [vmem:[#allocation0 + $0xa8] sm:$0xf] %v302_v10  ;;  %v166_v16 = vld [vmem:[#allocation0 + $0x3] ss:$8 sm:$0xf0]   ;;  %vm257_vm4 = vcmask 523520  }
   0xd   :  { %51 = vst [vmem:[#allocation0 + $0xa0] sm:$0xf] %v303_v11  ;;  %v315_v26 = vld [vmem:[%s535_s0 + $0x20] sm:$0xf]  ;;  %v292_v30 = vld [vmem:[%s535_s0 + $0x7c] sm:$0xf] }
   0xe   :  { %55 = vst [vmem:[#allocation0 + $0x98] sm:$0xf] %v304_v12  ;;  %v209_v29 = vld [vmem:[#allocation0 + $0x2] ss:$8 sm:$0xf0]  }
   0xf   :  { %59 = vst [vmem:[#allocation0 + $0x90] sm:$0xf] %v305_v13  ;;  %v293_v31 = vld [vmem:[%s535_s0 + $0x78] sm:$0xf]  ;;  %v294_v35 = vld [vmem:[%s535_s0 + $0x74] sm:$0xf] }
  0x10   :  { %v164_v19 = vld [vmem:[#allocation0 + $0x3] ss:$8 sm:$0xf]   ;;  %63 = vst [vmem:[#allocation0 + $0x88] sm:$0xf] %v306_v14 }
  0x11   :  { %v168_v20 = vsel %vm132_vm0, %v166_v16, %v164_v19  ;;  %67 = vst [vmem:[#allocation0 + $0x80] sm:$0xf] %v307_v15  ;;  %v207_v27 = vld [vmem:[#allocation0 + $0x2] ss:$8 sm:$0xf]  }
  0x12   :  { %169 = vrot.lane.b32.xlu0 %v168_v20, %s338_s15  ;;  %71 = vst [vmem:[#allocation0 + $0x78] sm:$0xf] %v308_v17  ;;  %v211_v32 = vsel %vm132_vm0, %v209_v29, %v207_v27  ;;  %v295_v36 = vld [vmem:[%s535_s0 + $0x70] sm:$0xf]  ;;  %v296_v37 = vld [vmem:[%s535_s0 + $0x6c] sm:$0xf] }
  0x13   :  { %75 = vst [vmem:[#allocation0 + $0x70] sm:$0xf] %v309_v18  ;;  %212 = vrot.lane.b32.xlu2 %v211_v32, %s339_s30  ;;  %v297_v38 = vld [vmem:[%s535_s0 + $0x68] sm:$0xf]  ;;  %v298_v39 = vld [vmem:[%s535_s0 + $0x64] sm:$0xf] }
  0x14   :  { %79 = vst [vmem:[#allocation0 + $0x68] sm:$0xf] %v310_v21  ;;  %v187_v28 = vld [vmem:[#allocation0 + $0x83] ss:$8 sm:$0xf0]  }
  0x15   :  { %83 = vst [vmem:[#allocation0 + $0x60] sm:$0xf] %v311_v22  ;;  %v299_v40 = vld [vmem:[%s535_s0 + $0x60] sm:$0xf]  ;;  %s340_s0 = smov 32  }
  0x16   :  { %87 = vst [vmem:[#allocation0 + $0x58] sm:$0xf] %v312_v23  ;;  %v230_v48 = vld [vmem:[#allocation0 + $0x82] ss:$8 sm:$0xf0]  }
  0x17   :  { %91 = vst [vmem:[#allocation0 + $0x50] sm:$0xf] %v313_v24  ;;  %v250_v49 = vld [vmem:[#allocation0 + $0x1] ss:$8 sm:$0xf]  }
  0x18   :  { %v185_v33 = vld [vmem:[#allocation0 + $0x83] ss:$8 sm:$0xf]   ;;  %95 = vst [vmem:[#allocation0 + $0x48] sm:$0xf] %v314_v25 }
  0x19   :  { %v189_v34 = vsel %vm132_vm0, %v187_v28, %v185_v33  ;;  %99 = vst [vmem:[#allocation0 + $0x40] sm:$0xf] %v315_v26  ;;  %v228_v47 = vld [vmem:[#allocation0 + $0x82] ss:$8 sm:$0xf]  }
  0x1a   :  { %190 = vrot.lane.b32.xlu1 %v189_v34, %s338_s15  ;;  %7 = vst [vmem:[#allocation0 + $0xf8] sm:$0xf] %v292_v30  ;;  %v252_v51 = vld [vmem:[#allocation0 + $0x1] ss:$8 sm:$0xf0]   ;;  %v232_v52 = vsel %vm132_vm0, %v230_v48, %v228_v47 }
  0x1b   :  { %11 = vst [vmem:[#allocation0 + $0xf0] sm:$0xf] %v293_v31  ;;  %v254_v55 = vsel %vm132_vm0, %v252_v51, %v250_v49  ;;  %v271_v1 = vld [vmem:[#allocation0 + $0x81] ss:$8 sm:$0xf]  }
  0x1c   :  { %15 = vst [vmem:[#allocation0 + $0xe8] sm:$0xf] %v294_v35  ;;  %v176_v41 = vld [vmem:[#allocation0 + $0x43] ss:$8 sm:$0xf0]  }
  0x1d   :  { %19 = vst [vmem:[#allocation0 + $0xe0] sm:$0xf] %v295_v36  ;;  %v219_v42 = vld [vmem:[#allocation0 + $0x42] ss:$8 sm:$0xf0]  }
  0x1e   :  { %23 = vst [vmem:[#allocation0 + $0xd8] sm:$0xf] %v296_v37  ;;  %v262_v57 = vld [vmem:[#allocation0 + $0x41] ss:$8 sm:$0xf0]  }
  0x1f   :  { %27 = vst [vmem:[#allocation0 + $0xd0] sm:$0xf] %v297_v38  ;;  %v273_v2 = vld [vmem:[#allocation0 + $0x81] ss:$8 sm:$0xf0]  }
  0x20   :  { %v174_v43 = vld [vmem:[#allocation0 + $0x43] ss:$8 sm:$0xf]   ;;  %31 = vst [vmem:[#allocation0 + $0xc8] sm:$0xf] %v298_v39  ;;  %v275_v3 = vsel %vm132_vm0, %v273_v2, %v271_v1 }
  0x21   :  { %v178_v44 = vsel %vm132_vm0, %v176_v41, %v174_v43  ;;  %35 = vst [vmem:[#allocation0 + $0xc0] sm:$0xf] %v299_v40  ;;  %v217_v45 = vld [vmem:[#allocation0 + $0x42] ss:$8 sm:$0xf]  }
  0x22   :  { %179 = vrot.lane.b32.xlu0 %v178_v44, %s338_s15  ;;  %v221_v46 = vsel %vm132_vm0, %v219_v42, %v217_v45  ;;  %v260_v56 = vld [vmem:[#allocation0 + $0x41] ss:$8 sm:$0xf]   ;;  %v130_v4 = vld [vmem:[#allocation0] ss:$8 sm:$0xf]  }
  0x23   :  { %222 = vrot.lane.b32.xlu2 %v221_v46, %s339_s30  ;;  %v264_v63 = vsel %vm132_vm0, %v262_v57, %v260_v56  ;;  %v131_v5 = vld [vmem:[#allocation0] ss:$8 sm:$0xf0]  }
  0x24   :  { %v198_v50 = vld [vmem:[#allocation0 + $0xc3] ss:$8 sm:$0xf0]   ;;  %v241_v59 = vld [vmem:[#allocation0 + $0xc2] ss:$8 sm:$0xf0]   ;;  %v133_v6 = vsel %vm132_vm0, %v131_v5, %v130_v4 }
  0x25   :  { %v284_v61 = vld [vmem:[#allocation0 + $0xc1] ss:$8 sm:$0xf0]   ;;  %135 = vst.msk [vmem:[%s536_s1] sm:$0xff] %vm134_vm1, %v133_v6  }
  0x26   :  { %v146_v7 = vld [vmem:[#allocation0 + $0x80] ss:$8 sm:$0xf]  }
  0x27   :  { %v148_v8 = vld [vmem:[#allocation0 + $0x80] ss:$8 sm:$0xf0]  }
  0x28   :  { %v196_v53 = vld [vmem:[#allocation0 + $0xc3] ss:$8 sm:$0xf]   ;;  %v239_v58 = vld [vmem:[#allocation0 + $0xc2] ss:$8 sm:$0xf]   ;;  %v150_v9 = vsel %vm132_vm0, %v148_v8, %v146_v7 }
  0x29   :  { %v200_v54 = vsel %vm132_vm0, %v198_v50, %v196_v53  ;;  %v282_v60 = vld [vmem:[#allocation0 + $0xc1] ss:$8 sm:$0xf]   ;;  %v243_v62 = vsel %vm132_vm0, %v241_v59, %v239_v58  ;;  %324 = vst.msk [vmem:[%s536_s1 + $0x10] sm:$0xff] %vm134_vm1, %v150_v9  }
  0x2a   :  { %201 = vrot.lane.b32.xlu1 %v200_v54, %s338_s15  ;;  %233 = vrot.lane.b32.xlu0 %v232_v52, %s339_s30  ;;  %v286_v0 = vsel %vm132_vm0, %v284_v61, %v282_v60  ;;  %v137_v11 = vld [vmem:[#allocation0 + $0x40] ss:$8 sm:$0xf]  }
  0x2b   :  { %255 = vrot.lane.b32.xlu2 %v254_v55, %s340_s0  ;;  %v139_v12 = vld [vmem:[#allocation0 + $0x40] ss:$8 sm:$0xf0]  }
  0x2c   :  { %v141_v13 = vsel %vm132_vm0, %v139_v12, %v137_v11  ;;  %v155_v14 = vld [vmem:[#allocation0 + $0xc0] ss:$8 sm:$0xf]  }
  0x2d   :  { %323 = vst.msk [vmem:[%s536_s1 + $0x8] sm:$0xff] %vm134_vm1, %v141_v13   ;;  %v157_v15 = vld [vmem:[#allocation0 + $0xc0] ss:$8 sm:$0xf0]  }
  0x2e   :  { %v159_v16 = vsel %vm132_vm0, %v157_v15, %v155_v14 }
  0x2f   :  { %325 = vst.msk [vmem:[%s536_s1 + $0x18] sm:$0xff] %vm134_vm1, %v159_v16  }
  0x32   :  { %244 = vrot.lane.b32.xlu1 %v243_v62, %s339_s30  ;;  %265 = vrot.lane.b32.xlu0 %v264_v63, %s340_s0 }
  0x33   :  { %287 = vrot.lane.b32.xlu2 %v286_v0, %s340_s0 }
  0x3a   :  { %276 = vrot.lane.b32.xlu1 %v275_v3, %s340_s0 }
  0x6d   :  { %v213_v10 = vpop.permute.xlu2 %212  }
  0x7d   :  { %v223_v17 = vpop.permute.xlu2 %222  }
  0x84   :  { %v170_v18 = vpop.permute.xlu0 %169  }
  0x85   :  { %172 = vst.msk [vmem:[%s536_s1] sm:$0xff] %vm171_vm2, %v170_v18   ;;  %v256_v19 = vpop.permute.xlu2 %255  }
  0x86   :  { %215 = vst.msk [vmem:[%s536_s1] sm:$0xff] %vm214_vm3, %v213_v10  }
  0x87   :  { %258 = vst.msk [vmem:[%s536_s1] sm:$0xff] %vm257_vm4, %v256_v19  }
  0x8c   :  { %v191_v20 = vpop.permute.xlu1 %190  }
  0x8d   :  { %327 = vst.msk [vmem:[%s536_s1 + $0x10] sm:$0xff] %vm171_vm2, %v191_v20   ;;  %v288_v21 = vpop.permute.xlu2 %287  }
  0x94   :  { %v180_v22 = vpop.permute.xlu0 %179  }
  0x95   :  { %326 = vst.msk [vmem:[%s536_s1 + $0x8] sm:$0xff] %vm171_vm2, %v180_v22  }
  0x96   :  { %329 = vst.msk [vmem:[%s536_s1 + $0x8] sm:$0xff] %vm214_vm3, %v223_v17  }
  0x9c   :  { %v202_v23 = vpop.permute.xlu1 %201   ;;  %v234_v24 = vpop.permute.xlu0 %233  }
  0x9d   :  { %328 = vst.msk [vmem:[%s536_s1 + $0x18] sm:$0xff] %vm171_vm2, %v202_v23  }
  0x9e   :  { %330 = vst.msk [vmem:[%s536_s1 + $0x10] sm:$0xff] %vm214_vm3, %v234_v24  }
  0xa4   :  { %v245_v25 = vpop.permute.xlu1 %244   ;;  %v266_v26 = vpop.permute.xlu0 %265  }
  0xa5   :  { %331 = vst.msk [vmem:[%s536_s1 + $0x18] sm:$0xff] %vm214_vm3, %v245_v25  }
  0xa6   :  { %332 = vst.msk [vmem:[%s536_s1 + $0x8] sm:$0xff] %vm257_vm4, %v266_v26  }
  0xa7   :  { %334 = vst.msk [vmem:[%s536_s1 + $0x18] sm:$0xff] %vm257_vm4, %v288_v21  }
  0xac   :  { %v277_v27 = vpop.permute.xlu1 %276  }
  0xad   :  { %333 = vst.msk [vmem:[%s536_s1 + $0x10] sm:$0xff] %vm257_vm4, %v277_v27  }

// kernel: eq.86
= control target key start
LH: loop header
LB: loop body
LE: loop exit
PB: predicated region body
PF: predicated region fallthrough
CT: control target
= control target key end

     0   :  { %vm7_vm0 = vcmask 130048   ;;  %vm13_vm1 = vcmask 261248   ;;  %s39_s0 = inlined_call_operand.vmem [shape: s32[2,16], index: 0, kind: input, shape index: {}]   ;;  %s40_s1 = inlined_call_operand.vmem [shape: s32[32], index: 1, kind: output, shape index: {}]  }
   0x1   :  { %v4_v0 = vld [vmem:[%s39_s0] sm:$0x3]  ;;  %s22_s0 = smov 16  }
   0x2   :  { %5 = vst [vmem:[#allocation1] sm:$0x3] %v4_v0 }
   0x9   :  { %v10_v1 = vld [vmem:[#allocation1 + $0x1] sm:$0x1]   ;;  %v6_v2 = vld [vmem:[#allocation1] sm:$0x1]  }
   0xa   :  { %11 = vrot.lane.b32.xlu0 %v10_v1, %s22_s0  ;;  %8 = vst.msk [vmem:[#allocation0] sm:$0x1] %vm7_vm0, %v6_v2  }
  0x7c   :  { %v12_v3 = vpop.permute.xlu0 %11  }
  0x7d   :  { %14 = vst.msk [vmem:[#allocation0] sm:$0x1] %vm13_vm1, %v12_v3  }
  0x84   :  { %v17_v4 = vld [vmem:[#allocation0] sm:$0x1] }
  0x85   :  { %20 = vst [vmem:[%s40_s1] sm:$0x1] %v17_v4 }

// kernel: llama_reader_forward.1
= control target key start
LH: loop header
LB: loop body
LE: loop exit
PB: predicated region body
PF: predicated region fallthrough
CT: control target
= control target key end

     0   :  { %s5283_s0 = inlined_call_operand.vmem [shape: bf16[32,256], index: 0, kind: input, shape index: {}]   ;;  %s5284_s1 = inlined_call_operand.vmem [shape: f32[32,256], index: 1, kind: input, shape index: {}]   ;;  %s5285_s2 = inlined_call_operand.vmem [shape: bf16[256,128], index: 2, kind: input, shape index: {}]   ;;  %s5286_s3 = inlined_call_operand.vmem [shape: f32[32,128], index: 3, kind: input, shape index: {}]   ;;  %s5287_s4 = inlined_call_operand.vmem [shape: f32[32,128], index: 4, kind: input, shape index: {}]   ;;  %s5288_s5 = inlined_call_operand.vmem [shape: bf16[128,128], index: 5, kind: input, shape index: {}]   ;;  %s5289_s6 = inlined_call_operand.vmem [shape: bf16[128,32], index: 6, kind: input, shape index: {}]   ;;  %s5290_s7 = inlined_call_operand.vmem [shape: bf16[32,128], index: 7, kind: input, shape index: {}]   ;;  %s5291_s8 = inlined_call_operand.vmem [shape: f32[128,128], index: 8, kind: input, shape index: {}]   ;;  %s5292_s9 = inlined_call_operand.vmem [shape: f32[128,128], index: 9, kind: input, shape index: {}]   ;;  %s5293_s10 = inlined_call_operand.vmem [shape: bf16[2,1,128], index: 10, kind: input, shape index: {}]   ;;  %s5294_s11 = inlined_call_operand.vmem [shape: bf16[2,128,384], index: 11, kind: input, shape index: {}]   ;;  %s5295_s12 = inlined_call_operand.vmem [shape: bf16[2,128,128], index: 12, kind: input, shape index: {}]   ;;  %s5296_s13 = inlined_call_operand.vmem [shape: bf16[2,1,128], index: 13, kind: input, shape index: {}]   ;;  %s5297_s14 = inlined_call_operand.vmem [shape: bf16[2,128,512], index: 14, kind: input, shape index: {}]   ;;  %s5298_s15 = inlined_call_operand.vmem [shape: bf16[2,256,128], index: 15, kind: input, shape index: {}]   ;;  %s5299_s16 = inlined_call_operand.vmem [shape: bf16[1,128], index: 16, kind: input, shape index: {}]   ;;  %s5300_s17 = inlined_call_operand.vmem [shape: bf16[128,256], index: 17, kind: input, shape index: {}]   ;;  %s5301_s18 = inlined_call_operand.hbm [shape: bf16[32,256], index: 18, kind: output, shape index: {0}]   ;;  %s5302_s19 = inlined_call_operand.hbm [shape: f32[1,1], index: 19, kind: output, shape index: {1}]  }
   0x1   :  { %5309 = sst [smem:[#allocation10_spill]] %s5283_s0 }
   0x2   :  { %5310 = sst [smem:[#allocation11_spill]] %s5284_s1 }
   0x3   :  { %5311 = sst [smem:[#allocation12_spill]] %s5285_s2 }
   0x4   :  { %5312 = sst [smem:[#allocation13_spill]] %s5286_s3 }
   0x5   :  { %5313 = sst [smem:[#allocation14_spill]] %s5299_s16 }
   0x6   :  { %5314 = sst [smem:[#allocation15_spill]] %s5300_s17 }
   0x7   :  { %5315 = sst [smem:[#allocation16_spill]] %s5301_s18 }
   0x8   :  { %5316 = sst [smem:[#allocation17_spill]] %s5302_s19 }
   0x9   :  { %25 = vsyncpa [#allocation4], 0 }
   0xa   :  { %26 = vsyncpa [#allocation5], 0  ;;  %s4247_s0 = smov 0  }
   0xb LB: > { %5317 = sst [smem:[#allocation9_spill]] %s4140_s0  ;;  %s4253_s30 = sadd.s32 4294967295, %s4140_s0   ;;  %s4140_s0 = sphi %s4247_s0, %s32_s0  }
   0xc   : > { %p3143_p0 = scmp.ge.s32.totalorder %s4140_s0, 1  ;;  %p578_p1 = scmp.lt.s32.totalorder %s4140_s0, 3 }
   0xe   : > { %p579_p2 = pnand %p3143_p0, %p578_p1 }
   0xf   : > { %p650_p3 = scmp.lt.s32.totalorder (!%p579_p2), %s4253_s30, 1  ;;  %p3151_p4 = scmp.ne.s32.totalorder (!%p579_p2), %s4253_s30, 0 }
  0x10   : > { %582 = sbr.rel (%p579_p2) target bundleno = 3236 (0xca4), region = 92 }
  0x15   : > { %s4259_s20 = scalar_select %p650_p3, %s4253_s30, 1 }
  0x16   : > { %680 = sbr.rel (%p3151_p4) target bundleno = 204 (0xcc), region = 96  ;;  %s5318_s0 = sld [smem:[#allocation12_spill]] (!%p3151_p4) }
  0x17   : > { %s3906_s2 = smul.u32 192, %s4259_s20  ;;  %s3727_s23 = sshll.u32 %s4259_s20, 6 }
  0x18   : > { %s4279_s21 = scalar_lea.vmem %s5295_s12, %s3727_s23  ;;  %s3728_s1 = sshll.u32 %s4259_s20, 8 }
  0x19   : > { %s4274_s28 = scalar_lea.vmem %s5294_s11, %s3906_s2  ;;  %s3729_s19 = sshll.u32 %s4259_s20, 7 }
  0x1a   : > { %s4286_s16 = scalar_lea.vmem %s5297_s14, %s3728_s1  ;;  %s4291_s25 = scalar_lea.vmem %s5298_s15, %s3729_s19 }
  0x1c   : > { %s5319_s27 = smov %s5318_s0  ;;  %v3741_v0 = vld [vmem:[%s5318_s0 + $0x38] sm:$0xff]  ;;  %s5320_s0 = sld [smem:[#allocation10_spill]] }
  0x1d   : > { %v3749_v1 = vld [vmem:[%s5319_s27 + $0x78] sm:$0xff]  ;;  %833 = vmatpush.bf16.msra.mxu0 %v3741_v0  ;;  %3864 = vmatpush.bf16.msra.mxu2 %v3741_v0  ;;  %v3740_v2 = vld [vmem:[%s5319_s27 + $0x30] sm:$0xff]  ;;  %v3739_v4 = vld [vmem:[%s5319_s27 + $0x28] sm:$0xff] }
  0x1e   : > { %852 = vmatpush.bf16.msra.mxu1 %v3749_v1  ;;  %3872 = vmatpush.bf16.msra.mxu3 %v3749_v1  ;;  %v3748_v3 = vld [vmem:[%s5319_s27 + $0x70] sm:$0xff]  ;;  %v3747_v5 = vld [vmem:[%s5319_s27 + $0x68] sm:$0xff]  ;;  %v3738_v6 = vld [vmem:[%s5319_s27 + $0x20] sm:$0xff] }
  0x1f   : > { %v3746_v7 = vld [vmem:[%s5319_s27 + $0x60] sm:$0xff]  ;;  %v3737_v8 = vld [vmem:[%s5319_s27 + $0x18] sm:$0xff]  ;;  %v3736_v10 = vld [vmem:[%s5319_s27 + $0x10] sm:$0xff] }
  0x20   : > { %v3745_v9 = vld [vmem:[%s5319_s27 + $0x58] sm:$0xff]  ;;  %v3744_v11 = vld [vmem:[%s5319_s27 + $0x50] sm:$0xff]  ;;  %v3735_v12 = vld [vmem:[%s5319_s27 + $0x8] sm:$0xff] }
  0x21   : > { %834 = vmatpush.bf16.msra.mxu0 %v3740_v2  ;;  %3865 = vmatpush.bf16.msra.mxu2 %v3740_v2  ;;  %v3743_v13 = vld [vmem:[%s5319_s27 + $0x48] sm:$0xff]  ;;  %v3734_v14 = vld [vmem:[%s5319_s27] sm:$0xff] }
  0x22   : > { %853 = vmatpush.bf16.msra.mxu1 %v3748_v3  ;;  %3873 = vmatpush.bf16.msra.mxu3 %v3748_v3  ;;  %v3742_v15 = vld [vmem:[%s5319_s27 + $0x40] sm:$0xff]  ;;  %s5321_s3 = smov %s5320_s0 }
  0x23   : > { %v3154_v16 = vld [vmem:[%s5320_s0] sm:$0xf]  ;;  %v3731_v17 = vld [vmem:[%s5321_s3 + $0x4] sm:$0xf0]  ;;  %v3162_v18 = vld [vmem:[%s5321_s3 + $0x10] sm:$0xf] }
  0x24   : > { %v3733_v19 = vld [vmem:[%s5321_s3 + $0x14] sm:$0xf0]  ;;  %v3730_v20 = vld [vmem:[%s5321_s3 + $0x4] sm:$0xf]  ;;  %v3156_v21 = vld [vmem:[%s5321_s3 + $0x8] sm:$0xf0]  ;;  %v3155_v24 = vor.u32 %v3731_v17, %v3154_v16 }
  0x25   : > { %835 = vmatpush.bf16.msra.mxu0 %v3739_v4  ;;  %3866 = vmatpush.bf16.msra.mxu2 %v3739_v4  ;;  %v3732_v22 = vld [vmem:[%s5321_s3 + $0x14] sm:$0xf]  ;;  %v3164_v23 = vld [vmem:[%s5321_s3 + $0x18] sm:$0xf0]  ;;  %v3163_v25 = vor.u32 %v3733_v19, %v3162_v18  ;;  %v3159_v26 = vor.u32 %v3730_v20, %v3156_v21 }
  0x26   : > { %854 = vmatpush.bf16.msra.mxu1 %v3747_v5  ;;  %3874 = vmatpush.bf16.msra.mxu3 %v3747_v5  ;;  %v3167_v27 = vor.u32 %v3732_v22, %v3164_v23 }
  0x29   : > { %836 = vmatpush.bf16.msra.mxu0 %v3738_v6  ;;  %3867 = vmatpush.bf16.msra.mxu2 %v3738_v6 }
  0x2a   : > { %855 = vmatpush.bf16.msra.mxu1 %v3746_v7  ;;  %3875 = vmatpush.bf16.msra.mxu3 %v3746_v7 }
  0x2d   : > { %837 = vmatpush.bf16.msra.mxu0 %v3737_v8  ;;  %3868 = vmatpush.bf16.msra.mxu2 %v3737_v8 }
  0x2e   : > { %856 = vmatpush.bf16.msra.mxu1 %v3745_v9  ;;  %3876 = vmatpush.bf16.msra.mxu3 %v3745_v9 }
  0x31   : > { %838 = vmatpush.bf16.msra.mxu0 %v3736_v10  ;;  %3869 = vmatpush.bf16.msra.mxu2 %v3736_v10 }
  0x32   : > { %857 = vmatpush.bf16.msra.mxu1 %v3744_v11  ;;  %3877 = vmatpush.bf16.msra.mxu3 %v3744_v11 }
  0x35   : > { %839 = vmatpush.bf16.msra.mxu0 %v3735_v12  ;;  %3870 = vmatpush.bf16.msra.mxu2 %v3735_v12 }
  0x36   : > { %858 = vmatpush.bf16.msra.mxu1 %v3743_v13  ;;  %3878 = vmatpush.bf16.msra.mxu3 %v3743_v13 }
  0x39   : > { %840 = vmatpush.bf16.msra.mxu0 %v3734_v14  ;;  %3871 = vmatpush.bf16.msra.mxu2 %v3734_v14 }
  0x3a   : > { %859 = vmatpush.bf16.msra.mxu1 %v3742_v15  ;;  %3879 = vmatpush.bf16.msra.mxu3 %v3742_v15 }
  0x3c   : > { %841 = vmatmul.bf16.vlgmr.msra.gmra.mxu0 %v3155_v24  ;;  %846 = vmatmul.bf16.vlgmr.msra.gmra.mxu2 %v3163_v25 }
  0x3d   : > { %860 = vmatmul.bf16.vlgmr.msra.gmra.mxu1 %v3159_v26  ;;  %865 = vmatmul.bf16.vlgmr.msra.gmra.mxu3 %v3167_v27 }
  0xb9   : > { %v842_v28 = vpop.f32.mrf.mxu0 }
  0xba   : > { %v861_v29 = vpop.f32.mrf.mxu1 }
  0xbb   : > { %v862_v30 = vadd.f32 %v861_v29, %v842_v28 }
  0xbd   : > { %871 = vst [vmem:[#allocation2 + $0x10] sm:$0xff] %v862_v30 }
  0xbf   : > { %v847_v31 = vpop.f32.mrf.mxu2 }
  0xc0   : > { %v866_v32 = vpop.f32.mrf.mxu3 }
  0xc1   : > { %v867_v33 = vadd.f32 %v866_v32, %v847_v31  ;;  %v844_v34 = vpop.f32.mrf.mxu0 }
  0xc2   : > { %v863_v35 = vpop.f32.mrf.mxu1 }
  0xc3   : > { %873 = vst [vmem:[#allocation2 + $0x18] sm:$0xff] %v867_v33  ;;  %v864_v36 = vadd.f32 %v863_v35, %v844_v34 }
  0xc5   : > { %872 = vst [vmem:[#allocation2] sm:$0xff] %v864_v36 }
  0xc7   : > { %v849_v37 = vpop.f32.mrf.mxu2 }
  0xc8   : > { %v868_v38 = vpop.f32.mrf.mxu3 }
  0xc9   : > { %v869_v39 = vadd.f32 %v868_v38, %v849_v37 }
  0xcb   : > { %874 = vst [vmem:[#allocation2 + $0x8] sm:$0xff] %v869_v39 }
  0xcc PF: > { %v4366_v40 = vld [vmem:[#allocation2 + $0x18] sm:$0xff]  ;;  %v4368_v41 = vld [vmem:[#allocation2 + $0x10] sm:$0xff]  ;;  %v4376_v45 = vld [vmem:[#allocation2] sm:$0xff]  ;;  %v4142_v51 = vmov 128.0   ;;  %s5322_s17 = scalar_lea.vmem %s5293_s10, %s4259_s20  ;;  %s5323_s18 = sld [smem:[#allocation13_spill]]  ;;  %vm1372_vm13 = vcmask 261120  }
  0xcd   : > { %v882_v42 = vmul.f32 %v4366_v40, %v4366_v40  ;;  %v880_v43 = vmul.f32 %v4368_v41, %v4368_v41  ;;  %v881_v47 = vmul.f32 %v4376_v45, %v4376_v45  ;;  %v3318_v48 = vld [vmem:[%s4274_s28 + $0xa8] sm:$0xf]  ;;  %v3772_v49 = vld [vmem:[%s4274_s28 + $0xb0] sm:$0xf0]  ;;  %v3771_v50 = vld [vmem:[%s4274_s28 + $0xac] sm:$0xf]  ;;  %3934 = vrcp.f32 %v4142_v51  ;;  %s5324_s23 = scalar_lea.vmem %s5296_s13, %s4259_s20 }
  0xce   : > { %v3319_v52 = vor.u32 %v3772_v49, %v3318_v48  ;;  %v3320_v53 = vld [vmem:[%s4274_s28 + $0xb4] sm:$0xf0]  ;;  %v3326_v54 = vld [vmem:[%s4274_s28 + $0xb0] sm:$0xf]  ;;  %v3773_v55 = vld [vmem:[%s4274_s28 + $0xb8] sm:$0xf0] }
  0xcf   : > { %888 = vadd.xlane.f32.xlu1 %v882_v42  ;;  %884 = vadd.xlane.f32.xlu0 %v880_v43  ;;  %v3323_v56 = vor.u32 %v3771_v50, %v3320_v53  ;;  %v3327_v57 = vor.u32 %v3773_v55, %v3326_v54  ;;  %v3306_v58 = vld [vmem:[%s4274_s28 + $0x90] sm:$0xf]  ;;  %v3769_v59 = vld [vmem:[%s4274_s28 + $0x98] sm:$0xf0]  ;;  %v3768_v60 = vld [vmem:[%s4274_s28 + $0x94] sm:$0xf] }
  0xd0   : > { %1119 = vmatpush.bf16.msra.mxu0 %v3319_v52  ;;  %v3307_v61 = vor.u32 %v3769_v59, %v3306_v58  ;;  %v3308_v62 = vld [vmem:[%s4274_s28 + $0x9c] sm:$0xf0]  ;;  %v3314_v63 = vld [vmem:[%s4274_s28 + $0x98] sm:$0xf]  ;;  %v3770_v0 = vld [vmem:[%s4274_s28 + $0xa0] sm:$0xf0] }
  0xd1   : > { %1138 = vmatpush.bf16.msra.mxu1 %v3323_v56  ;;  %1157 = vmatpush.bf16.msra.mxu2 %v3327_v57  ;;  %v3311_v1 = vor.u32 %v3768_v60, %v3308_v62  ;;  %v3315_v2 = vor.u32 %v3770_v0, %v3314_v63  ;;  %v3294_v4 = vld [vmem:[%s4274_s28 + $0x78] sm:$0xf]  ;;  %v3766_v5 = vld [vmem:[%s4274_s28 + $0x80] sm:$0xf0]  ;;  %v3765_v6 = vld [vmem:[%s4274_s28 + $0x7c] sm:$0xf] }
  0xd2   : > { %v4374_v44 = vld [vmem:[#allocation2 + $0x8] sm:$0xff]  ;;  %v3295_v7 = vor.u32 %v3766_v5, %v3294_v4  ;;  %v3302_v9 = vld [vmem:[%s4274_s28 + $0x80] sm:$0xf]  ;;  %v3762_v16 = vld [vmem:[%s4274_s28 + $0x64] sm:$0xf]  ;;  %p3656_p5 = scmp.ne.s32.totalorder %s4253_s30, 1 }
  0xd3   : > { %v883_v46 = vmul.f32 %v4374_v44, %v4374_v44  ;;  %v4394_v3 = vpop.eup %3934  ;;  %v3296_v8 = vld [vmem:[%s4274_s28 + $0x84] sm:$0xf0]  ;;  %v3767_v10 = vld [vmem:[%s4274_s28 + $0x88] sm:$0xf0]  ;;  %v3282_v14 = vld [vmem:[%s4274_s28 + $0x60] sm:$0xf] }
  0xd4   : > { %1120 = vmatpush.bf16.msra.mxu0 %v3307_v61  ;;  %v893_v11 = vmul.f32 128.0, %v4394_v3  ;;  %v3299_v12 = vor.u32 %v3765_v6, %v3296_v8  ;;  %v3303_v13 = vor.u32 %v3767_v10, %v3302_v9  ;;  %v3763_v15 = vld [vmem:[%s4274_s28 + $0x68] sm:$0xf0]  ;;  %v3284_v18 = vld [vmem:[%s4274_s28 + $0x6c] sm:$0xf0]  ;;  %vm897_vm0 = vweird.f32 %v4394_v3  ;;  %s5334_s26 = sld [smem:[#allocation14_spill]] (!%p3656_p5) }
  0xd5   : > { %1139 = vmatpush.bf16.msra.mxu1 %v3311_v1  ;;  %1158 = vmatpush.bf16.msra.mxu2 %v3315_v2  ;;  %v3283_v17 = vor.u32 %v3763_v15, %v3282_v14  ;;  %v3290_v19 = vld [vmem:[%s4274_s28 + $0x68] sm:$0xf]  ;;  %v3764_v20 = vld [vmem:[%s4274_s28 + $0x70] sm:$0xf0]  ;;  %v3287_v22 = vor.u32 %v3762_v16, %v3284_v18  ;;  %v3759_v26 = vld [vmem:[%s4274_s28 + $0x4c] sm:$0xf] }
  0xd6   : > { %v894_v21 = vsub.f32 1.0, %v893_v11  ;;  %v3291_v23 = vor.u32 %v3764_v20, %v3290_v19  ;;  %v3270_v24 = vld [vmem:[%s4274_s28 + $0x48] sm:$0xf]  ;;  %v3760_v25 = vld [vmem:[%s4274_s28 + $0x50] sm:$0xf0] }
  0xd7   : > { %890 = vadd.xlane.f32.xlu1 %v883_v46  ;;  %886 = vadd.xlane.f32.xlu0 %v881_v47  ;;  %v3271_v27 = vor.u32 %v3760_v25, %v3270_v24  ;;  %v3272_v28 = vld [vmem:[%s4274_s28 + $0x54] sm:$0xf0]  ;;  %v3278_v29 = vld [vmem:[%s4274_s28 + $0x50] sm:$0xf]  ;;  %v3761_v30 = vld [vmem:[%s4274_s28 + $0x58] sm:$0xf0] }
  0xd8   : > { %1121 = vmatpush.bf16.msra.mxu0 %v3295_v7  ;;  %v895_v31 = vmul.f32 %v4394_v3, %v894_v21  ;;  %v3275_v32 = vor.u32 %v3759_v26, %v3272_v28  ;;  %v3279_v33 = vor.u32 %v3761_v30, %v3278_v29  ;;  %v3258_v34 = vld [vmem:[%s4274_s28 + $0x30] sm:$0xf]  ;;  %v3757_v35 = vld [vmem:[%s4274_s28 + $0x38] sm:$0xf0]  ;;  %v3756_v36 = vld [vmem:[%s4274_s28 + $0x34] sm:$0xf] }
  0xd9   : > { %1140 = vmatpush.bf16.msra.mxu1 %v3299_v12  ;;  %1159 = vmatpush.bf16.msra.mxu2 %v3303_v13  ;;  %v3259_v37 = vor.u32 %v3757_v35, %v3258_v34  ;;  %v3260_v38 = vld [vmem:[%s4274_s28 + $0x3c] sm:$0xf0]  ;;  %v3266_v39 = vld [vmem:[%s4274_s28 + $0x38] sm:$0xf]  ;;  %v3758_v42 = vld [vmem:[%s4274_s28 + $0x40] sm:$0xf0] }
  0xda   : > { %v896_v43 = vadd.f32 %v4394_v3, %v895_v31  ;;  %v3263_v46 = vor.u32 %v3756_v36, %v3260_v38  ;;  %v3267_v47 = vor.u32 %v3758_v42, %v3266_v39  ;;  %v3246_v48 = vld [vmem:[%s4274_s28 + $0x18] sm:$0xf]  ;;  %v3754_v49 = vld [vmem:[%s4274_s28 + $0x20] sm:$0xf0]  ;;  %v3753_v50 = vld [vmem:[%s4274_s28 + $0x1c] sm:$0xf] }
  0xdb   : > { %v3247_v51 = vor.u32 %v3754_v49, %v3246_v48  ;;  %v3248_v52 = vld [vmem:[%s4274_s28 + $0x24] sm:$0xf0]  ;;  %v3254_v53 = vld [vmem:[%s4274_s28 + $0x20] sm:$0xf]  ;;  %v3755_v54 = vld [vmem:[%s4274_s28 + $0x28] sm:$0xf0] }
  0xdc   : > { %1122 = vmatpush.bf16.msra.mxu0 %v3283_v17  ;;  %v4431_v55 = vsel %vm897_vm0, %v4394_v3, %v896_v43  ;;  %v3251_v56 = vor.u32 %v3753_v50, %v3248_v52  ;;  %v3255_v57 = vor.u32 %v3755_v54, %v3254_v53  ;;  %v3234_v58 = vld [vmem:[%s4274_s28] sm:$0xf]  ;;  %v3751_v59 = vld [vmem:[%s4274_s28 + $0x8] sm:$0xf0]  ;;  %v3750_v60 = vld [vmem:[%s4274_s28 + $0x4] sm:$0xf] }
  0xdd   : > { %1141 = vmatpush.bf16.msra.mxu1 %v3287_v22  ;;  %1160 = vmatpush.bf16.msra.mxu2 %v3291_v23  ;;  %v3235_v63 = vor.u32 %v3751_v59, %v3234_v58  ;;  %v3236_v0 = vld [vmem:[%s4274_s28 + $0xc] sm:$0xf0]  ;;  %v3242_v1 = vld [vmem:[%s4274_s28 + $0x8] sm:$0xf]  ;;  %v3752_v2 = vld [vmem:[%s4274_s28 + $0x10] sm:$0xf0] }
  0xde   : > { %v3239_v5 = vor.u32 %v3750_v60, %v3236_v0  ;;  %v3243_v6 = vor.u32 %v3752_v2, %v3242_v1  ;;  %v879_v28 = vld [vmem:[%s5322_s17] sm:$0x1]  ;;  %v3781_v29 = vld [vmem:[%s5288_s5 + $0x38] sm:$0xff]  ;;  %v3779_v39 = vld [vmem:[%s5288_s5 + $0x28] sm:$0xff] }
  0xdf   : > { %1254 = vmatpush.bf16.msra.mxu3 %v3781_v29  ;;  %v3778_v50 = vld [vmem:[%s5288_s5 + $0x20] sm:$0xff]  ;;  %v3776_v0 = vld [vmem:[%s5288_s5 + $0x10] sm:$0xff]  ;;  %v3775_v1 = vld [vmem:[%s5288_s5 + $0x8] sm:$0xff] }
  0xe0   : > { %1123 = vmatpush.bf16.msra.mxu0 %v3271_v27 }
  0xe1   : > { %1142 = vmatpush.bf16.msra.mxu1 %v3275_v32  ;;  %1161 = vmatpush.bf16.msra.mxu2 %v3279_v33  ;;  %v3780_v32 = vld [vmem:[%s5288_s5 + $0x30] sm:$0xff]  ;;  %v951_v33 = vunpack.c.l.bf16 %v879_v28  ;;  %v1180_v28 = vld [vmem:[%s5287_s4] sm:$0xff] }
  0xe3   : > { %1255 = vmatpush.bf16.msra.mxu3 %v3780_v32  ;;  %v952_v43 = vperm.slane %v951_v33, 0 }
  0xe4   : > { %1124 = vmatpush.bf16.msra.mxu0 %v3259_v37 }
  0xe5   : > { %1143 = vmatpush.bf16.msra.mxu1 %v3263_v46  ;;  %1162 = vmatpush.bf16.msra.mxu2 %v3267_v47 }
  0xe7   : > { %1256 = vmatpush.bf16.msra.mxu3 %v3779_v39 }
  0xe8   : > { %1125 = vmatpush.bf16.msra.mxu0 %v3247_v51 }
  0xe9   : > { %1144 = vmatpush.bf16.msra.mxu1 %v3251_v56  ;;  %1163 = vmatpush.bf16.msra.mxu2 %v3255_v57 }
  0xeb   : > { %1257 = vmatpush.bf16.msra.mxu3 %v3778_v50 }
  0xec   : > { %1126 = vmatpush.bf16.msra.mxu0 %v3235_v63 }
  0xed   : > { %1145 = vmatpush.bf16.msra.mxu1 %v3239_v5  ;;  %1164 = vmatpush.bf16.msra.mxu2 %v3243_v6 }
  0xf0   : > { %1287 = vmatpush.bf16.msrb.mxu0 %v3781_v29 }
  0xf4   : > { %1288 = vmatpush.bf16.msrb.mxu0 %v3780_v32 }
  0xf8   : > { %1289 = vmatpush.bf16.msrb.mxu0 %v3779_v39 }
  0xfc   : > { %1290 = vmatpush.bf16.msrb.mxu0 %v3778_v50 }
 0x142   : > { %v889_v61 = vpop.xlane.xlu1 %888  ;;  %v885_v62 = vpop.xlane.xlu0 %884 }
 0x143   : > { %v899_v4 = vmul.f32 %v4431_v55, %v885_v62  ;;  %v901_v7 = vmul.f32 %v4431_v55, %v889_v61 }
 0x145   : > { %v903_v3 = vadd.f32 1e-06, %v899_v4  ;;  %v4441_v8 = vadd.f32 1e-06, %v901_v7 }
 0x147   : > { %3936 = vrsqrt.f32 %v903_v3  ;;  %vm913_vm2 = vweird.f32 %v903_v3  ;;  %vm933_vm9 = vweird.f32 %v4441_v8 }
 0x148   : > { %3938 = vrsqrt.f32 %v4441_v8 }
 0x14a   : > { %v891_v9 = vpop.xlane.xlu1 %890  ;;  %v887_v10 = vpop.xlane.xlu0 %886 }
 0x14b   : > { %v902_v11 = vmul.f32 %v4431_v55, %v891_v9  ;;  %v900_v12 = vmul.f32 %v4431_v55, %v887_v10 }
 0x14d   : > { %v906_v13 = vadd.f32 1e-06, %v902_v11  ;;  %v904_v14 = vadd.f32 1e-06, %v900_v12  ;;  %v3937_v15 = vpop.eup %3936 }
 0x14e   : > { %v908_v16 = vmul.f32 %v3937_v15, %v903_v3  ;;  %v4446_v19 = vpop.eup %3938  ;;  %vm914_vm1 = vweird.f32 %v3937_v15 }
 0x14f   : > { %3940 = vrsqrt.f32 %v906_v13  ;;  %v928_v25 = vmul.f32 %v4446_v19, %v4441_v8  ;;  %vm915_vm3 = vmor %vm913_vm2, %vm914_vm1  ;;  %vm923_vm5 = vweird.f32 %v904_v14  ;;  %vm943_vm7 = vweird.f32 %v906_v13 }
 0x150   : > { %3942 = vrsqrt.f32 %v904_v14  ;;  %v909_v17 = vmul.f32 %v3937_v15, %v908_v16  ;;  %vm934_vm10 = vweird.f32 %v4446_v19 }
 0x151   : > { %v929_v34 = vmul.f32 %v4446_v19, %v928_v25  ;;  %vm935_vm12 = vmor %vm933_vm9, %vm934_vm10  ;;  %v1183_v25 = vld [vmem:[%s5287_s4 + $0x18] sm:$0xff] }
 0x152   : > { %v910_v18 = vmul.f32 0.5, %v909_v17 }
 0x153   : > { %v930_v46 = vmul.f32 0.5, %v929_v34  ;;  %v1176_v34 = vld [vmem:[%s5323_s18] sm:$0xff] }
 0x154   : > { %v911_v21 = vsub.f32 1.5, %v910_v18 }
 0x155   : > { %v3941_v20 = vpop.eup %3940  ;;  %v931_v53 = vsub.f32 1.5, %v930_v46 }
 0x156   : > { %v3943_v22 = vpop.eup %3942  ;;  %v938_v23 = vmul.f32 %v3941_v20, %v906_v13  ;;  %v912_v26 = vmul.f32 %v3937_v15, %v911_v21  ;;  %vm944_vm8 = vweird.f32 %v3941_v20  ;;  %v1178_v21 = vld [vmem:[%s5323_s18 + $0x10] sm:$0xff] }
 0x157   : > { %v918_v24 = vmul.f32 %v3943_v22, %v904_v14  ;;  %vm924_vm4 = vweird.f32 %v3943_v22  ;;  %vm945_vm11 = vmor %vm943_vm7, %vm944_vm8  ;;  %v932_v56 = vmul.f32 %v4446_v19, %v931_v53 }
 0x158   : > { %v939_v30 = vmul.f32 %v3941_v20, %v938_v23  ;;  %v916_v35 = vsel %vm915_vm3, %v3937_v15, %v912_v26  ;;  %vm925_vm6 = vmor %vm923_vm5, %vm924_vm4  ;;  %v1181_v23 = vld [vmem:[%s5287_s4 + $0x8] sm:$0xff] }
 0x159   : > { %v919_v27 = vmul.f32 %v3943_v22, %v918_v24  ;;  %v947_v42 = vmul.f32 %v916_v35, %v4368_v41  ;;  %v936_v58 = vsel %vm935_vm12, %v4446_v19, %v932_v56 }
 0x15a   : > { %v940_v37 = vmul.f32 0.5, %v939_v30  ;;  %v949_v60 = vmul.f32 %v936_v58, %v4366_v40  ;;  %v3774_v40 = vld [vmem:[%s5288_s5] sm:$0xff] }
 0x15b   : > { %v920_v31 = vmul.f32 0.5, %v919_v27  ;;  %v953_v51 = vmul.f32 %v952_v43, %v947_v42  ;;  %v1177_v27 = vld [vmem:[%s5323_s18 + $0x8] sm:$0xff]  ;;  %v3782_v58 = vld [vmem:[%s5289_s6] sm:$0xff] }
 0x15c   : > { %v941_v49 = vsub.f32 1.5, %v940_v37  ;;  %v955_v62 = vmul.f32 %v952_v43, %v949_v60 }
 0x15d   : > { %v921_v36 = vsub.f32 1.5, %v920_v31 }
 0x15e   : > { %v942_v41 = vmul.f32 %v3941_v20, %v941_v49 }
 0x15f   : > { %v922_v38 = vmul.f32 %v3943_v22, %v921_v36 }
 0x160   : > { %v946_v57 = vsel %vm945_vm11, %v3941_v20, %v942_v41  ;;  %v1182_v20 = vld [vmem:[%s5287_s4 + $0x10] sm:$0xff] }
 0x161   : > { %v926_v47 = vsel %vm925_vm6, %v3943_v22, %v922_v38  ;;  %v950_v59 = vmul.f32 %v946_v57, %v4374_v44  ;;  %v1179_v22 = vld [vmem:[%s5323_s18 + $0x18] sm:$0xff] }
 0x162   : > { %v948_v48 = vmul.f32 %v926_v47, %v4376_v45  ;;  %v3777_v45 = vld [vmem:[%s5288_s5 + $0x18] sm:$0xff] }
 0x163   : > { %1258 = vmatpush.bf16.msra.mxu3 %v3777_v45  ;;  %1291 = vmatpush.bf16.msrb.mxu0 %v3777_v45  ;;  %v956_v61 = vmul.f32 %v952_v43, %v950_v59 }
 0x164   : > { %v954_v52 = vmul.f32 %v952_v43, %v948_v48 }
 0x165   : > { %v958_v63 = vpack.c.bf16 %v956_v61, %v955_v62 }
 0x166   : > { %v957_v54 = vpack.c.bf16 %v954_v52, %v953_v51 }
 0x167   : > { %1259 = vmatpush.bf16.msra.mxu3 %v3776_v0  ;;  %1292 = vmatpush.bf16.msrb.mxu0 %v3776_v0 }
 0x168   : > { %1127 = vmatmul.bf16.vlgmr.msra.gmra.mxu0 %v957_v54  ;;  %1146 = vmatmul.bf16.vlgmr.msra.gmra.mxu1 %v957_v54 }
 0x169   : > { %1165 = vmatmul.bf16.vlgmr.msra.gmra.mxu2 %v957_v54 }
 0x16b   : > { %1260 = vmatpush.bf16.msra.mxu3 %v3775_v1  ;;  %1293 = vmatpush.bf16.msrb.mxu0 %v3775_v1 }
 0x16f   : > { %1261 = vmatpush.bf16.msra.mxu3 %v3774_v40  ;;  %1294 = vmatpush.bf16.msrb.mxu0 %v3774_v40 }
 0x178   : > { %1132 = vmatmul.bf16.gmra.mxu0 %v958_v63  ;;  %1151 = vmatmul.bf16.gmra.mxu1 %v958_v63 }
 0x179   : > { %1170 = vmatmul.bf16.gmra.mxu2 %v958_v63 }
 0x1e5   : > { %v1128_v44 = vpop.f32.mrf.mxu0  ;;  %v1147_v2 = vpop.f32.mrf.mxu1 }
 0x1e6   : > { %v1281_v42 = vmul.f32 %v1176_v34, %v1147_v2  ;;  %v1200_v59 = vmul.f32 %v1176_v34, %v1128_v44 }
 0x1ec   : > { %v1166_v15 = vpop.f32.mrf.mxu2 }
 0x1ed   : > { %v1130_v4 = vpop.f32.mrf.mxu0  ;;  %v1149_v5 = vpop.f32.mrf.mxu1 }
 0x1ee   : > { %v1285_v6 = vpack.c.bf16 %v1149_v5, %v1147_v2  ;;  %v1204_v3 = vpack.c.bf16 %v1130_v4, %v1128_v44  ;;  %v1282_v35 = vmul.f32 %v1177_v27, %v1149_v5  ;;  %v1201_v54 = vmul.f32 %v1177_v27, %v1130_v4  ;;  %v3783_v44 = vld [vmem:[%s5289_s6 + $0x8] sm:$0xff]  ;;  %v3784_v2 = vld [vmem:[%s5289_s6 + $0x10] sm:$0xff]  ;;  %v3785_v4 = vld [vmem:[%s5289_s6 + $0x18] sm:$0xff] }
 0x1ef   : > { %v3786_v5 = vld [vmem:[%s5289_s6 + $0x20] sm:$0xff] }
 0x1f0   : > { %1262 = vmatmul.bf16.vlgmr.msra.gmra.mxu3 %v1204_v3  ;;  %1295 = vmatmul.bf16.vlgmr.msrb.gmra.mxu0 %v1285_v6  ;;  %v3789_v6 = vld [vmem:[%s5289_s6 + $0x38] sm:$0xff]  ;;  %v3787_v3 = vld [vmem:[%s5289_s6 + $0x28] sm:$0xff] }
 0x1f4   : > { %v1168_v19 = vpop.f32.mrf.mxu2 }
 0x1f5   : > { %v1133_v7 = vpop.f32.mrf.mxu0  ;;  %v1152_v8 = vpop.f32.mrf.mxu1  ;;  %v1497_v40 = vpack.c.bf16 %v1168_v19, %v1166_v15 }
 0x1f6   : > { %v1283_v30 = vmul.f32 %v1178_v21, %v1152_v8  ;;  %v1202_v48 = vmul.f32 %v1178_v21, %v1133_v7 }
 0x1fc   : > { %v1171_v36 = vpop.f32.mrf.mxu2 }
 0x1fd   : > { %v1135_v9 = vpop.f32.mrf.mxu0  ;;  %v1154_v10 = vpop.f32.mrf.mxu1 }
 0x1fe   : > { %v1205_v11 = vpack.c.bf16 %v1135_v9, %v1133_v7  ;;  %v1286_v12 = vpack.c.bf16 %v1154_v10, %v1152_v8  ;;  %v1284_v31 = vmul.f32 %v1179_v22, %v1154_v10  ;;  %v1203_v50 = vmul.f32 %v1179_v22, %v1135_v9  ;;  %v3788_v7 = vld [vmem:[%s5289_s6 + $0x30] sm:$0xff] }
 0x200   : > { %1267 = vmatmul.bf16.gmra.mxu3 %v1205_v11  ;;  %1300 = vmatmul.bf16.gmra.mxu0 %v1286_v12 }
 0x204   : > { %v1173_v62 = vpop.f32.mrf.mxu2 }
 0x205   : > { %v1498_v1 = vpack.c.bf16 %v1173_v62, %v1171_v36 }
 0x26d   : > { %v1296_v13 = vpop.f32.mrf.mxu0 }
 0x26e   : > { %v1306_v37 = vmul.f32 %v1296_v13, %v1180_v28 }
 0x270   : > { %v1310_v51 = vadd.f32 %v1306_v37, %v1281_v42 }
 0x273   : > { %v1263_v14 = vpop.f32.mrf.mxu3 }
 0x274   : > { %v1273_v41 = vmul.f32 %v1263_v14, %v1180_v28 }
 0x275   : > { %v1298_v16 = vpop.f32.mrf.mxu0 }
 0x276   : > { %v1307_v32 = vmul.f32 %v1298_v16, %v1181_v23  ;;  %v1277_v63 = vadd.f32 %v1273_v41, %v1200_v59 }
 0x278   : > { %v1311_v47 = vadd.f32 %v1307_v32, %v1282_v35 }
 0x27a   : > { %v1446_v56 = vpack.c.bf16 %v1311_v47, %v1310_v51 }
 0x27b   : > { %v1265_v17 = vpop.f32.mrf.mxu3 }
 0x27c   : > { %v1274_v52 = vmul.f32 %v1265_v17, %v1181_v23 }
 0x27d   : > { %v1301_v18 = vpop.f32.mrf.mxu0 }
 0x27e   : > { %v1308_v26 = vmul.f32 %v1301_v18, %v1182_v20  ;;  %v1278_v61 = vadd.f32 %v1274_v52, %v1201_v54 }
 0x280   : > { %v1312_v38 = vadd.f32 %v1308_v26, %v1283_v30  ;;  %v1330_v0 = vpack.c.bf16 %v1278_v61, %v1277_v63 }
 0x283   : > { %v1268_v24 = vpop.f32.mrf.mxu3 }
 0x284   : > { %v1275_v43 = vmul.f32 %v1268_v24, %v1182_v20 }
 0x285   : > { %v1303_v29 = vpop.f32.mrf.mxu0 }
 0x286   : > { %v1309_v33 = vmul.f32 %v1303_v29, %v1183_v25  ;;  %v1279_v45 = vadd.f32 %v1275_v43, %v1202_v48 }
 0x288   : > { %v1313_v39 = vadd.f32 %v1309_v33, %v1284_v31 }
 0x28a   : > { %v1447_v46 = vpack.c.bf16 %v1313_v39, %v1312_v38 }
 0x28b   : > { %v1270_v49 = vpop.f32.mrf.mxu3 }
 0x28c   : > { %v1276_v53 = vmul.f32 %v1270_v49, %v1183_v25  ;;  %1454 = vmatpush.bf16.msrb.mxu2 %v1447_v46 }
 0x28e   : > { %v1280_v57 = vadd.f32 %v1276_v53, %v1203_v50 }
 0x290   : > { %1455 = vmatpush.bf16.msrb.mxu2 %v1446_v56  ;;  %v1331_v60 = vpack.c.bf16 %v1280_v57, %v1279_v45 }
 0x292   : > { %1403 = vmatpush.bf16.msrb.mxu1 %v1331_v60  ;;  %3880 = vmatpush.bf16.msrb.mxu3 %v1331_v60  ;;  %v1596_v60 = vld [vmem:[%s5292_s9] sm:$0xff] }
 0x293   : > { %3400 = vmatmul.msk.bf16.vlgmr.msrb.gmra.mxu2 %vm1372_vm13, %v3782_v58 }
 0x296   : > { %1404 = vmatpush.bf16.msrb.mxu1 %v1330_v0  ;;  %3881 = vmatpush.bf16.msrb.mxu3 %v1330_v0 }
 0x299   : > { %3392 = vmatmul.msk.bf16.vlgmr.msrb.gmra.mxu1 %vm1372_vm13, %v3782_v58  ;;  %3399 = vmatmul.msk.bf16.vlgmr.msrb.gmra.mxu3 %vm1372_vm13, %v3789_v6 }
 0x29a   : > { %1505 = vmatpush.bf16.msra.mxu3 %v1498_v1  ;;  %v1597_v1 = vld [vmem:[%s5292_s9 + $0x8] sm:$0xff] }
 0x29e   : > { %1506 = vmatpush.bf16.msra.mxu3 %v1497_v40 }
 0x2a3   : > { %3401 = vmatmul.msk.bf16.gmra.mxu2 %vm1372_vm13, %v3783_v44 }
 0x2a9   : > { %3393 = vmatmul.msk.bf16.gmra.mxu1 %vm1372_vm13, %v3783_v44  ;;  %3408 = vmatmul.msk.bf16.vlgmr.msra.gmra.mxu3 %vm1372_vm13, %v3782_v58 }
 0x2b3   : > { %3402 = vmatmul.msk.bf16.gmra.mxu2 %vm1372_vm13, %v3784_v2 }
 0x2b9   : > { %3394 = vmatmul.msk.bf16.gmra.mxu1 %vm1372_vm13, %v3784_v2  ;;  %3409 = vmatmul.msk.bf16.gmra.mxu3 %vm1372_vm13, %v3783_v44 }
 0x2c3   : > { %3403 = vmatmul.msk.bf16.gmra.mxu2 %vm1372_vm13, %v3785_v4 }
 0x2c9   : > { %3395 = vmatmul.msk.bf16.gmra.mxu1 %vm1372_vm13, %v3785_v4  ;;  %3410 = vmatmul.msk.bf16.gmra.mxu3 %vm1372_vm13, %v3784_v2 }
 0x2d3   : > { %3404 = vmatmul.msk.bf16.gmra.mxu2 %vm1372_vm13, %v3786_v5 }
 0x2d9   : > { %3396 = vmatmul.msk.bf16.gmra.mxu1 %vm1372_vm13, %v3786_v5  ;;  %3411 = vmatmul.msk.bf16.gmra.mxu3 %vm1372_vm13, %v3785_v4  ;;  %v1598_v4 = vld [vmem:[%s5292_s9 + $0x10] sm:$0xff] }
 0x2e3   : > { %3405 = vmatmul.msk.bf16.gmra.mxu2 %vm1372_vm13, %v3787_v3 }
 0x2e9   : > { %3397 = vmatmul.msk.bf16.gmra.mxu1 %vm1372_vm13, %v3787_v3  ;;  %3412 = vmatmul.msk.bf16.gmra.mxu3 %vm1372_vm13, %v3786_v5 }
 0x2f3   : > { %3406 = vmatmul.msk.bf16.gmra.mxu2 %vm1372_vm13, %v3788_v7 }
 0x2f9   : > { %3398 = vmatmul.msk.bf16.gmra.mxu1 %vm1372_vm13, %v3788_v7  ;;  %3413 = vmatmul.msk.bf16.gmra.mxu3 %vm1372_vm13, %v3787_v3 }
 0x303   : > { %3407 = vmatmul.msk.bf16.gmra.mxu2 %vm1372_vm13, %v3789_v6 }
 0x309   : > { %3414 = vmatmul.msk.bf16.gmra.mxu3 %vm1372_vm13, %v3788_v7  ;;  %v1599_v7 = vld [vmem:[%s5292_s9 + $0x18] sm:$0xff] }
 0x316   : > { %v1457_v8 = vpop.f32.mrf.mxu2  ;;  %v1406_v29 = vpop.f32.mrf.mxu1 }
 0x319   : > { %3415 = vmatmul.msk.bf16.gmra.mxu3 %vm1372_vm13, %v3789_v6 }
 0x31c   : > { %v1441_v41 = vpop.f32.mrf.mxu3 }
 0x31e   : > { %v1459_v9 = vpop.f32.mrf.mxu2  ;;  %v1408_v31 = vpop.f32.mrf.mxu1 }
 0x31f   : > { %v1588_v34 = vpack.c.bf16 %v1459_v9, %v1457_v8  ;;  %v1580_v36 = vpack.c.bf16 %v1408_v31, %v1406_v29  ;;  %v1552_v8 = vld [vmem:[%s5291_s8 + $0x20] sm:$0xff] }
 0x324   : > { %v1443_v56 = vpop.f32.mrf.mxu3 }
 0x325   : > { %v1587_v63 = vpack.c.bf16 %v1443_v56, %v1441_v41 }
 0x326   : > { %v1462_v10 = vpop.f32.mrf.mxu2  ;;  %v1411_v33 = vpop.f32.mrf.mxu1 }
 0x32c   : > { %v4560_v58 = vpop.f32.mrf.mxu3 }
 0x32e   : > { %v1464_v11 = vpop.f32.mrf.mxu2  ;;  %v1413_v35 = vpop.f32.mrf.mxu1 }
 0x32f   : > { %v1589_v32 = vpack.c.bf16 %v1464_v11, %v1462_v10  ;;  %v1581_v38 = vpack.c.bf16 %v1413_v35, %v1411_v33  ;;  %v1603_v33 = vld [vmem:[%s5292_s9 + $0x38] sm:$0xff] }
 0x334   : > { %v4562_v59 = vpop.f32.mrf.mxu3 }
 0x336   : > { %v1467_v12 = vpop.f32.mrf.mxu2  ;;  %v1416_v37 = vpop.f32.mrf.mxu1 }
 0x33c   : > { %v4570_v0 = vpop.f32.mrf.mxu3 }
 0x33e   : > { %v1469_v13 = vpop.f32.mrf.mxu2  ;;  %v1418_v39 = vpop.f32.mrf.mxu1 }
 0x33f   : > { %v1590_v30 = vpack.c.bf16 %v1469_v13, %v1467_v12  ;;  %v1582_v43 = vpack.c.bf16 %v1418_v39, %v1416_v37  ;;  %v1553_v13 = vld [vmem:[%s5291_s8 + $0x28] sm:$0xff]  ;;  %v1604_v37 = vld [vmem:[%s5292_s9 + $0x40] sm:$0xff] }
 0x344   : > { %v4578_v2 = vpop.f32.mrf.mxu3 }
 0x346   : > { %v1472_v14 = vpop.f32.mrf.mxu2  ;;  %v1421_v42 = vpop.f32.mrf.mxu1 }
 0x34c   : > { %v1518_v3 = vpop.f32.mrf.mxu3 }
 0x34d   : > { %v4594_v11 = vmul.f32 %v1552_v8, %v1518_v3  ;;  %v1557_v3 = vld [vmem:[%s5291_s8 + $0x48] sm:$0xff] }
 0x34e   : > { %v1474_v15 = vpop.f32.mrf.mxu2  ;;  %v1423_v46 = vpop.f32.mrf.mxu1 }
 0x34f   : > { %v1591_v16 = vpack.c.bf16 %v1474_v15, %v1472_v14  ;;  %v1583_v48 = vpack.c.bf16 %v1423_v46, %v1421_v42  ;;  %v1600_v15 = vld [vmem:[%s5292_s9 + $0x20] sm:$0xff] }
 0x354   : > { %v1520_v12 = vpop.f32.mrf.mxu3 }
 0x355   : > { %v4600_v14 = vmul.f32 %v1553_v13, %v1520_v12 }
 0x356   : > { %v1477_v17 = vpop.f32.mrf.mxu2  ;;  %v1426_v47 = vpop.f32.mrf.mxu1 }
 0x35e   : > { %v1479_v18 = vpop.f32.mrf.mxu2  ;;  %v1428_v49 = vpop.f32.mrf.mxu1 }
 0x35f   : > { %v1592_v19 = vpack.c.bf16 %v1479_v18, %v1477_v17  ;;  %v1584_v50 = vpack.c.bf16 %v1428_v49, %v1426_v47  ;;  %v1562_v49 = vld [vmem:[%s5291_s8 + $0x70] sm:$0xff] }
 0x366   : > { %v1482_v20 = vpop.f32.mrf.mxu2  ;;  %v1431_v51 = vpop.f32.mrf.mxu1 }
 0x36e   : > { %v1484_v21 = vpop.f32.mrf.mxu2  ;;  %v1433_v52 = vpop.f32.mrf.mxu1 }
 0x36f   : > { %v1593_v28 = vpack.c.bf16 %v1484_v21, %v1482_v20  ;;  %v1585_v53 = vpack.c.bf16 %v1433_v52, %v1431_v51  ;;  %v1601_v20 = vld [vmem:[%s5292_s9 + $0x28] sm:$0xff]  ;;  %v1554_v21 = vld [vmem:[%s5291_s8 + $0x30] sm:$0xff] }
 0x370   : > { %v1561_v51 = vld [vmem:[%s5291_s8 + $0x68] sm:$0xff] }
 0x376   : > { %v1487_v22 = vpop.f32.mrf.mxu2  ;;  %v1436_v54 = vpop.f32.mrf.mxu1 }
 0x37e   : > { %v1489_v23 = vpop.f32.mrf.mxu2  ;;  %v1438_v45 = vpop.f32.mrf.mxu1 }
 0x37f   : > { %v1594_v27 = vpack.c.bf16 %v1489_v23, %v1487_v22  ;;  %v1586_v57 = vpack.c.bf16 %v1438_v45, %v1436_v54  ;;  %v1563_v54 = vld [vmem:[%s5291_s8 + $0x78] sm:$0xff] }
 0x386   : > { %v1492_v24 = vpop.f32.mrf.mxu2 }
 0x38e   : > { %v1494_v25 = vpop.f32.mrf.mxu2 }
 0x38f   : > { %v1595_v26 = vpack.c.bf16 %v1494_v25, %v1492_v24  ;;  %v1555_v24 = vld [vmem:[%s5291_s8 + $0x38] sm:$0xff] }
 0x391   : > { %1612 = vmatpush.bf16.xpose.msra.mxu0 %v1595_v26 }
 0x399   : > { %1613 = vmatpush.bf16.xpose.msra.mxu0 %v1594_v27 }
 0x3a1   : > { %1614 = vmatpush.bf16.xpose.msra.mxu0 %v1593_v28  ;;  %v1602_v28 = vld [vmem:[%s5292_s9 + $0x30] sm:$0xff] }
 0x3a9   : > { %1615 = vmatpush.bf16.xpose.msra.mxu0 %v1592_v19  ;;  %v1523_v19 = vpop.f32.mrf.mxu3 }
 0x3aa   : > { %v4621_v25 = vmul.f32 %v1554_v21, %v1523_v19 }
 0x3b1   : > { %1616 = vmatpush.bf16.xpose.msra.mxu0 %v1591_v16  ;;  %v1815_v16 = vpack.c.bf16 %v4600_v14, %v4594_v11  ;;  %v1525_v26 = vpop.f32.mrf.mxu3  ;;  %v1607_v11 = vld [vmem:[%s5292_s9 + $0x58] sm:$0xff] }
 0x3b2   : > { %v1571_v27 = vmul.f32 %v1555_v24, %v1525_v26  ;;  %v1550_v24 = vld [vmem:[%s5291_s8 + $0x10] sm:$0xff] }
 0x3b4   : > { %v1816_v29 = vpack.c.bf16 %v1571_v27, %v4621_v25  ;;  %v1551_v25 = vld [vmem:[%s5291_s8 + $0x18] sm:$0xff]  ;;  %v1566_v27 = vmul.f32 %v1550_v24, %v4570_v0 }
 0x3b9   : > { %1617 = vmatpush.bf16.xpose.msra.mxu0 %v1590_v30 }
 0x3c1   : > { %1618 = vmatpush.bf16.xpose.msra.mxu0 %v1589_v32  ;;  %v1528_v32 = vpop.f32.mrf.mxu3 }
 0x3c9   : > { %1619 = vmatpush.bf16.xpose.msra.mxu0 %v1588_v34 }
 0x3d0   : > { %1620 = vmatmul.bf16.vlgmr.msra.gmra.mxu0 %v1580_v36  ;;  %v1530_v36 = vpop.f32.mrf.mxu3 }
 0x3d1   : > { %v1573_v13 = vmul.f32 %v1557_v3, %v1530_v36 }
 0x3d8   : > { %v1533_v42 = vpop.f32.mrf.mxu3 }
 0x3e0   : > { %1625 = vmatmul.bf16.gmra.mxu0 %v1581_v38 }
 0x3f0   : > { %1630 = vmatmul.bf16.gmra.mxu0 %v1582_v43  ;;  %v1535_v43 = vpop.f32.mrf.mxu3 }
 0x3f8   : > { %v1538_v46 = vpop.f32.mrf.mxu3 }
 0x400   : > { %1635 = vmatmul.bf16.gmra.mxu0 %v1583_v48  ;;  %v1540_v47 = vpop.f32.mrf.mxu3 }
 0x401   : > { %v1577_v45 = vmul.f32 %v1561_v51, %v1540_v47  ;;  %v1608_v51 = vld [vmem:[%s5292_s9 + $0x60] sm:$0xff] }
 0x408   : > { %v1543_v48 = vpop.f32.mrf.mxu3 }
 0x409   : > { %v1578_v52 = vmul.f32 %v1562_v49, %v1543_v48 }
 0x410   : > { %1640 = vmatmul.bf16.gmra.mxu0 %v1584_v50  ;;  %v1560_v50 = vld [vmem:[%s5291_s8 + $0x60] sm:$0xff] }
 0x411   : > { %v1576_v41 = vmul.f32 %v1560_v50, %v1538_v46 }
 0x420   : > { %1645 = vmatmul.bf16.gmra.mxu0 %v1585_v53  ;;  %v1545_v53 = vpop.f32.mrf.mxu3 }
 0x421   : > { %v1579_v56 = vmul.f32 %v1563_v54, %v1545_v53 }
 0x430   : > { %1650 = vmatmul.bf16.gmra.mxu0 %v1586_v57  ;;  %v1558_v57 = vld [vmem:[%s5291_s8 + $0x50] sm:$0xff] }
 0x440   : > { %1655 = vmatmul.bf16.gmra.mxu0 %v1587_v63  ;;  %v1574_v63 = vmul.f32 %v1558_v57, %v1533_v42 }
 0x44d   : > { %v1621_v61 = vpop.f32.mrf.mxu0 }
 0x44e   : > { %v4567_v62 = vadd.f32 %v1621_v61, %v1596_v60  ;;  %v1559_v60 = vld [vmem:[%s5291_s8 + $0x58] sm:$0xff]  ;;  %v1820_v61 = vpack.c.bf16 %v1579_v56, %v1578_v52  ;;  %v1609_v56 = vld [vmem:[%s5292_s9 + $0x68] sm:$0xff] }
 0x450   : > { %1661 = vmax.xlane.f32.xlu2 %v4567_v62  ;;  %1821 = vmatpush.bf16.msra.mxu1 %v1820_v61 }
 0x455   : > { %v1623_v40 = vpop.f32.mrf.mxu0 }
 0x456   : > { %v4575_v44 = vadd.f32 %v1623_v40, %v1597_v1  ;;  %v1575_v1 = vmul.f32 %v1559_v60, %v1535_v43 }
 0x458   : > { %1663 = vmax.xlane.f32.xlu2 %v4575_v44 }
 0x45d   : > { %v1626_v5 = vpop.f32.mrf.mxu0 }
 0x45e   : > { %v4583_v6 = vadd.f32 %v1626_v5, %v1598_v4  ;;  %v1819_v4 = vpack.c.bf16 %v1577_v45, %v1576_v41  ;;  %v1556_v5 = vld [vmem:[%s5291_s8 + $0x40] sm:$0xff] }
 0x45f   : > { %v1572_v12 = vmul.f32 %v1556_v5, %v1528_v32  ;;  %v1548_v32 = vld [vmem:[%s5291_s8] sm:$0xff] }
 0x460   : > { %1665 = vmax.xlane.f32.xlu0 %v4583_v6  ;;  %1822 = vmatpush.bf16.msra.mxu1 %v1819_v4  ;;  %v1564_v0 = vmul.f32 %v1548_v32, %v4560_v58 }
 0x465   : > { %v1628_v9 = vpop.f32.mrf.mxu0 }
 0x466   : > { %v4592_v10 = vadd.f32 %v1628_v9, %v1599_v7 }
 0x468   : > { %1667 = vmax.xlane.f32.xlu1 %v4592_v10 }
 0x46d   : > { %v1631_v17 = vpop.f32.mrf.mxu0 }
 0x46e   : > { %v4607_v18 = vadd.f32 %v1631_v17, %v1600_v15  ;;  %v1818_v15 = vpack.c.bf16 %v1575_v1, %v1574_v63  ;;  %v1817_v17 = vpack.c.bf16 %v1573_v13, %v1572_v12 }
 0x470   : > { %1669 = vmax.xlane.f32.xlu2 %v4607_v18  ;;  %1823 = vmatpush.bf16.msra.mxu1 %v1818_v15 }
 0x474   : > { %1824 = vmatpush.bf16.msra.mxu1 %v1817_v17 }
 0x475   : > { %v1633_v22 = vpop.f32.mrf.mxu0 }
 0x476   : > { %v4616_v23 = vadd.f32 %v1633_v22, %v1601_v20 }
 0x478   : > { %1671 = vmax.xlane.f32.xlu0 %v4616_v23  ;;  %1825 = vmatpush.bf16.msra.mxu1 %v1816_v29  ;;  %v1606_v29 = vld [vmem:[%s5292_s9 + $0x50] sm:$0xff] }
 0x47c   : > { %1826 = vmatpush.bf16.msra.mxu1 %v1815_v16 }
 0x47d   : > { %v1636_v30 = vpop.f32.mrf.mxu0 }
 0x47e   : > { %v4628_v31 = vadd.f32 %v1636_v30, %v1602_v28  ;;  %v1567_v28 = vmul.f32 %v1551_v25, %v4578_v2 }
 0x480   : > { %1673 = vmax.xlane.f32.xlu1 %v4628_v31 }
 0x485   : > { %v1638_v34 = vpop.f32.mrf.mxu0 }
 0x486   : > { %v4634_v35 = vadd.f32 %v1638_v34, %v1603_v33  ;;  %v1549_v33 = vld [vmem:[%s5291_s8 + $0x8] sm:$0xff] }
 0x487   : > { %v1565_v2 = vmul.f32 %v1549_v33, %v4562_v59 }
 0x488   : > { %1675 = vmax.xlane.f32.xlu2 %v4634_v35 }
 0x489   : > { %v1813_v43 = vpack.c.bf16 %v1565_v2, %v1564_v0 }
 0x48d   : > { %v1641_v38 = vpop.f32.mrf.mxu0 }
 0x48e   : > { %v4640_v39 = vadd.f32 %v1641_v38, %v1604_v37 }
 0x490   : > { %1677 = vmax.xlane.f32.xlu2 %v4640_v39 }
 0x495   : > { %v1643_v9 = vpop.f32.mrf.mxu0 }
 0x4c3   : > { %v1662_v40 = vpop.xlane.xlu2 %1661 }
 0x4c4   : > { %v1693_v7 = vsub.f32 %v4567_v62, %v1662_v40  ;;  %v1646_v62 = vpop.f32.mrf.mxu0  ;;  %v1610_v40 = vld [vmem:[%s5292_s9 + $0x70] sm:$0xff] }
 0x4c5   : > { %v4705_v47 = vadd.f32 %v1646_v62, %v1606_v29 }
 0x4c6   : > { %v1709_v8 = vmul.f32 1.442695, %v1693_v7 }
 0x4c8   : > { %3944 = vpow2.f32 %v1709_v8  ;;  %v1611_v8 = vld [vmem:[%s5292_s9 + $0x78] sm:$0xff] }
 0x4cb   : > { %v1664_v19 = vpop.xlane.xlu2 %1663 }
 0x4cc   : > { %v1694_v20 = vsub.f32 %v4575_v44, %v1664_v19  ;;  %v1605_v44 = vld [vmem:[%s5292_s9 + $0x48] sm:$0xff]  ;;  %v1648_v38 = vpop.f32.mrf.mxu0 }
 0x4cd   : > { %v4690_v34 = vadd.f32 %v1643_v9, %v1605_v44  ;;  %v4715_v48 = vadd.f32 %v1648_v38, %v1607_v11 }
 0x4ce   : > { %v4669_v21 = vpop.eup %3944  ;;  %v1711_v22 = vmul.f32 1.442695, %v1694_v20 }
 0x4cf   : > { %1741 = vadd.xlane.f32.xlu0 %v4669_v21 }
 0x4d0   : > { %3946 = vpow2.f32 %v1711_v22 }
 0x4d3   : > { %v1666_v26 = vpop.xlane.xlu0 %1665 }
 0x4d4   : > { %v1695_v30 = vsub.f32 %v4583_v6, %v1666_v26  ;;  %v1814_v6 = vpack.c.bf16 %v1567_v28, %v1566_v27  ;;  %v1651_v16 = vpop.f32.mrf.mxu0 }
 0x4d5   : > { %v4725_v54 = vadd.f32 %v1651_v16, %v1608_v51 }
 0x4d6   : > { %v4692_v36 = vpop.eup %3946  ;;  %v1713_v37 = vmul.f32 1.442695, %v1695_v30  ;;  %1827 = vmatpush.bf16.msra.mxu1 %v1814_v6 }
 0x4d7   : > { %1743 = vadd.xlane.f32.xlu1 %v4692_v36  ;;  %1679 = vmax.xlane.f32.xlu0 %v4690_v34 }
 0x4d8   : > { %3948 = vpow2.f32 %v1713_v37 }
 0x4da   : > { %1828 = vmatpush.bf16.msra.mxu1 %v1813_v43 }
 0x4db   : > { %v1668_v42 = vpop.xlane.xlu1 %1667 }
 0x4dc   : > { %v1696_v46 = vsub.f32 %v4592_v10, %v1668_v42  ;;  %v1653_v41 = vpop.f32.mrf.mxu0 }
 0x4dd   : > { %v4735_v61 = vadd.f32 %v1653_v41, %v1609_v56 }
 0x4de   : > { %v4707_v58 = vpop.eup %3948  ;;  %v1715_v59 = vmul.f32 1.442695, %v1696_v46 }
 0x4df   : > { %1745 = vadd.xlane.f32.xlu1 %v4707_v58  ;;  %1681 = vmax.xlane.f32.xlu0 %v4705_v47 }
 0x4e0   : > { %3950 = vpow2.f32 %v1715_v59 }
 0x4e3   : > { %v1670_v14 = vpop.xlane.xlu2 %1669 }
 0x4e4   : > { %v1697_v10 = vsub.f32 %v4607_v18, %v1670_v14  ;;  %v1656_v1 = vpop.f32.mrf.mxu0 }
 0x4e5   : > { %v4745_v3 = vadd.f32 %v1656_v1, %v1610_v40 }
 0x4e6   : > { %v4717_v49 = vpop.eup %3950  ;;  %v1717_v50 = vmul.f32 1.442695, %v1697_v10 }
 0x4e7   : > { %1747 = vadd.xlane.f32.xlu2 %v4717_v49  ;;  %1683 = vmax.xlane.f32.xlu1 %v4715_v48 }
 0x4e8   : > { %3952 = vpow2.f32 %v1717_v50 }
 0x4eb   : > { %v1672_v52 = vpop.xlane.xlu0 %1671 }
 0x4ec   : > { %v1698_v53 = vsub.f32 %v4616_v23, %v1672_v52  ;;  %v1658_v9 = vpop.f32.mrf.mxu0 }
 0x4ed   : > { %v4755_v15 = vadd.f32 %v1658_v9, %v1611_v8 }
 0x4ee   : > { %v4727_v18 = vpop.eup %3952  ;;  %v1719_v45 = vmul.f32 1.442695, %v1698_v53 }
 0x4ef   : > { %1749 = vadd.xlane.f32.xlu2 %v4727_v18  ;;  %1685 = vmax.xlane.f32.xlu1 %v4725_v54 }
 0x4f0   : > { %3954 = vpow2.f32 %v1719_v45 }
 0x4f3   : > { %v1674_v57 = vpop.xlane.xlu1 %1673 }
 0x4f4   : > { %v1699_v60 = vsub.f32 %v4628_v31, %v1674_v57 }
 0x4f6   : > { %v4737_v23 = vpop.eup %3954  ;;  %v1721_v63 = vmul.f32 1.442695, %v1699_v60 }
 0x4f7   : > { %1751 = vadd.xlane.f32.xlu0 %v4737_v23  ;;  %1687 = vmax.xlane.f32.xlu2 %v4735_v61 }
 0x4f8   : > { %3956 = vpow2.f32 %v1721_v63 }
 0x4fb   : > { %v1676_v4 = vpop.xlane.xlu2 %1675 }
 0x4fc   : > { %v1700_v5 = vsub.f32 %v4634_v35, %v1676_v4 }
 0x4fe   : > { %v4747_v31 = vpop.eup %3956  ;;  %v1723_v7 = vmul.f32 1.442695, %v1700_v5 }
 0x4ff   : > { %1753 = vadd.xlane.f32.xlu0 %v4747_v31  ;;  %1689 = vmax.xlane.f32.xlu2 %v4745_v3 }
 0x500   : > { %3958 = vpow2.f32 %v1723_v7 }
 0x503   : > { %v1678_v12 = vpop.xlane.xlu2 %1677 }
 0x504   : > { %v1701_v13 = vsub.f32 %v4640_v39, %v1678_v12 }
 0x506   : > { %v4757_v35 = vpop.eup %3958  ;;  %v1725_v17 = vmul.f32 1.442695, %v1701_v13 }
 0x507   : > { %1691 = vmax.xlane.f32.xlu0 %v4755_v15  ;;  %1755 = vadd.xlane.f32.xlu1 %v4757_v35 }
 0x508   : > { %3960 = vpow2.f32 %v1725_v17 }
 0x50e   : > { %v4761_v19 = vpop.eup %3960 }
 0x50f   : > { %1757 = vadd.xlane.f32.xlu1 %v4761_v19 }
 0x542   : > { %v1742_v20 = vpop.xlane.xlu0 %1741 }
 0x543   : > { %3962 = vrcp.f32 %v1742_v20 }
 0x549   : > { %v3963_v25 = vpop.eup %3962 }
 0x54a   : > { %v1744_v22 = vpop.xlane.xlu1 %1743  ;;  %v1680_v62 = vpop.xlane.xlu0 %1679  ;;  %v1789_v26 = vmul.f32 %v3963_v25, %v4669_v21 }
 0x54b   : > { %3964 = vrcp.f32 %v1744_v22  ;;  %v1702_v39 = vsub.f32 %v4690_v34, %v1680_v62 }
 0x54d   : > { %v1727_v24 = vmul.f32 1.442695, %v1702_v39 }
 0x54f   : > { %3966 = vpow2.f32 %v1727_v24 }
 0x551   : > { %v3965_v44 = vpop.eup %3964 }
 0x552   : > { %v1790_v27 = vmul.f32 %v3965_v44, %v4692_v36  ;;  %v1746_v28 = vpop.xlane.xlu1 %1745  ;;  %v1682_v30 = vpop.xlane.xlu0 %1681 }
 0x553   : > { %v1703_v32 = vsub.f32 %v4705_v47, %v1682_v30 }
 0x554   : > { %v1805_v33 = vpack.c.bf16 %v1790_v27, %v1789_v26 }
 0x555   : > { %v4768_v37 = vpop.eup %3966  ;;  %v1729_v0 = vmul.f32 1.442695, %v1703_v32 }
 0x556   : > { %1829 = vmatmul.bf16.vlgmr.msra.gmra.mxu1 %v1805_v33  ;;  %1759 = vadd.xlane.f32.xlu2 %v4768_v37 }
 0x557   : > { %3968 = vpow2.f32 %v1729_v0 }
 0x558   : > { %3970 = vrcp.f32 %v1746_v28 }
 0x55a   : > { %v1748_v34 = vpop.xlane.xlu2 %1747  ;;  %v1684_v2 = vpop.xlane.xlu1 %1683 }
 0x55b   : > { %3972 = vrcp.f32 %v1748_v34  ;;  %v1704_v21 = vsub.f32 %v4715_v48, %v1684_v2 }
 0x55d   : > { %v4772_v6 = vpop.eup %3968  ;;  %v1731_v36 = vmul.f32 1.442695, %v1704_v21 }
 0x55e   : > { %1761 = vadd.xlane.f32.xlu0 %v4772_v6  ;;  %v3971_v29 = vpop.eup %3970 }
 0x55f   : > { %3974 = vpow2.f32 %v1731_v36  ;;  %v1791_v46 = vmul.f32 %v3971_v29, %v4707_v58 }
 0x561   : > { %v3973_v38 = vpop.eup %3972 }
 0x562   : > { %v1750_v42 = vpop.xlane.xlu2 %1749  ;;  %v1686_v43 = vpop.xlane.xlu1 %1685  ;;  %v1792_v47 = vmul.f32 %v3973_v38, %v4717_v49 }
 0x563   : > { %v1705_v59 = vsub.f32 %v4725_v54, %v1686_v43 }
 0x564   : > { %v1806_v11 = vpack.c.bf16 %v1792_v47, %v1791_v46 }
 0x565   : > { %v4778_v14 = vpop.eup %3974  ;;  %v1733_v16 = vmul.f32 1.442695, %v1705_v59 }
 0x566   : > { %1834 = vmatmul.bf16.gmra.mxu1 %v1806_v11  ;;  %1763 = vadd.xlane.f32.xlu1 %v4778_v14 }
 0x567   : > { %3976 = vpow2.f32 %v1733_v16 }
 0x568   : > { %3978 = vrcp.f32 %v1750_v42 }
 0x56a   : > { %v1752_v10 = vpop.xlane.xlu0 %1751  ;;  %v1688_v48 = vpop.xlane.xlu2 %1687 }
 0x56b   : > { %3980 = vrcp.f32 %v1752_v10  ;;  %v1706_v50 = vsub.f32 %v4735_v61, %v1688_v48 }
 0x56d   : > { %v4782_v51 = vpop.eup %3976  ;;  %v1735_v58 = vmul.f32 1.442695, %v1706_v50 }
 0x56e   : > { %1765 = vadd.xlane.f32.xlu2 %v4782_v51  ;;  %v3979_v49 = vpop.eup %3978 }
 0x56f   : > { %3982 = vpow2.f32 %v1735_v58  ;;  %v1793_v41 = vmul.f32 %v3979_v49, %v4727_v18 }
 0x571   : > { %v3981_v52 = vpop.eup %3980 }
 0x572   : > { %v1754_v53 = vpop.xlane.xlu0 %1753  ;;  %v1690_v54 = vpop.xlane.xlu2 %1689  ;;  %v1794_v45 = vmul.f32 %v3981_v52, %v4737_v23 }
 0x573   : > { %v1707_v56 = vsub.f32 %v4745_v3, %v1690_v54 }
 0x574   : > { %v1807_v57 = vpack.c.bf16 %v1794_v45, %v1793_v41 }
 0x575   : > { %v3983_v60 = vpop.eup %3982  ;;  %v1737_v63 = vmul.f32 1.442695, %v1707_v56 }
 0x576   : > { %1839 = vmatmul.bf16.gmra.mxu1 %v1807_v57  ;;  %1767 = vadd.xlane.f32.xlu0 %v3983_v60 }
 0x577   : > { %3984 = vpow2.f32 %v1737_v63 }
 0x578   : > { %3986 = vrcp.f32 %v1754_v53 }
 0x57a   : > { %v1692_v61 = vpop.xlane.xlu0 %1691  ;;  %v1756_v1 = vpop.xlane.xlu1 %1755 }
 0x57b   : > { %v1708_v40 = vsub.f32 %v4755_v15, %v1692_v61  ;;  %3988 = vrcp.f32 %v1756_v1  ;;  %v3799_v61 = vld [vmem:[%s4279_s21 + $0x38] sm:$0xff]  ;;  %v3798_v1 = vld [vmem:[%s4279_s21 + $0x30] sm:$0xff] }
 0x57c   : > { %1979 = vmatpush.bf16.msrb.mxu3 %v3799_v61  ;;  %v3524_v61 = vld [vmem:[%s4286_s16 + $0x90] sm:$0xf0] }
 0x57d   : > { %v3985_v4 = vpop.eup %3984  ;;  %v1739_v5 = vmul.f32 1.442695, %v1708_v40  ;;  %v3797_v40 = vld [vmem:[%s4279_s21 + $0x28] sm:$0xff] }
 0x57e   : > { %1769 = vadd.xlane.f32.xlu1 %v3985_v4  ;;  %v3987_v18 = vpop.eup %3986 }
 0x57f   : > { %3990 = vpow2.f32 %v1739_v5  ;;  %v1795_v3 = vmul.f32 %v3987_v18, %v4747_v31  ;;  %v3790_v5 = vld [vmem:[%s5290_s7] sm:$0xff]  ;;  %v3795_v18 = vld [vmem:[%s4279_s21 + $0x18] sm:$0xff] }
 0x580   : > { %1980 = vmatpush.bf16.msrb.mxu3 %v3798_v1  ;;  %v3530_v1 = vld [vmem:[%s4286_s16 + $0x88] sm:$0xf] }
 0x581   : > { %v3989_v23 = vpop.eup %3988 }
 0x582   : > { %v1796_v7 = vmul.f32 %v3989_v23, %v4757_v35  ;;  %v1758_v12 = vpop.xlane.xlu1 %1757  ;;  %v3791_v23 = vld [vmem:[%s5290_s7 + $0x8] sm:$0xff] }
 0x583   : > { %3992 = vrcp.f32 %v1758_v12 }
 0x584   : > { %v1808_v8 = vpack.c.bf16 %v1796_v7, %v1795_v3  ;;  %1981 = vmatpush.bf16.msrb.mxu3 %v3797_v40  ;;  %v3794_v3 = vld [vmem:[%s4279_s21 + $0x10] sm:$0xff]  ;;  %v3793_v7 = vld [vmem:[%s4279_s21 + $0x8] sm:$0xff]  ;;  %v3819_v40 = vld [vmem:[%s4286_s16 + $0x94] sm:$0xf0] }
 0x585   : > { %v3991_v9 = vpop.eup %3990 }
 0x586   : > { %1771 = vadd.xlane.f32.xlu2 %v3991_v9  ;;  %1844 = vmatmul.bf16.gmra.mxu1 %v1808_v8  ;;  %v3792_v8 = vld [vmem:[%s4279_s21] sm:$0xff] }
 0x589   : > { %v3993_v15 = vpop.eup %3992 }
 0x58a   : > { %v1797_v20 = vmul.f32 %v3993_v15, %v4761_v19 }
 0x5c9   : > { %v1760_v13 = vpop.xlane.xlu2 %1759 }
 0x5ca   : > { %3994 = vrcp.f32 %v1760_v13 }
 0x5d0   : > { %v3995_v17 = vpop.eup %3994 }
 0x5d1   : > { %v1798_v22 = vmul.f32 %v3995_v17, %v4768_v37  ;;  %v1762_v31 = vpop.xlane.xlu0 %1761 }
 0x5d2   : > { %3996 = vrcp.f32 %v1762_v31 }
 0x5d3   : > { %v4793_v62 = vpop.f32.mrf.mxu1  ;;  %v1809_v39 = vpack.c.bf16 %v1798_v22, %v1797_v20 }
 0x5d5   : > { %1849 = vmatmul.bf16.gmra.mxu1 %v1809_v39 }
 0x5d8   : > { %v3997_v44 = vpop.eup %3996 }
 0x5d9   : > { %v1764_v35 = vpop.xlane.xlu1 %1763  ;;  %v1799_v27 = vmul.f32 %v3997_v44, %v4772_v6 }
 0x5da   : > { %3998 = vrcp.f32 %v1764_v35 }
 0x5db   : > { %v4795_v24 = vpop.f32.mrf.mxu1 }
 0x5dc   : > { %v1874_v25 = vpack.c.bf16 %v4795_v24, %v4793_v62  ;;  %v4048_v62 = vld [vmem:[#allocation2 + $0x10] sm:$0xff]  ;;  %v4049_v24 = vld [vmem:[#allocation2] sm:$0xff] }
 0x5e0   : > { %v3999_v26 = vpop.eup %3998 }
 0x5e1   : > { %v1800_v19 = vmul.f32 %v3999_v26, %v4778_v14  ;;  %v1766_v32 = vpop.xlane.xlu2 %1765 }
 0x5e2   : > { %4000 = vrcp.f32 %v1766_v32  ;;  %v4051_v32 = vld [vmem:[#allocation2 + $0x8] sm:$0xff] }
 0x5e3   : > { %v1835_v28 = vpop.f32.mrf.mxu1  ;;  %v1810_v30 = vpack.c.bf16 %v1800_v19, %v1799_v27  ;;  %v4050_v27 = vld [vmem:[#allocation2 + $0x18] sm:$0xff] }
 0x5e5   : > { %1854 = vmatmul.bf16.gmra.mxu1 %v1810_v30 }
 0x5e8   : > { %v4001_v34 = vpop.eup %4000 }
 0x5e9   : > { %v1768_v33 = vpop.xlane.xlu0 %1767  ;;  %v1801_v21 = vmul.f32 %v4001_v34, %v4782_v51  ;;  %v3830_v34 = vld [vmem:[%s4286_s16 + $0xec] sm:$0xf0] }
 0x5ea   : > { %4002 = vrcp.f32 %v1768_v33 }
 0x5eb   : > { %v1837_v37 = vpop.f32.mrf.mxu1 }
 0x5ec   : > { %v1875_v0 = vpack.c.bf16 %v1837_v37, %v1835_v28 }
 0x5f0   : > { %v4003_v2 = vpop.eup %4002 }
 0x5f1   : > { %v1802_v36 = vmul.f32 %v4003_v2, %v3983_v60  ;;  %v1770_v42 = vpop.xlane.xlu1 %1769  ;;  %v3828_v2 = vld [vmem:[%s4286_s16 + $0xe4] sm:$0xf] }
 0x5f2   : > { %4004 = vrcp.f32 %v1770_v42 }
 0x5f3   : > { %v1840_v29 = vpop.f32.mrf.mxu1  ;;  %v1811_v38 = vpack.c.bf16 %v1802_v36, %v1801_v21  ;;  %v3572_v36 = vld [vmem:[%s4286_s16 + $0xf0] sm:$0xf0] }
 0x5f4   : > { %v3575_v42 = vor.u32 %v3828_v2, %v3572_v36 }
 0x5f5   : > { %1859 = vmatmul.bf16.gmra.mxu1 %v1811_v38  ;;  %v3831_v38 = vld [vmem:[%s4286_s16 + $0xf4] sm:$0xf0] }
 0x5f8   : > { %v4005_v47 = vpop.eup %4004 }
 0x5f9   : > { %v1772_v6 = vpop.xlane.xlu2 %1771  ;;  %v1803_v11 = vmul.f32 %v4005_v47, %v3985_v4  ;;  %v3796_v4 = vld [vmem:[%s4279_s21 + $0x20] sm:$0xff] }
 0x5fa   : > { %4006 = vrcp.f32 %v1772_v6  ;;  %1982 = vmatpush.bf16.msrb.mxu3 %v3796_v4  ;;  %v3824_v47 = vld [vmem:[%s4286_s16 + $0xc4] sm:$0xf] }
 0x5fb   : > { %v1842_v43 = vpop.f32.mrf.mxu1 }
 0x5fc   : > { %v1876_v46 = vpack.c.bf16 %v1842_v43, %v1840_v29  ;;  %v3578_v29 = vld [vmem:[%s4286_s16 + $0xe8] sm:$0xf]  ;;  %v3554_v43 = vld [vmem:[%s4286_s16 + $0xc0] sm:$0xf] }
 0x5fd   : > { %v3579_v6 = vor.u32 %v3831_v38, %v3578_v29  ;;  %v3458_v29 = vld [vmem:[%s4286_s16] sm:$0xf]  ;;  %v3802_v38 = vld [vmem:[%s4286_s16 + $0xc] sm:$0xf0] }
 0x5fe   : > { %1983 = vmatpush.bf16.msrb.mxu3 %v3795_v18  ;;  %v3506_v18 = vld [vmem:[%s4286_s16 + $0x60] sm:$0xf] }
 0x5ff   : > { %2305 = vmatpush.bf16.msrb.mxu0 %v3579_v6 }
 0x600   : > { %v4007_v59 = vpop.eup %4006 }
 0x601   : > { %v1804_v14 = vmul.f32 %v4007_v59, %v3991_v9 }
 0x602   : > { %1984 = vmatpush.bf16.msrb.mxu3 %v3794_v3  ;;  %v3812_v3 = vld [vmem:[%s4286_s16 + $0x64] sm:$0xf] }
 0x603   : > { %v1812_v16 = vpack.c.bf16 %v1804_v14, %v1803_v11  ;;  %v1845_v10 = vpop.f32.mrf.mxu1  ;;  %v3556_v11 = vld [vmem:[%s4286_s16 + $0xd0] sm:$0xf0]  ;;  %v3562_v14 = vld [vmem:[%s4286_s16 + $0xc8] sm:$0xf] }
 0x605   : > { %1864 = vmatmul.bf16.gmra.mxu1 %v1812_v16  ;;  %v3827_v16 = vld [vmem:[%s4286_s16 + $0xd4] sm:$0xf0] }
 0x606   : > { %1985 = vmatpush.bf16.msrb.mxu3 %v3793_v7 }
 0x60a   : > { %1986 = vmatpush.bf16.msrb.mxu3 %v3792_v8  ;;  %v3508_v8 = vld [vmem:[%s4286_s16 + $0x70] sm:$0xf0] }
 0x60b   : > { %v1847_v48 = vpop.f32.mrf.mxu1 }
 0x60c   : > { %v1877_v63 = vpack.c.bf16 %v1847_v48, %v1845_v10  ;;  %v3559_v10 = vor.u32 %v3824_v47, %v3556_v11  ;;  %v3563_v48 = vor.u32 %v3827_v16, %v3562_v14  ;;  %v3466_v47 = vld [vmem:[%s4286_s16 + $0x8] sm:$0xf] }
 0x60e   : > { %2286 = vmatpush.bf16.msra.mxu3 %v3575_v42  ;;  %2306 = vmatpush.bf16.msrb.mxu0 %v3563_v48  ;;  %v3800_v42 = vld [vmem:[%s4286_s16 + $0x4] sm:$0xf]  ;;  %v3580_v48 = vld [vmem:[%s4286_s16 + $0xf8] sm:$0xf0] }
 0x612   : > { %2287 = vmatpush.bf16.msra.mxu3 %v3559_v10  ;;  %v3829_v10 = vld [vmem:[%s4286_s16 + $0xec] sm:$0xf] }
 0x652   : > { %v1850_v50 = vpop.f32.mrf.mxu1 }
 0x65a   : > { %v1852_v51 = vpop.f32.mrf.mxu1 }
 0x65b   : > { %v1878_v60 = vpack.c.bf16 %v1852_v51, %v1850_v50  ;;  %v3538_v50 = vld [vmem:[%s4286_s16 + $0xa0] sm:$0xf]  ;;  %v3822_v51 = vld [vmem:[%s4286_s16 + $0xac] sm:$0xf0] }
 0x662   : > { %v1855_v58 = vpop.f32.mrf.mxu1 }
 0x66a   : > { %v1857_v49 = vpop.f32.mrf.mxu1 }
 0x66b   : > { %v1879_v57 = vpack.c.bf16 %v1857_v49, %v1855_v58  ;;  %v3820_v58 = vld [vmem:[%s4286_s16 + $0xa4] sm:$0xf]  ;;  %v3539_v49 = vor.u32 %v3822_v51, %v3538_v50  ;;  %v3583_v50 = vor.u32 %v3829_v10, %v3580_v48 }
 0x672   : > { %v1860_v52 = vpop.f32.mrf.mxu1 }
 0x67a   : > { %v1862_v53 = vpop.f32.mrf.mxu1 }
 0x67b   : > { %v1880_v56 = vpack.c.bf16 %v1862_v53, %v1860_v52  ;;  %v3540_v52 = vld [vmem:[%s4286_s16 + $0xb0] sm:$0xf0]  ;;  %v3546_v53 = vld [vmem:[%s4286_s16 + $0xa8] sm:$0xf] }
 0x682   : > { %v1865_v54 = vpop.f32.mrf.mxu1 }
 0x68a   : > { %v1867_v41 = vpop.f32.mrf.mxu1 }
 0x68b   : > { %v1881_v45 = vpack.c.bf16 %v1867_v41, %v1865_v54  ;;  %v3823_v54 = vld [vmem:[%s4286_s16 + $0xb4] sm:$0xf0]  ;;  %v3543_v41 = vor.u32 %v3820_v58, %v3540_v52  ;;  %v3825_v58 = vld [vmem:[%s4286_s16 + $0xcc] sm:$0xf] }
 0x68d   : > { %1894 = vmatpush.bf16.msra.mxu2 %v1881_v45  ;;  %v3547_v45 = vor.u32 %v3823_v54, %v3546_v53  ;;  %2288 = vmatpush.bf16.msra.mxu3 %v3543_v41 }
 0x68f   : > { %2307 = vmatpush.bf16.msrb.mxu0 %v3547_v45 }
 0x691   : > { %1895 = vmatpush.bf16.msra.mxu2 %v1880_v56  ;;  %v3522_v56 = vld [vmem:[%s4286_s16 + $0x80] sm:$0xf] }
 0x695   : > { %1896 = vmatpush.bf16.msra.mxu2 %v1879_v57  ;;  %v3818_v57 = vld [vmem:[%s4286_s16 + $0x8c] sm:$0xf0] }
 0x699   : > { %1897 = vmatpush.bf16.msra.mxu2 %v1878_v60  ;;  %v3816_v60 = vld [vmem:[%s4286_s16 + $0x84] sm:$0xf] }
 0x69a   : > { %v3527_v4 = vor.u32 %v3816_v60, %v3524_v61  ;;  %v3817_v61 = vld [vmem:[%s4286_s16 + $0x8c] sm:$0xf] }
 0x69c   : > { %2289 = vmatpush.bf16.msra.mxu3 %v3527_v4 }
 0x69d   : > { %1898 = vmatpush.bf16.msra.mxu2 %v1877_v63  ;;  %v3523_v63 = vor.u32 %v3818_v57, %v3522_v56  ;;  %v3821_v56 = vld [vmem:[%s4286_s16 + $0xac] sm:$0xf]  ;;  %v3548_v57 = vld [vmem:[%s4286_s16 + $0xb8] sm:$0xf0] }
 0x69e   : > { %v3551_v60 = vor.u32 %v3821_v56, %v3548_v57 }
 0x6a1   : > { %1899 = vmatpush.bf16.msra.mxu2 %v1876_v46  ;;  %v3826_v46 = vld [vmem:[%s4286_s16 + $0xcc] sm:$0xf0] }
 0x6a2   : > { %v3555_v59 = vor.u32 %v3826_v46, %v3554_v43  ;;  %v3459_v43 = vor.u32 %v3802_v38, %v3458_v29  ;;  %v3460_v46 = vld [vmem:[%s4286_s16 + $0x10] sm:$0xf0]  ;;  %v3468_v29 = vld [vmem:[%s4286_s16 + $0x18] sm:$0xf0] }
 0x6a3   : > { %v3463_v11 = vor.u32 %v3800_v42, %v3460_v46 }
 0x6a5   : > { %1900 = vmatpush.bf16.msra.mxu2 %v1875_v0  ;;  %v3570_v0 = vld [vmem:[%s4286_s16 + $0xe0] sm:$0xf] }
 0x6a6   : > { %v3571_v21 = vor.u32 %v3830_v34, %v3570_v0  ;;  %v3482_v0 = vld [vmem:[%s4286_s16 + $0x28] sm:$0xf]  ;;  %v3807_v34 = vld [vmem:[%s4286_s16 + $0x34] sm:$0xf0] }
 0x6a9   : > { %1901 = vmatpush.bf16.msra.mxu2 %v1874_v25 }
 0x6ac   : > { %1902 = vmatmul.bf16.vlgmr.msra.gmra.mxu2 %v3790_v5  ;;  %v3531_v5 = vor.u32 %v3819_v40, %v3530_v1  ;;  %v3532_v1 = vld [vmem:[%s4286_s16 + $0x98] sm:$0xf0] }
 0x6ad   : > { %2267 = vmatpush.bf16.msrb.mxu2 %v3571_v21  ;;  %v3483_v21 = vor.u32 %v3807_v34, %v3482_v0 }
 0x6ae   : > { %2308 = vmatpush.bf16.msrb.mxu0 %v3531_v5  ;;  %v3535_v5 = vor.u32 %v3817_v61, %v3532_v1  ;;  %v3839_v61 = vld [vmem:[%s4291_s25 + $0x38] sm:$0xff] }
 0x6af   : > { %v3847_v1 = vld [vmem:[%s4291_s25 + $0x78] sm:$0xff] }
 0x6b1   : > { %2268 = vmatpush.bf16.msrb.mxu2 %v3555_v59  ;;  %v3803_v59 = vld [vmem:[%s4286_s16 + $0x14] sm:$0xf0] }
 0x6b2   : > { %v3467_v14 = vor.u32 %v3803_v59, %v3466_v47 }
 0x6b5   : > { %2269 = vmatpush.bf16.msrb.mxu2 %v3539_v49  ;;  %v3564_v49 = vld [vmem:[%s4286_s16 + $0xd8] sm:$0xf0] }
 0x6b6   : > { %v3567_v53 = vor.u32 %v3825_v58, %v3564_v49 }
 0x6b9   : > { %2270 = vmatpush.bf16.msrb.mxu2 %v3523_v63 }
 0x6bc   : > { %1907 = vmatmul.bf16.gmra.mxu2 %v3791_v23  ;;  %v3814_v23 = vld [vmem:[%s4286_s16 + $0x6c] sm:$0xf0] }
 0x6bd   : > { %v3507_v7 = vor.u32 %v3814_v23, %v3506_v18 }
 0x6bf   : > { %2271 = vmatpush.bf16.msrb.mxu2 %v3507_v7 }
 0x72f   : > { %v1903_v9 = vpop.f32.mrf.mxu2 }
 0x737   : > { %v1905_v12 = vpop.f32.mrf.mxu2 }
 0x738   : > { %v1913_v13 = vpack.c.bf16 %v1905_v12, %v1903_v9  ;;  %v3514_v9 = vld [vmem:[%s4286_s16 + $0x68] sm:$0xf]  ;;  %v3815_v12 = vld [vmem:[%s4286_s16 + $0x74] sm:$0xf0] }
 0x73a   : > { %1987 = vmatmul.bf16.vlgmr.msrb.gmra.mxu3 %v1913_v13  ;;  %v3511_v13 = vor.u32 %v3812_v3, %v3508_v8 }
 0x73c   : > { %2290 = vmatpush.bf16.msra.mxu3 %v3511_v13 }
 0x73f   : > { %v1908_v15 = vpop.f32.mrf.mxu2 }
 0x747   : > { %v1910_v17 = vpop.f32.mrf.mxu2 }
 0x748   : > { %v1914_v20 = vpack.c.bf16 %v1910_v17, %v1908_v15  ;;  %v3515_v15 = vor.u32 %v3815_v12, %v3514_v9  ;;  %v3490_v17 = vld [vmem:[%s4286_s16 + $0x40] sm:$0xf]  ;;  %v3813_v9 = vld [vmem:[%s4286_s16 + $0x6c] sm:$0xf]  ;;  %v3516_v12 = vld [vmem:[%s4286_s16 + $0x78] sm:$0xf0] }
 0x749   : > { %v3519_v13 = vor.u32 %v3813_v9, %v3516_v12  ;;  %v3844_v12 = vld [vmem:[%s4291_s25 + $0x60] sm:$0xff] }
 0x74a   : > { %1992 = vmatmul.bf16.gmra.mxu3 %v1914_v20  ;;  %2309 = vmatpush.bf16.msrb.mxu0 %v3515_v15  ;;  %v3810_v20 = vld [vmem:[%s4286_s16 + $0x4c] sm:$0xf0]  ;;  %v2002_v15 = vld [vmem:[%s5324_s23] sm:$0x1]  ;;  %s5339_s23 = sld [smem:[#allocation11_spill]] (!%p3656_p5) }
 0x7bd   : > { %v1988_v22 = vpop.f32.mrf.mxu3 }
 0x7be   : > { %v4816_v39 = vadd.f32 %v4048_v62, %v1988_v22  ;;  %v3808_v22 = vld [vmem:[%s4286_s16 + $0x44] sm:$0xf]  ;;  %v3491_v62 = vor.u32 %v3810_v20, %v3490_v17 }
 0x7c0   : > { %v2003_v31 = vmul.f32 %v4816_v39, %v4816_v39  ;;  %2272 = vmatpush.bf16.msrb.mxu2 %v3491_v62  ;;  %v3500_v62 = vld [vmem:[%s4286_s16 + $0x58] sm:$0xf0] }
 0x7c2   : > { %2007 = vadd.xlane.f32.xlu0 %v2003_v31  ;;  %v3492_v31 = vld [vmem:[%s4286_s16 + $0x50] sm:$0xf0] }
 0x7c5   : > { %v1990_v35 = vpop.f32.mrf.mxu3 }
 0x7c6   : > { %v4820_v25 = vadd.f32 %v4049_v24, %v1990_v35  ;;  %v3498_v35 = vld [vmem:[%s4286_s16 + $0x48] sm:$0xf]  ;;  %v3811_v24 = vld [vmem:[%s4286_s16 + $0x54] sm:$0xf0] }
 0x7c8   : > { %v2004_v44 = vmul.f32 %v4820_v25, %v4820_v25 }
 0x7ca   : > { %2009 = vadd.xlane.f32.xlu1 %v2004_v44  ;;  %v3495_v44 = vor.u32 %v3808_v22, %v3492_v31  ;;  %v3809_v22 = vld [vmem:[%s4286_s16 + $0x4c] sm:$0xf] }
 0x7cb   : > { %v3503_v31 = vor.u32 %v3809_v22, %v3500_v62 }
 0x7cc   : > { %2291 = vmatpush.bf16.msra.mxu3 %v3495_v44  ;;  %v3805_v44 = vld [vmem:[%s4286_s16 + $0x2c] sm:$0xf] }
 0x7cd   : > { %v1993_v26 = vpop.f32.mrf.mxu3 }
 0x7ce   : > { %v4824_v19 = vadd.f32 %v4050_v27, %v1993_v26  ;;  %v3499_v26 = vor.u32 %v3811_v24, %v3498_v35  ;;  %v3474_v27 = vld [vmem:[%s4286_s16 + $0x20] sm:$0xf] }
 0x7d0   : > { %v2005_v28 = vmul.f32 %v4824_v19, %v4824_v19  ;;  %2310 = vmatpush.bf16.msrb.mxu0 %v3499_v26  ;;  %v3484_v26 = vld [vmem:[%s4286_s16 + $0x38] sm:$0xf0] }
 0x7d1   : > { %v3487_v34 = vor.u32 %v3805_v44, %v3484_v26 }
 0x7d2   : > { %2011 = vadd.xlane.f32.xlu2 %v2005_v28  ;;  %v3806_v28 = vld [vmem:[%s4286_s16 + $0x2c] sm:$0xf0] }
 0x7d4   : > { %2311 = vmatpush.bf16.msrb.mxu0 %v3483_v21 }
 0x7d5   : > { %v1995_v30 = vpop.f32.mrf.mxu3 }
 0x7d6   : > { %v4828_v33 = vadd.f32 %v4051_v32, %v1995_v30  ;;  %v3804_v30 = vld [vmem:[%s4286_s16 + $0x24] sm:$0xf]  ;;  %v3475_v32 = vor.u32 %v3806_v28, %v3474_v27  ;;  %v2067_v27 = vunpack.c.l.bf16 %v2002_v15  ;;  %v3843_v15 = vld [vmem:[%s4291_s25 + $0x58] sm:$0xff] }
 0x7d8   : > { %v2006_v37 = vmul.f32 %v4828_v33, %v4828_v33  ;;  %2273 = vmatpush.bf16.msrb.mxu2 %v3475_v32  ;;  %2312 = vmatpush.bf16.msrb.mxu0 %v3467_v14  ;;  %v2068_v38 = vperm.slane %v2067_v27, 0 }
 0x7da   : > { %2013 = vadd.xlane.f32.xlu0 %v2006_v37  ;;  %v3476_v37 = vld [vmem:[%s4286_s16 + $0x30] sm:$0xf0] }
 0x7db   : > { %v3479_v2 = vor.u32 %v3804_v30, %v3476_v37 }
 0x7dc   : > { %2274 = vmatpush.bf16.msrb.mxu2 %v3459_v43  ;;  %2662 = vmatpush.bf16.msra.mxu0 %v3847_v1 }
 0x7dd   : > { %2292 = vmatpush.bf16.msra.mxu3 %v3479_v2 }
 0x7e0   : > { %2324 = vmatpush.bf16.msra.mxu2 %v3583_v50 }
 0x7e1   : > { %2293 = vmatpush.bf16.msra.mxu3 %v3463_v11 }
 0x7e4   : > { %2325 = vmatpush.bf16.msra.mxu2 %v3567_v53 }
 0x7e5   : > { %2643 = vmatpush.bf16.msrb.mxu3 %v3839_v61 }
 0x7e8   : > { %2326 = vmatpush.bf16.msra.mxu2 %v3551_v60 }
 0x7ec   : > { %2327 = vmatpush.bf16.msra.mxu2 %v3535_v5  ;;  %v3837_v5 = vld [vmem:[%s4291_s25 + $0x28] sm:$0xff] }
 0x7f0   : > { %2328 = vmatpush.bf16.msra.mxu2 %v3519_v13  ;;  %v3835_v13 = vld [vmem:[%s4291_s25 + $0x18] sm:$0xff] }
 0x7f4   : > { %2329 = vmatpush.bf16.msra.mxu2 %v3503_v31 }
 0x7f8   : > { %2330 = vmatpush.bf16.msra.mxu2 %v3487_v34 }
 0x835   : > { %v2008_v36 = vpop.xlane.xlu0 %2007 }
 0x836   : > { %v2015_v6 = vmul.f32 %v2008_v36, %v4431_v55  ;;  %v3801_v36 = vld [vmem:[%s4286_s16 + $0xc] sm:$0xf] }
 0x837   : > { %v3471_v47 = vor.u32 %v3801_v36, %v3468_v29 }
 0x838   : > { %v2019_v16 = vadd.f32 1e-06, %v2015_v6 }
 0x839   : > { %2331 = vmatpush.bf16.msra.mxu2 %v3471_v47 }
 0x83a   : > { %4008 = vrsqrt.f32 %v2019_v16  ;;  %vm2029_vm15 = vweird.f32 %v2019_v16 }
 0x83d   : > { %v2010_v51 = vpop.xlane.xlu1 %2009 }
 0x83e   : > { %v2016_v52 = vmul.f32 %v2010_v51, %v4431_v55 }
 0x840   : > { %v4009_v54 = vpop.eup %4008  ;;  %v2020_v41 = vadd.f32 1e-06, %v2016_v52 }
 0x841   : > { %v2024_v45 = vmul.f32 %v4009_v54, %v2019_v16  ;;  %vm2030_vm14 = vweird.f32 %v4009_v54 }
 0x842   : > { %4010 = vrsqrt.f32 %v2020_v41  ;;  %vm2031_vm0 = vmor %vm2029_vm15, %vm2030_vm14  ;;  %vm2039_vm2 = vweird.f32 %v2020_v41 }
 0x843   : > { %v2025_v63 = vmul.f32 %v4009_v54, %v2024_v45 }
 0x845   : > { %v2026_v40 = vmul.f32 0.5, %v2025_v63  ;;  %v2012_v4 = vpop.xlane.xlu2 %2011 }
 0x846   : > { %v2017_v18 = vmul.f32 %v2012_v4, %v4431_v55  ;;  %v3846_v4 = vld [vmem:[%s4291_s25 + $0x70] sm:$0xff] }
 0x847   : > { %v2027_v23 = vsub.f32 1.5, %v2026_v40  ;;  %v3838_v40 = vld [vmem:[%s4291_s25 + $0x30] sm:$0xff]  ;;  %2663 = vmatpush.bf16.msra.mxu0 %v3846_v4 }
 0x848   : > { %v4011_v3 = vpop.eup %4010  ;;  %v2021_v7 = vadd.f32 1e-06, %v2017_v18  ;;  %2644 = vmatpush.bf16.msrb.mxu3 %v3838_v40  ;;  %v3845_v18 = vld [vmem:[%s4291_s25 + $0x68] sm:$0xff] }
 0x849   : > { %v2034_v8 = vmul.f32 %v4011_v3, %v2020_v41  ;;  %v2028_v17 = vmul.f32 %v4009_v54, %v2027_v23  ;;  %vm2040_vm1 = vweird.f32 %v4011_v3  ;;  %v3836_v23 = vld [vmem:[%s4291_s25 + $0x20] sm:$0xff] }
 0x84a   : > { %4012 = vrsqrt.f32 %v2021_v7  ;;  %vm2041_vm3 = vmor %vm2039_vm2, %vm2040_vm1  ;;  %vm2049_vm5 = vweird.f32 %v2021_v7 }
 0x84b   : > { %v2035_v20 = vmul.f32 %v4011_v3, %v2034_v8  ;;  %v2032_v30 = vsel %vm2031_vm0, %v4009_v54, %v2028_v17  ;;  %2664 = vmatpush.bf16.msra.mxu0 %v3845_v18  ;;  %v3834_v17 = vld [vmem:[%s4291_s25 + $0x10] sm:$0xff] }
 0x84c   : > { %v2063_v42 = vmul.f32 %v2032_v30, %v4816_v39  ;;  %2645 = vmatpush.bf16.msrb.mxu3 %v3837_v5  ;;  %v3841_v30 = vld [vmem:[%s4291_s25 + $0x48] sm:$0xff] }
 0x84d   : > { %v2036_v35 = vmul.f32 0.5, %v2035_v20  ;;  %v2014_v24 = vpop.xlane.xlu0 %2013 }
 0x84e   : > { %v2018_v28 = vmul.f32 %v2014_v24, %v4431_v55  ;;  %v2069_v11 = vmul.f32 %v2068_v38, %v2063_v42 }
 0x84f   : > { %v2037_v32 = vsub.f32 1.5, %v2036_v35  ;;  %2665 = vmatpush.bf16.msra.mxu0 %v3844_v12  ;;  %v3842_v35 = vld [vmem:[%s4291_s25 + $0x50] sm:$0xff] }
 0x850   : > { %v4013_v37 = vpop.eup %4012  ;;  %v2022_v0 = vadd.f32 1e-06, %v2018_v28  ;;  %2646 = vmatpush.bf16.msrb.mxu3 %v3836_v23  ;;  %v3833_v28 = vld [vmem:[%s4291_s25 + $0x8] sm:$0xff] }
 0x851   : > { %v2038_v2 = vmul.f32 %v4011_v3, %v2037_v32  ;;  %v2044_v21 = vmul.f32 %v4013_v37, %v2021_v7  ;;  %vm2050_vm4 = vweird.f32 %v4013_v37  ;;  %v3832_v32 = vld [vmem:[%s4291_s25] sm:$0xff] }
 0x852   : > { %4014 = vrsqrt.f32 %v2022_v0  ;;  %vm2051_vm6 = vmor %vm2049_vm5, %vm2050_vm4  ;;  %vm2059_vm8 = vweird.f32 %v2022_v0 }
 0x853   : > { %v2042_v6 = vsel %vm2041_vm3, %v4011_v3, %v2038_v2  ;;  %v2045_v43 = vmul.f32 %v4013_v37, %v2044_v21  ;;  %2666 = vmatpush.bf16.msra.mxu0 %v3843_v15  ;;  %v3840_v21 = vld [vmem:[%s4291_s25 + $0x40] sm:$0xff]  ;;  %s5333_s25 = sld [smem:[#allocation15_spill]] (!%p3656_p5) }
 0x854   : > { %v2064_v46 = vmul.f32 %v2042_v6, %v4820_v25  ;;  %2647 = vmatpush.bf16.msrb.mxu3 %v3835_v13 }
 0x855   : > { %v2046_v59 = vmul.f32 0.5, %v2045_v43 }
 0x856   : > { %v2070_v14 = vmul.f32 %v2068_v38, %v2064_v46 }
 0x857   : > { %v2047_v16 = vsub.f32 1.5, %v2046_v59  ;;  %2667 = vmatpush.bf16.msra.mxu0 %v3842_v35 }
 0x858   : > { %v4015_v10 = vpop.eup %4014  ;;  %v2073_v48 = vpack.c.bf16 %v2070_v14, %v2069_v11  ;;  %2648 = vmatpush.bf16.msrb.mxu3 %v3834_v17 }
 0x859   : > { %v2054_v50 = vmul.f32 %v4015_v10, %v2022_v0  ;;  %v2048_v51 = vmul.f32 %v4013_v37, %v2047_v16  ;;  %vm2060_vm7 = vweird.f32 %v4015_v10 }
 0x85a   : > { %2275 = vmatmul.bf16.vlgmr.msrb.gmra.mxu2 %v2073_v48  ;;  %2294 = vmatmul.bf16.vlgmr.msra.gmra.mxu3 %v2073_v48  ;;  %vm2061_vm9 = vmor %vm2059_vm8, %vm2060_vm7 }
 0x85b   : > { %v2055_v58 = vmul.f32 %v4015_v10, %v2054_v50  ;;  %2313 = vmatmul.bf16.vlgmr.msrb.gmra.mxu0 %v2073_v48  ;;  %v2052_v52 = vsel %vm2051_vm6, %v4013_v37, %v2048_v51  ;;  %3882 = vmatpush.bf16.msrb.mxu2 %v3847_v1 }
 0x85c   : > { %v2065_v41 = vmul.f32 %v2052_v52, %v4824_v19  ;;  %2649 = vmatpush.bf16.msrb.mxu3 %v3833_v28  ;;  %2668 = vmatpush.bf16.msra.mxu0 %v3841_v30 }
 0x85d   : > { %v2056_v49 = vmul.f32 0.5, %v2055_v58 }
 0x85e   : > { %v2071_v57 = vmul.f32 %v2068_v38, %v2065_v41 }
 0x85f   : > { %v2057_v53 = vsub.f32 1.5, %v2056_v49  ;;  %3883 = vmatpush.bf16.msrb.mxu2 %v3846_v4 }
 0x860   : > { %2650 = vmatpush.bf16.msrb.mxu3 %v3832_v32  ;;  %2669 = vmatpush.bf16.msra.mxu0 %v3840_v21 }
 0x861   : > { %v2058_v54 = vmul.f32 %v4015_v10, %v2057_v53 }
 0x863   : > { %v2062_v45 = vsel %vm2061_vm9, %v4015_v10, %v2058_v54  ;;  %3884 = vmatpush.bf16.msrb.mxu2 %v3845_v18 }
 0x864   : > { %v2066_v56 = vmul.f32 %v2062_v45, %v4828_v33 }
 0x866   : > { %v2072_v60 = vmul.f32 %v2068_v38, %v2066_v56 }
 0x867   : > { %3885 = vmatpush.bf16.msrb.mxu2 %v3844_v12 }
 0x868   : > { %v2074_v63 = vpack.c.bf16 %v2072_v60, %v2071_v57 }
 0x86a   : > { %2280 = vmatmul.bf16.gmra.mxu2 %v2074_v63  ;;  %2299 = vmatmul.bf16.gmra.mxu3 %v2074_v63 }
 0x86b   : > { %2318 = vmatmul.bf16.gmra.mxu0 %v2074_v63  ;;  %3886 = vmatpush.bf16.msrb.mxu2 %v3843_v15 }
 0x86f   : > { %3887 = vmatpush.bf16.msrb.mxu2 %v3842_v35 }
 0x873   : > { %3888 = vmatpush.bf16.msrb.mxu2 %v3841_v30 }
 0x877   : > { %3889 = vmatpush.bf16.msrb.mxu2 %v3840_v21 }
 0x87a   : > { %2332 = vmatmul.bf16.vlgmr.msra.gmra.mxu2 %v2073_v48 }
 0x88a   : > { %2337 = vmatmul.bf16.gmra.mxu2 %v2074_v63 }
 0x8d8   : > { %v4956_v10 = vpop.f32.mrf.mxu0 }
 0x8dd   : > { %v4916_v3 = vpop.f32.mrf.mxu2  ;;  %v4918_v7 = vpop.f32.mrf.mxu3 }
 0x8de   : > { %v3584_v8 = vmul.f32 -1.442695, %v4916_v3  ;;  %v3585_v9 = vmul.f32 -1.442695, %v4918_v7 }
 0x8e0   : > { %4016 = vpow2.f32 %v3584_v8 }
 0x8e1   : > { %4018 = vpow2.f32 %v3585_v9 }
 0x8e5   : > { %v4926_v20 = vpop.f32.mrf.mxu2  ;;  %v4928_v22 = vpop.f32.mrf.mxu3 }
 0x8e6   : > { %v4017_v62 = vpop.eup %4016  ;;  %v3586_v31 = vmul.f32 -1.442695, %v4926_v20  ;;  %v3587_v26 = vmul.f32 -1.442695, %v4928_v22 }
 0x8e7   : > { %v4019_v24 = vpop.eup %4018  ;;  %v2367_v44 = vadd.f32 1.0, %v4017_v62 }
 0x8e8   : > { %v4933_v27 = vadd.f32 1.0, %v4019_v24  ;;  %4020 = vpow2.f32 %v3586_v31 }
 0x8e9   : > { %4022 = vrcp.f32 %v2367_v44  ;;  %v2384_v16 = vand.u32 2147483647, %v2367_v44  ;;  %v2386_v48 = vand.u32 2147483648, %v2367_v44  ;;  %vm2380_vm11 = vweird.f32 %v2367_v44 }
 0x8ea   : > { %4024 = vrcp.f32 %v4933_v27  ;;  %v2399_v50 = vand.u32 2147483647, %v4933_v27  ;;  %v2401_v52 = vand.u32 2147483648, %v4933_v27  ;;  %vm2395_vm13 = vweird.f32 %v4933_v27 }
 0x8eb   : > { %4026 = vpow2.f32 %v3587_v26  ;;  %vm4968_vm12 = vcmp.eq.f32.partialorder %v2384_v16, 8.507059e+37  ;;  %v2387_v1 = vor.u32 1.1754944e-38, %v2386_v48 }
 0x8ec   : > { %vm4983_vm15 = vcmp.eq.f32.partialorder %v2399_v50, 8.507059e+37  ;;  %v2402_v8 = vor.u32 1.1754944e-38, %v2401_v52 }
 0x8ed   : > { %v4939_v37 = vpop.f32.mrf.mxu2  ;;  %v4941_v0 = vpop.f32.mrf.mxu3 }
 0x8ee   : > { %v4021_v34 = vpop.eup %4020  ;;  %v3588_v2 = vmul.f32 -1.442695, %v4939_v37  ;;  %v3589_v38 = vmul.f32 -1.442695, %v4941_v0 }
 0x8ef   : > { %v4023_v36 = vpop.eup %4022  ;;  %v4945_v29 = vadd.f32 1.0, %v4021_v34 }
 0x8f0   : > { %v4948_v42 = vpop.eup %4024  ;;  %v2376_v6 = vmul.f32 %v4023_v36, %v2367_v44  ;;  %4028 = vpow2.f32 %v3588_v2  ;;  %vm2381_vm10 = vweird.f32 %v4023_v36 }
 0x8f1   : > { %v4027_v43 = vpop.eup %4026  ;;  %v2391_v46 = vmul.f32 %v4948_v42, %v4933_v27  ;;  %4030 = vrcp.f32 %v4945_v29  ;;  %vm4974_vm14 = vmor %vm2380_vm11, %vm2381_vm10  ;;  %v2416_v40 = vand.u32 2147483648, %v4945_v29  ;;  %vm2396_vm0 = vweird.f32 %v4948_v42 }
 0x8f2   : > { %v2377_v47 = vsub.f32 1.0, %v2376_v6  ;;  %v4953_v59 = vadd.f32 1.0, %v4027_v43  ;;  %4032 = vpow2.f32 %v3589_v38  ;;  %vm2410_vm1 = vweird.f32 %v4945_v29  ;;  %vm4998_vm3 = vmor %vm2395_vm13, %vm2396_vm0 }
 0x8f3   : > { %v2392_v11 = vsub.f32 1.0, %v2391_v46  ;;  %v2414_v17 = vand.u32 2147483647, %v4945_v29  ;;  %v2417_v35 = vor.u32 1.1754944e-38, %v2416_v40 }
 0x8f4   : > { %v2378_v14 = vmul.f32 %v4023_v36, %v2377_v47  ;;  %4034 = vrcp.f32 %v4953_v59  ;;  %v2429_v32 = vand.u32 2147483647, %v4953_v59  ;;  %v2431_v34 = vand.u32 2147483648, %v4953_v59 }
 0x8f5   : > { %v4959_v51 = vpop.f32.mrf.mxu2  ;;  %v4963_v54 = vpop.f32.mrf.mxu3  ;;  %v2393_v45 = vmul.f32 %v4948_v42, %v2392_v11  ;;  %vm2415_vm6 = vcmp.eq.f32.partialorder %v2414_v17, 8.507059e+37  ;;  %vm2425_vm7 = vweird.f32 %v4953_v59 }
 0x8f6   : > { %v4029_v58 = vpop.eup %4028  ;;  %v2379_v49 = vadd.f32 %v4023_v36, %v2378_v14  ;;  %v3590_v53 = vmul.f32 -1.442695, %v4959_v51  ;;  %v3591_v4 = vmul.f32 -1.442695, %v4963_v54  ;;  %v2432_v14 = vor.u32 1.1754944e-38, %v2431_v34 }
 0x8f7   : > { %v4031_v41 = vpop.eup %4030  ;;  %v4966_v56 = vadd.f32 1.0, %v4029_v58  ;;  %v2394_v12 = vadd.f32 %v4948_v42, %v2393_v45  ;;  %vm2430_vm9 = vcmp.eq.f32.partialorder %v2429_v32, 8.507059e+37 }
 0x8f8   : > { %v2406_v60 = vmul.f32 %v4031_v41, %v4945_v29  ;;  %4036 = vpow2.f32 %v3590_v53  ;;  %v4033_v63 = vpop.eup %4032  ;;  %v2383_v18 = vsel %vm4974_vm14, %v4023_v36, %v2379_v49  ;;  %vm2411_vm2 = vweird.f32 %v4031_v41  ;;  %v2316_v36 = vpop.f32.mrf.mxu0 }
 0x8f9   : > { %4038 = vrcp.f32 %v4966_v56  ;;  %v4992_v62 = vadd.f32 1.0, %v4033_v63  ;;  %v2388_v31 = vsel %vm4968_vm12, %v2387_v1, %v2383_v18  ;;  %v2398_v21 = vsel %vm4998_vm3, %v4948_v42, %v2394_v12  ;;  %vm2412_vm4 = vmor %vm2410_vm1, %vm2411_vm2 }
 0x8fa   : > { %v4035_v5 = vpop.eup %4034  ;;  %v2407_v9 = vsub.f32 1.0, %v2406_v60  ;;  %4040 = vpow2.f32 %v3591_v4  ;;  %v2495_v6 = vmul.f32 %v2388_v31, %v4916_v3  ;;  %v2403_v29 = vsel %vm4983_vm15, %v2402_v8, %v2398_v21 }
 0x8fb   : > { %v2421_v13 = vmul.f32 %v4035_v5, %v4953_v59  ;;  %4042 = vrcp.f32 %v4992_v62  ;;  %vm2426_vm5 = vweird.f32 %v4035_v5  ;;  %v2496_v53 = vmul.f32 %v2403_v29, %v4918_v7 }
 0x8fc   : > { %v2408_v15 = vmul.f32 %v4031_v41, %v2407_v9  ;;  %vm2427_vm8 = vmor %vm2425_vm7, %vm2426_vm5  ;;  %v2503_v58 = vmul.f32 %v2495_v6, %v4956_v10  ;;  %vm2440_vm11 = vweird.f32 %v4966_v56  ;;  %v2446_v10 = vand.u32 2147483648, %v4966_v56 }
 0x8fd   : > { %v2422_v24 = vsub.f32 1.0, %v2421_v13  ;;  %v2333_v44 = vpop.f32.mrf.mxu2  ;;  %v2444_v4 = vand.u32 2147483647, %v4966_v56  ;;  %v2461_v32 = vand.u32 2147483648, %v4992_v62  ;;  %vm2455_vm3 = vweird.f32 %v4992_v62 }
 0x8fe   : > { %v4037_v26 = vpop.eup %4036  ;;  %v2409_v30 = vadd.f32 %v4031_v41, %v2408_v15  ;;  %v2447_v9 = vor.u32 1.1754944e-38, %v2446_v10 }
 0x8ff   : > { %v4039_v2 = vpop.eup %4038  ;;  %v2423_v27 = vmul.f32 %v4035_v5, %v2422_v24  ;;  %v5011_v38 = vadd.f32 1.0, %v4037_v26  ;;  %vm2445_vm13 = vcmp.eq.f32.partialorder %v2444_v4, 8.507059e+37 }
 0x900   : > { %v2413_v43 = vsel %vm2412_vm4, %v4031_v41, %v2409_v30  ;;  %v2436_v46 = vmul.f32 %v4039_v2, %v4966_v56  ;;  %v4041_v48 = vpop.eup %4040  ;;  %vm2441_vm10 = vweird.f32 %v4039_v2 }
 0x901   : > { %v2418_v47 = vsel %vm2415_vm6, %v2417_v35, %v2413_v43  ;;  %v2424_v11 = vadd.f32 %v4035_v5, %v2423_v27  ;;  %4044 = vrcp.f32 %v5011_v38  ;;  %v5020_v50 = vpop.eup %4042  ;;  %v2374_v63 = vadd.f32 1.0, %v4041_v48  ;;  %vm2442_vm12 = vmor %vm2440_vm11, %vm2441_vm10 }
 0x902   : > { %v2497_v42 = vmul.f32 %v2418_v47, %v4926_v20  ;;  %v2437_v16 = vsub.f32 1.0, %v2436_v46  ;;  %v2451_v20 = vmul.f32 %v5020_v50, %v4992_v62  ;;  %v2476_v13 = vand.u32 2147483648, %v5011_v38 }
 0x903   : > { %v2428_v3 = vsel %vm2427_vm8, %v4035_v5, %v2424_v11  ;;  %4046 = vrcp.f32 %v2374_v63  ;;  %v2319_v5 = vpop.f32.mrf.mxu0  ;;  %v2474_v56 = vand.u32 2147483647, %v5011_v38  ;;  %vm2470_vm15 = vweird.f32 %v5011_v38 }
 0x904   : > { %v2505_v49 = vmul.f32 %v2497_v42, %v2316_v36  ;;  %v2433_v52 = vsel %vm2430_vm9, %v2432_v14, %v2428_v3  ;;  %v2438_v59 = vmul.f32 %v4039_v2, %v2437_v16  ;;  %v2452_v1 = vsub.f32 1.0, %v2451_v20 }
 0x905   : > { %v2498_v41 = vmul.f32 %v2433_v52, %v4928_v22  ;;  %v2335_v45 = vpop.f32.mrf.mxu2  ;;  %v2504_v22 = vmul.f32 %v2496_v53, %v2333_v44  ;;  %vm2456_vm0 = vweird.f32 %v5020_v50  ;;  %v2477_v26 = vor.u32 1.1754944e-38, %v2476_v13 }
 0x906   : > { %v2511_v57 = vpack.c.bf16 %v2505_v49, %v2503_v58  ;;  %v2439_v60 = vadd.f32 %v4039_v2, %v2438_v59  ;;  %v2453_v12 = vmul.f32 %v5020_v50, %v2452_v1  ;;  %vm2475_vm2 = vcmp.eq.f32.partialorder %v2474_v56, 8.507059e+37  ;;  %vm2457_vm4 = vmor %vm2455_vm3, %vm2456_vm0 }
 0x907   : > { %v4045_v61 = vpop.eup %4044  ;;  %v2506_v40 = vmul.f32 %v2498_v41, %v2335_v45  ;;  %v2462_v11 = vor.u32 1.1754944e-38, %v2461_v32  ;;  %vm2485_vm7 = vweird.f32 %v2374_v63 }
 0x908   : > { %v2466_v7 = vmul.f32 %v4045_v61, %v5011_v38  ;;  %2651 = vmatmul.bf16.vlgmr.msrb.gmra.mxu3 %v2511_v57  ;;  %v2443_v18 = vsel %vm2442_vm12, %v4039_v2, %v2439_v60  ;;  %vm2471_vm14 = vweird.f32 %v4045_v61  ;;  %v2454_v44 = vadd.f32 %v5020_v50, %v2453_v12 }
 0x909   : > { %v2512_v8 = vpack.c.bf16 %v2506_v40, %v2504_v22  ;;  %v2448_v17 = vsel %vm2445_vm13, %v2447_v9, %v2443_v18  ;;  %v4047_v31 = vpop.eup %4046  ;;  %vm2472_vm1 = vmor %vm2470_vm15, %vm2471_vm14  ;;  %v2459_v2 = vand.u32 2147483647, %v4992_v62  ;;  %v2491_v38 = vand.u32 2147483648, %v2374_v63 }
 0x90a   : > { %v2467_v23 = vsub.f32 1.0, %v2466_v7  ;;  %v2481_v28 = vmul.f32 %v4047_v31, %v2374_v63  ;;  %v2499_v30 = vmul.f32 %v2448_v17, %v4939_v37  ;;  %v2458_v6 = vsel %vm2457_vm4, %v5020_v50, %v2454_v44 }
 0x90b   : > { %2670 = vmatmul.bf16.vlgmr.msra.gmra.mxu0 %v2512_v8  ;;  %v2321_v43 = vpop.f32.mrf.mxu0  ;;  %vm2486_vm5 = vweird.f32 %v4047_v31  ;;  %v2489_v37 = vand.u32 2147483647, %v2374_v63  ;;  %vm2460_vm6 = vcmp.eq.f32.partialorder %v2459_v2, 8.507059e+37  ;;  %v2492_v62 = vor.u32 1.1754944e-38, %v2491_v38 }
 0x90c   : > { %v2468_v15 = vmul.f32 %v4045_v61, %v2467_v23  ;;  %v2482_v36 = vsub.f32 1.0, %v2481_v28  ;;  %v2507_v47 = vmul.f32 %v2499_v30, %v2319_v5  ;;  %v2463_v14 = vsel %vm2460_vm6, %v2462_v11, %v2458_v6  ;;  %vm2487_vm8 = vmor %vm2485_vm7, %vm2486_vm5 }
 0x90d   : > { %v2338_v24 = vpop.f32.mrf.mxu2  ;;  %vm2490_vm9 = vcmp.eq.f32.partialorder %v2489_v37, 8.507059e+37  ;;  %v2500_v50 = vmul.f32 %v2463_v14, %v4941_v0 }
 0x90e   : > { %v2469_v35 = vadd.f32 %v4045_v61, %v2468_v15  ;;  %v2483_v46 = vmul.f32 %v4047_v31, %v2482_v36 }
 0x90f   : > { %v2508_v49 = vmul.f32 %v2500_v50, %v2338_v24 }
 0x910   : > { %v2473_v34 = vsel %vm2472_vm1, %v4045_v61, %v2469_v35  ;;  %v2484_v42 = vadd.f32 %v4047_v31, %v2483_v46 }
 0x911   : > { %v2478_v21 = vsel %vm2475_vm2, %v2477_v26, %v2473_v34 }
 0x912   : > { %v2501_v27 = vmul.f32 %v2478_v21, %v4959_v51  ;;  %v2488_v48 = vsel %vm2487_vm8, %v4047_v31, %v2484_v42 }
 0x913   : > { %v2493_v51 = vsel %vm2490_vm9, %v2492_v62, %v2488_v48 }
 0x914   : > { %v2509_v29 = vmul.f32 %v2501_v27, %v2321_v43  ;;  %v2502_v58 = vmul.f32 %v2493_v51, %v4963_v54 }
 0x915   : > { %v2340_v3 = vpop.f32.mrf.mxu2 }
 0x916   : > { %v2513_v16 = vpack.c.bf16 %v2509_v29, %v2507_v47  ;;  %v2510_v52 = vmul.f32 %v2502_v58, %v2340_v3 }
 0x918   : > { %2656 = vmatmul.bf16.gmra.mxu3 %v2513_v16  ;;  %v2514_v59 = vpack.c.bf16 %v2510_v52, %v2508_v49 }
 0x91a   : > { %2675 = vmatmul.bf16.vlgmr.msrb.gmra.mxu2 %v2514_v59 }
 0x988   : > { %v2671_v53 = vpop.f32.mrf.mxu0 }
 0x98b   : > { %v2652_v41 = vpop.f32.mrf.mxu3 }
 0x98c   : > { %v2672_v20 = vadd.f32 %v2671_v53, %v2652_v41 }
 0x98e   : > { %v5046_v45 = vadd.f32 %v2672_v20, %v4816_v39 }
 0x990   : > { %2685 = vst [vmem:[#allocation2 + $0x10] sm:$0xff] %v5046_v45  ;;  %v2673_v57 = vpop.f32.mrf.mxu0 }
 0x993   : > { %v2654_v60 = vpop.f32.mrf.mxu3 }
 0x994   : > { %v2674_v63 = vadd.f32 %v2673_v57, %v2654_v60 }
 0x996   : > { %v5050_v61 = vadd.f32 %v2674_v63, %v4820_v25 }
 0x998   : > { %2686 = vst [vmem:[#allocation2] sm:$0xff] %v5050_v61 }
 0x99b   : > { %v2657_v0 = vpop.f32.mrf.mxu3 }
 0x99d   : > { %v2676_v54 = vpop.f32.mrf.mxu2 }
 0x99e   : > { %v2677_v10 = vadd.f32 %v2676_v54, %v2657_v0 }
 0x9a0   : > { %v5054_v1 = vadd.f32 %v2677_v10, %v4824_v19 }
 0x9a2   : > { %2687 = vst [vmem:[#allocation2 + $0x18] sm:$0xff] %v5054_v1 }
 0x9a3   : > { %v2659_v39 = vpop.f32.mrf.mxu3 }
 0x9a5   : > { %v2678_v40 = vpop.f32.mrf.mxu2 }
 0x9a6   : > { %v2679_v4 = vadd.f32 %v2678_v40, %v2659_v39  ;;  %2692 = sbr.rel (%p3656_p5) target bundleno = 3220 (0xc94), region = 100 }
 0x9a8   : > { %v5058_v7 = vadd.f32 %v2679_v4, %v4828_v33 }
 0x9aa   : > { %2688 = vst [vmem:[#allocation2 + $0x8] sm:$0xff] %v5058_v7 }
 0x9ab   : > { %v2696_v25 = vmul.f32 %v5054_v1, %v5054_v1  ;;  %v2694_v19 = vmul.f32 %v5046_v45, %v5046_v45  ;;  %v2697_v22 = vmul.f32 %v5058_v7, %v5058_v7  ;;  %v2695_v33 = vmul.f32 %v5050_v61, %v5050_v61  ;;  %v3715_v5 = vld [vmem:[%s5333_s25 + $0x70] sm:$0xf]  ;;  %v3863_v18 = vld [vmem:[%s5333_s25 + $0x74] sm:$0xf0]  ;;  %v3862_v23 = vld [vmem:[%s5333_s25 + $0x74] sm:$0xf] }
 0x9ac   : > { %v3716_v8 = vor.u32 %v3863_v18, %v3715_v5  ;;  %v3717_v9 = vld [vmem:[%s5333_s25 + $0x78] sm:$0xf0]  ;;  %v3707_v13 = vld [vmem:[%s5333_s25 + $0x60] sm:$0xf]  ;;  %v3861_v15 = vld [vmem:[%s5333_s25 + $0x64] sm:$0xf0] }
 0x9ad   : > { %2702 = vadd.xlane.f32.xlu1 %v2696_v25  ;;  %2698 = vadd.xlane.f32.xlu0 %v2694_v19  ;;  %v3720_v12 = vor.u32 %v3862_v23, %v3717_v9  ;;  %v3860_v56 = vld [vmem:[%s5333_s25 + $0x64] sm:$0xf]  ;;  %v3708_v17 = vor.u32 %v3861_v15, %v3707_v13  ;;  %v3709_v31 = vld [vmem:[%s5333_s25 + $0x68] sm:$0xf0]  ;;  %v3699_v24 = vld [vmem:[%s5333_s25 + $0x50] sm:$0xf] }
 0x9ae   : > { %2862 = vmatpush.bf16.msra.mxu0 %v3716_v8  ;;  %3890 = vmatpush.bf16.msra.mxu2 %v3716_v8  ;;  %v3712_v35 = vor.u32 %v3860_v56, %v3709_v31  ;;  %v3859_v44 = vld [vmem:[%s5333_s25 + $0x54] sm:$0xf0]  ;;  %v3858_v26 = vld [vmem:[%s5333_s25 + $0x54] sm:$0xf]  ;;  %v3701_v30 = vld [vmem:[%s5333_s25 + $0x58] sm:$0xf0] }
 0x9af   : > { %2881 = vmatpush.bf16.msra.mxu1 %v3720_v12  ;;  %3898 = vmatpush.bf16.msra.mxu3 %v3720_v12  ;;  %v3700_v28 = vor.u32 %v3859_v44, %v3699_v24  ;;  %v3704_v32 = vor.u32 %v3858_v26, %v3701_v30  ;;  %v3691_v34 = vld [vmem:[%s5333_s25 + $0x40] sm:$0xf]  ;;  %v3857_v2 = vld [vmem:[%s5333_s25 + $0x44] sm:$0xf0]  ;;  %v3856_v21 = vld [vmem:[%s5333_s25 + $0x44] sm:$0xf] }
 0x9b0   : > { %v3692_v36 = vor.u32 %v3857_v2, %v3691_v34  ;;  %v3693_v27 = vld [vmem:[%s5333_s25 + $0x48] sm:$0xf0]  ;;  %v3683_v6 = vld [vmem:[%s5333_s25 + $0x30] sm:$0xf]  ;;  %v3855_v43 = vld [vmem:[%s5333_s25 + $0x34] sm:$0xf0] }
 0x9b1   : > { %v3696_v38 = vor.u32 %v3856_v21, %v3693_v27  ;;  %v3854_v46 = vld [vmem:[%s5333_s25 + $0x34] sm:$0xf]  ;;  %v3684_v37 = vor.u32 %v3855_v43, %v3683_v6  ;;  %v3685_v47 = vld [vmem:[%s5333_s25 + $0x38] sm:$0xf0]  ;;  %v3675_v29 = vld [vmem:[%s5333_s25 + $0x20] sm:$0xf] }
 0x9b2   : > { %2863 = vmatpush.bf16.msra.mxu0 %v3708_v17  ;;  %3891 = vmatpush.bf16.msra.mxu2 %v3708_v17  ;;  %v3688_v11 = vor.u32 %v3854_v46, %v3685_v47  ;;  %v3853_v42 = vld [vmem:[%s5333_s25 + $0x24] sm:$0xf0]  ;;  %v3852_v14 = vld [vmem:[%s5333_s25 + $0x24] sm:$0xf]  ;;  %v3677_v16 = vld [vmem:[%s5333_s25 + $0x28] sm:$0xf0] }
 0x9b3   : > { %2882 = vmatpush.bf16.msra.mxu1 %v3712_v35  ;;  %3899 = vmatpush.bf16.msra.mxu3 %v3712_v35  ;;  %v3676_v62 = vor.u32 %v3853_v42, %v3675_v29  ;;  %v3680_v48 = vor.u32 %v3852_v14, %v3677_v16  ;;  %v3667_v51 = vld [vmem:[%s5333_s25 + $0x10] sm:$0xf]  ;;  %v3851_v3 = vld [vmem:[%s5333_s25 + $0x14] sm:$0xf0]  ;;  %v3850_v50 = vld [vmem:[%s5333_s25 + $0x14] sm:$0xf] }
 0x9b4   : > { %v3668_v58 = vor.u32 %v3851_v3, %v3667_v51  ;;  %v3669_v49 = vld [vmem:[%s5333_s25 + $0x18] sm:$0xf0]  ;;  %v3659_v52 = vld [vmem:[%s5333_s25] sm:$0xf]  ;;  %v3849_v59 = vld [vmem:[%s5333_s25 + $0x4] sm:$0xf0] }
 0x9b5   : > { %2704 = vadd.xlane.f32.xlu1 %v2697_v22  ;;  %2700 = vadd.xlane.f32.xlu0 %v2695_v33  ;;  %v3672_v53 = vor.u32 %v3850_v50, %v3669_v49  ;;  %v3848_v41 = vld [vmem:[%s5333_s25 + $0x4] sm:$0xf]  ;;  %v3661_v20 = vld [vmem:[%s5333_s25 + $0x8] sm:$0xf0]  ;;  %v3660_v57 = vor.u32 %v3849_v59, %v3659_v52 }
 0x9b6   : > { %2864 = vmatpush.bf16.msra.mxu0 %v3700_v28  ;;  %3892 = vmatpush.bf16.msra.mxu2 %v3700_v28  ;;  %v3664_v0 = vor.u32 %v3848_v41, %v3661_v20  ;;  %v2693_v28 = vld [vmem:[%s5334_s26] sm:$0x1] }
 0x9b7   : > { %2883 = vmatpush.bf16.msra.mxu1 %v3704_v32  ;;  %3900 = vmatpush.bf16.msra.mxu3 %v3704_v32  ;;  %v2758_v27 = vunpack.c.l.bf16 %v2693_v28 }
 0x9b9   : > { %v2759_v29 = vperm.slane %v2758_v27, 0 }
 0x9ba   : > { %2865 = vmatpush.bf16.msra.mxu0 %v3692_v36  ;;  %3893 = vmatpush.bf16.msra.mxu2 %v3692_v36 }
 0x9bb   : > { %2884 = vmatpush.bf16.msra.mxu1 %v3696_v38  ;;  %3901 = vmatpush.bf16.msra.mxu3 %v3696_v38 }
 0x9be   : > { %2866 = vmatpush.bf16.msra.mxu0 %v3684_v37  ;;  %3894 = vmatpush.bf16.msra.mxu2 %v3684_v37 }
 0x9bf   : > { %2885 = vmatpush.bf16.msra.mxu1 %v3688_v11  ;;  %3902 = vmatpush.bf16.msra.mxu3 %v3688_v11 }
 0x9c2   : > { %2867 = vmatpush.bf16.msra.mxu0 %v3676_v62  ;;  %3895 = vmatpush.bf16.msra.mxu2 %v3676_v62 }
 0x9c3   : > { %2886 = vmatpush.bf16.msra.mxu1 %v3680_v48  ;;  %3903 = vmatpush.bf16.msra.mxu3 %v3680_v48 }
 0x9c6   : > { %2868 = vmatpush.bf16.msra.mxu0 %v3668_v58  ;;  %3896 = vmatpush.bf16.msra.mxu2 %v3668_v58 }
 0x9c7   : > { %2887 = vmatpush.bf16.msra.mxu1 %v3672_v53  ;;  %3904 = vmatpush.bf16.msra.mxu3 %v3672_v53 }
 0x9ca   : > { %2869 = vmatpush.bf16.msra.mxu0 %v3660_v57  ;;  %3897 = vmatpush.bf16.msra.mxu2 %v3660_v57 }
 0x9cb   : > { %2888 = vmatpush.bf16.msra.mxu1 %v3664_v0  ;;  %3905 = vmatpush.bf16.msra.mxu3 %v3664_v0 }
 0xa20   : > { %v2703_v60 = vpop.xlane.xlu1 %2702  ;;  %v2699_v63 = vpop.xlane.xlu0 %2698 }
 0xa21   : > { %v2708_v54 = vmul.f32 %v2703_v60, %v4431_v55  ;;  %v2706_v10 = vmul.f32 %v2699_v63, %v4431_v55 }
 0xa23   : > { %v2712_v39 = vadd.f32 1e-06, %v2708_v54  ;;  %v2710_v40 = vadd.f32 1e-06, %v2706_v10 }
 0xa25   : > { %4052 = vrsqrt.f32 %v2712_v39  ;;  %vm2740_vm12 = vweird.f32 %v2712_v39  ;;  %vm2720_vm14 = vweird.f32 %v2710_v40 }
 0xa26   : > { %4054 = vrsqrt.f32 %v2710_v40 }
 0xa28   : > { %v2705_v4 = vpop.xlane.xlu1 %2704  ;;  %v2701_v25 = vpop.xlane.xlu0 %2700 }
 0xa29   : > { %v2709_v19 = vmul.f32 %v2705_v4, %v4431_v55  ;;  %v2707_v22 = vmul.f32 %v2701_v25, %v4431_v55 }
 0xa2b   : > { %v4053_v33 = vpop.eup %4052  ;;  %v2713_v5 = vadd.f32 1e-06, %v2709_v19  ;;  %v2711_v18 = vadd.f32 1e-06, %v2707_v22 }
 0xa2c   : > { %v4055_v23 = vpop.eup %4054  ;;  %v2735_v8 = vmul.f32 %v4053_v33, %v2712_v39  ;;  %vm2741_vm10 = vweird.f32 %v4053_v33 }
 0xa2d   : > { %v2715_v9 = vmul.f32 %v4055_v23, %v2710_v40  ;;  %4056 = vrsqrt.f32 %v2713_v5  ;;  %vm2721_vm11 = vweird.f32 %v4055_v23  ;;  %vm5173_vm13 = vmor %vm2740_vm12, %vm2741_vm10  ;;  %vm2750_vm2 = vweird.f32 %v2713_v5 }
 0xa2e   : > { %v2736_v12 = vmul.f32 %v4053_v33, %v2735_v8  ;;  %4058 = vrsqrt.f32 %v2711_v18  ;;  %vm5177_vm15 = vmor %vm2720_vm14, %vm2721_vm11  ;;  %vm2730_vm4 = vweird.f32 %v2711_v18 }
 0xa2f   : > { %v2716_v13 = vmul.f32 %v4055_v23, %v2715_v9 }
 0xa30   : > { %v2737_v15 = vmul.f32 0.5, %v2736_v12 }
 0xa31   : > { %v2717_v56 = vmul.f32 0.5, %v2716_v13 }
 0xa32   : > { %v2738_v17 = vsub.f32 1.5, %v2737_v15 }
 0xa33   : > { %v4057_v31 = vpop.eup %4056  ;;  %v2718_v35 = vsub.f32 1.5, %v2717_v56 }
 0xa34   : > { %v4059_v24 = vpop.eup %4058  ;;  %v2745_v44 = vmul.f32 %v4057_v31, %v2713_v5  ;;  %v2739_v30 = vmul.f32 %v4053_v33, %v2738_v17  ;;  %vm2751_vm0 = vweird.f32 %v4057_v31 }
 0xa35   : > { %v2725_v26 = vmul.f32 %v4059_v24, %v2711_v18  ;;  %v2719_v34 = vmul.f32 %v4055_v23, %v2718_v35  ;;  %vm2731_vm1 = vweird.f32 %v4059_v24  ;;  %vm2752_vm3 = vmor %vm2750_vm2, %vm2751_vm0 }
 0xa36   : > { %v2746_v55 = vmul.f32 %v4057_v31, %v2745_v44  ;;  %v2743_v43 = vsel %vm5173_vm13, %v4053_v33, %v2739_v30  ;;  %vm2732_vm5 = vmor %vm2730_vm4, %vm2731_vm1 }
 0xa37   : > { %v2726_v32 = vmul.f32 %v4059_v24, %v2725_v26  ;;  %v2723_v37 = vsel %vm5177_vm15, %v4055_v23, %v2719_v34  ;;  %v2756_v42 = vmul.f32 %v2743_v43, %v5054_v1 }
 0xa38   : > { %v2747_v2 = vmul.f32 0.5, %v2746_v55  ;;  %v2754_v14 = vmul.f32 %v2723_v37, %v5046_v45 }
 0xa39   : > { %v2727_v36 = vmul.f32 0.5, %v2726_v32  ;;  %v2762_v3 = vmul.f32 %v2759_v29, %v2756_v42 }
 0xa3a   : > { %v2748_v6 = vsub.f32 1.5, %v2747_v2  ;;  %v2760_v58 = vmul.f32 %v2759_v29, %v2754_v14 }
 0xa3b   : > { %v2728_v46 = vsub.f32 1.5, %v2727_v36 }
 0xa3c   : > { %v2749_v47 = vmul.f32 %v4057_v31, %v2748_v6 }
 0xa3d   : > { %v2729_v11 = vmul.f32 %v4059_v24, %v2728_v46 }
 0xa3e   : > { %v2753_v62 = vsel %vm2752_vm3, %v4057_v31, %v2749_v47 }
 0xa3f   : > { %v2733_v16 = vsel %vm2732_vm5, %v4059_v24, %v2729_v11  ;;  %v2757_v48 = vmul.f32 %v2753_v62, %v5058_v7 }
 0xa40   : > { %v2755_v51 = vmul.f32 %v2733_v16, %v5050_v61 }
 0xa41   : > { %v2763_v50 = vmul.f32 %v2759_v29, %v2757_v48 }
 0xa42   : > { %v2761_v49 = vmul.f32 %v2759_v29, %v2755_v51 }
 0xa43   : > { %v2765_v52 = vpack.c.bf16 %v2763_v50, %v2762_v3 }
 0xa44   : > { %v2764_v59 = vpack.c.bf16 %v2761_v49, %v2760_v58  ;;  %v2968_v58 = vld [vmem:[%s5339_s23] sm:$0xff]  ;;  %v2969_v49 = vld [vmem:[%s5339_s23 + $0x8] sm:$0xff] }
 0xa45   : > { %2875 = vmatmul.bf16.vlgmr.msra.gmra.mxu2 %v2765_v52  ;;  %2894 = vmatmul.bf16.vlgmr.msra.gmra.mxu3 %v2765_v52 }
 0xa46   : > { %2870 = vmatmul.bf16.vlgmr.msra.gmra.mxu0 %v2764_v59  ;;  %2889 = vmatmul.bf16.vlgmr.msra.gmra.mxu1 %v2764_v59 }
 0xac3   : > { %v5189_v1 = vpop.f32.mrf.mxu0  ;;  %v5191_v53 = vpop.f32.mrf.mxu1 }
 0xac4   : > { %v2900_v45 = vpack.c.bf16 %v5191_v53, %v5189_v1  ;;  %v2908_v61 = vmax.f32 %v5189_v1, %v5191_v53 }
 0xac6   : > { %2904 = vst [vmem:[#allocation3] sm:$0xff] %v2900_v45  ;;  %2909 = vmax.xlane.f32.xlu2 %v2908_v61 }
 0xac8   : > { %v5197_v7 = vpop.f32.mrf.mxu2  ;;  %v5199_v41 = vpop.f32.mrf.mxu3 }
 0xac9   : > { %v2902_v20 = vpack.c.bf16 %v5199_v41, %v5197_v7  ;;  %v2914_v57 = vmax.f32 %v5197_v7, %v5199_v41 }
 0xacb   : > { %2906 = vst [vmem:[#allocation3 + $0x10] sm:$0xff] %v2902_v20  ;;  %v5205_v60 = vpop.f32.mrf.mxu0  ;;  %v5207_v63 = vpop.f32.mrf.mxu1  ;;  %2915 = vmax.xlane.f32.xlu0 %v2914_v57 }
 0xacc   : > { %v2901_v0 = vpack.c.bf16 %v5207_v63, %v5205_v60  ;;  %v2911_v54 = vmax.f32 %v5205_v60, %v5207_v63 }
 0xace   : > { %2905 = vst [vmem:[#allocation3 + $0x8] sm:$0xff] %v2901_v0  ;;  %2912 = vmax.xlane.f32.xlu2 %v2911_v54  ;;  %v2971_v54 = vld [vmem:[%s5339_s23 + $0x18] sm:$0xff] }
 0xad0   : > { %v5213_v10 = vpop.f32.mrf.mxu2  ;;  %v5215_v39 = vpop.f32.mrf.mxu3 }
 0xad1   : > { %v2903_v40 = vpack.c.bf16 %v5215_v39, %v5213_v10  ;;  %v2917_v4 = vmax.f32 %v5213_v10, %v5215_v39 }
 0xad3   : > { %2907 = vst [vmem:[#allocation3 + $0x18] sm:$0xff] %v2903_v40  ;;  %2918 = vmax.xlane.f32.xlu1 %v2917_v4 }
 0xb39   : > { %v2910_v25 = vpop.xlane.xlu2 %2909 }
 0xb3a   : > { %v2920_v19 = vsub.f32 %v5189_v1, %v2910_v25  ;;  %v2921_v22 = vsub.f32 %v5191_v53, %v2910_v25 }
 0xb3c   : > { %v2928_v33 = vmul.f32 1.442695, %v2920_v19  ;;  %v2930_v5 = vmul.f32 1.442695, %v2921_v22  ;;  %v2972_v22 = vld [vmem:[%s5339_s23 + $0x20] sm:$0xff] }
 0xb3e   : > { %4060 = vpow2.f32 %v2928_v33  ;;  %v2916_v18 = vpop.xlane.xlu0 %2915 }
 0xb3f   : > { %4062 = vpow2.f32 %v2930_v5  ;;  %v2924_v23 = vsub.f32 %v5197_v7, %v2916_v18  ;;  %v2925_v8 = vsub.f32 %v5199_v41, %v2916_v18 }
 0xb41   : > { %v2936_v9 = vmul.f32 1.442695, %v2924_v23  ;;  %v2938_v12 = vmul.f32 1.442695, %v2925_v8  ;;  %v2913_v13 = vpop.xlane.xlu2 %2912 }
 0xb42   : > { %v2922_v15 = vsub.f32 %v5205_v60, %v2913_v13  ;;  %v2923_v56 = vsub.f32 %v5207_v63, %v2913_v13 }
 0xb43   : > { %4064 = vpow2.f32 %v2936_v9 }
 0xb44   : > { %v4061_v17 = vpop.eup %4060  ;;  %4066 = vpow2.f32 %v2938_v12  ;;  %v2932_v31 = vmul.f32 1.442695, %v2922_v15  ;;  %v2934_v35 = vmul.f32 1.442695, %v2923_v56 }
 0xb45   : > { %v4063_v24 = vpop.eup %4062 }
 0xb46   : > { %4068 = vpow2.f32 %v2932_v31  ;;  %v2919_v44 = vpop.xlane.xlu1 %2918  ;;  %v2944_v26 = vadd.f32 %v4063_v24, %v4061_v17 }
 0xb47   : > { %4070 = vpow2.f32 %v2934_v35  ;;  %v2926_v55 = vsub.f32 %v5213_v10, %v2919_v44  ;;  %v2927_v28 = vsub.f32 %v5215_v39, %v2919_v44 }
 0xb48   : > { %2945 = vadd.xlane.f32.xlu2 %v2944_v26 }
 0xb49   : > { %v4065_v30 = vpop.eup %4064  ;;  %v2940_v32 = vmul.f32 1.442695, %v2926_v55  ;;  %v2942_v34 = vmul.f32 1.442695, %v2927_v28 }
 0xb4a   : > { %v4067_v2 = vpop.eup %4066 }
 0xb4b   : > { %4072 = vpow2.f32 %v2940_v32  ;;  %v2950_v21 = vadd.f32 %v4067_v2, %v4065_v30 }
 0xb4c   : > { %v4069_v36 = vpop.eup %4068  ;;  %4074 = vpow2.f32 %v2942_v34 }
 0xb4d   : > { %v4071_v27 = vpop.eup %4070  ;;  %2951 = vadd.xlane.f32.xlu1 %v2950_v21 }
 0xb4e   : > { %v2947_v38 = vadd.f32 %v4071_v27, %v4069_v36 }
 0xb50   : > { %2948 = vadd.xlane.f32.xlu0 %v2947_v38 }
 0xb51   : > { %v4073_v6 = vpop.eup %4072 }
 0xb52   : > { %v4075_v43 = vpop.eup %4074 }
 0xb53   : > { %v2953_v46 = vadd.f32 %v4075_v43, %v4073_v6 }
 0xb55   : > { %2954 = vadd.xlane.f32.xlu2 %v2953_v46 }
 0xbbb   : > { %v2946_v37 = vpop.xlane.xlu2 %2945 }
 0xbbc   : > { %4076 = vlog2.f32 %v2946_v37 }
 0xbc0   : > { %v2952_v47 = vpop.xlane.xlu1 %2951 }
 0xbc1   : > { %4078 = vlog2.f32 %v2952_v47 }
 0xbc2   : > { %v4077_v11 = vpop.eup %4076 }
 0xbc3   : > { %v2957_v29 = vmul.f32 0.6931472, %v4077_v11  ;;  %v2949_v42 = vpop.xlane.xlu0 %2948 }
 0xbc4   : > { %4080 = vlog2.f32 %v2949_v42 }
 0xbc5   : > { %v2964_v14 = vadd.f32 %v2957_v29, %v2910_v25 }
 0xbc7   : > { %v4079_v62 = vpop.eup %4078  ;;  %v2976_v48 = vsub.f32 %v2964_v14, %v5189_v1  ;;  %v2977_v51 = vsub.f32 %v2964_v14, %v5191_v53  ;;  %v2970_v1 = vld [vmem:[%s5339_s23 + $0x10] sm:$0xff] }
 0xbc8   : > { %v2955_v16 = vpop.xlane.xlu2 %2954  ;;  %v2961_v3 = vmul.f32 0.6931472, %v4079_v62 }
 0xbc9   : > { %4082 = vlog2.f32 %v2955_v16  ;;  %v2984_v59 = vmul.f32 %v2976_v48, %v2968_v58  ;;  %v2985_v45 = vmul.f32 %v2977_v51, %v2969_v49 }
 0xbca   : > { %v4081_v50 = vpop.eup %4080  ;;  %v2966_v61 = vadd.f32 %v2961_v3, %v2916_v18 }
 0xbcb   : > { %v2959_v52 = vmul.f32 0.6931472, %v4081_v50  ;;  %v2992_v4 = vadd.f32 %v2985_v45, %v2984_v59 }
 0xbcc   : > { %v2980_v25 = vsub.f32 %v2966_v61, %v5197_v7  ;;  %v2981_v5 = vsub.f32 %v2966_v61, %v5199_v41  ;;  %v2974_v7 = vld [vmem:[%s5339_s23 + $0x30] sm:$0xff]  ;;  %v2975_v41 = vld [vmem:[%s5339_s23 + $0x38] sm:$0xff] }
 0xbcd   : > { %v2965_v20 = vadd.f32 %v2959_v52, %v2913_v13 }
 0xbce   : > { %v2988_v23 = vmul.f32 %v2980_v25, %v2972_v22 }
 0xbcf   : > { %v4083_v53 = vpop.eup %4082  ;;  %v2978_v57 = vsub.f32 %v2965_v20, %v5205_v60  ;;  %v2979_v0 = vsub.f32 %v2965_v20, %v5207_v63  ;;  %v2973_v63 = vld [vmem:[%s5339_s23 + $0x28] sm:$0xff] }
 0xbd0   : > { %v2963_v40 = vmul.f32 0.6931472, %v4083_v53  ;;  %v2989_v13 = vmul.f32 %v2981_v5, %v2973_v63 }
 0xbd1   : > { %v2986_v19 = vmul.f32 %v2978_v57, %v2970_v1  ;;  %v2987_v18 = vmul.f32 %v2979_v0, %v2971_v54 }
 0xbd2   : > { %v2967_v33 = vadd.f32 %v2963_v40, %v2919_v44 }
 0xbd3   : > { %v2993_v60 = vadd.f32 %v2992_v4, %v2986_v19 }
 0xbd4   : > { %v2982_v8 = vsub.f32 %v2967_v33, %v5213_v10  ;;  %v2983_v12 = vsub.f32 %v2967_v33, %v5215_v39 }
 0xbd5   : > { %v2994_v9 = vadd.f32 %v2993_v60, %v2987_v18 }
 0xbd6   : > { %v2990_v56 = vmul.f32 %v2982_v8, %v2974_v7  ;;  %v2991_v31 = vmul.f32 %v2983_v12, %v2975_v41 }
 0xbd7   : > { %v2995_v15 = vadd.f32 %v2994_v9, %v2988_v23 }
 0xbd9   : > { %v2996_v17 = vadd.f32 %v2995_v15, %v2989_v13 }
 0xbdb   : > { %v2997_v35 = vadd.f32 %v2996_v17, %v2990_v56 }
 0xbdd   : > { %v2998_v24 = vadd.f32 %v2997_v35, %v2991_v31 }
 0xbdf   : > { %2999 = vadd.xlane.f32.xlu0 %v2998_v24 }
 0xc52   : > { %v3000_v10 = vpop.xlane.xlu0 %2999 }
 0xc53   : > { %v3001_v44 = vrot.slane %v3000_v10, 4 }
 0xc55   : > { %v3002_v26 = vadd.f32 %v3001_v44, %v3000_v10 }
 0xc57   : > { %v3003_v55 = vrot.slane %v3002_v26, 2 }
 0xc59   : > { %v3004_v28 = vadd.f32 %v3003_v55, %v3002_v26 }
 0xc5b   : > { %v3005_v30 = vrot.slane %v3004_v28, 1 }
 0xc5d   : > { %v3006_v32 = vadd.f32 %v3005_v30, %v3004_v28 }
 0xc5f   : > { %3907 = vpush %v3006_v32 }
 0xc90   : > { %s3908_s20 = spop %3907 }
 0xc91   : > { %s3008_s29 = smul.f32 0.033333335, %s3908_s20 }
 0xc93   : > { %3010 = sst [smem:[#allocation6]] %s3008_s29 }
 0xc94 PF: > { %p3917_p6 = scmp.eq.s32.totalorder %s4253_s30, 1  ;;  %s4143_s28 = smov [#allocation3]  }
 0xc95   : > { %s3016_s22 = sshll.u32 %s4143_s28, 4  ;;  %s5340_s1 = sld [smem:[#allocation16_spill]]  ;;  %s3017_s22 = int_to_ptr.vmem [resolvable:$true] %s3016_s22 }
 0xc96   : > { %s4144_s2 = smov 128   ;;  %s4145_s26 = smov 8  }
 0xc97   : > { %s5341_s16 = sld [smem:[#allocation17_spill]]  ;;  %s4146_s29 = smov [#allocation6]  }
 0xc9b   : > { %s3018_s24 = sshll.u32 %s5340_s1, 4  ;;  %s3019_s24 = int_to_ptr.hbm [resolvable:$true] %s3018_s24 }
 0xc9c   : > { %3910 = dma.vmem_to_hbm [thread:$0]  (%p3917_p6), %s3017_s22, 512, %s3019_s24, [#allocation4], %s4144_s2, %s4144_s2, %s4145_s26  }
 0xc9d   : > { %s3031_s20 = sshll.u32 %s5341_s16, 4  ;;  %s3032_s20 = int_to_ptr.hbm [resolvable:$true] %s3031_s20 }
 0xc9e   : > { %3912 = dma.smem_to_hbm (%p3917_p6), %s4146_s29, 16, %s3032_s20, [#allocation5]  }
 0xc9f   : > { %4131 = dma.done.wait (%p3917_p6), [#allocation4], 512  }
 0xca0   : > { %4133 = vsyncadd (%p3917_p6), [#allocation4], 4294966784 }
 0xca1   : > { %4135 = dma.done.wait (%p3917_p6), [#allocation5], 16  }
 0xca2   : > { %4137 = vsyncadd (%p3917_p6), [#allocation5], 4294967280 }
 0xca3   : > { %3045 = sfence }
 0xca4 PF: > { %s5342_s28 = sld [smem:[#allocation9_spill]] }
 0xcaa   : > { %s32_s0 = sadd.s32 1, %s5342_s28  }
 0xcab   : > { %p29_p7 = scmp.ge.s32.totalorder %s32_s0, 4  }
 0xcad   :  { %31 = sbr.rel (!%p29_p7) target bundleno = 11 (0xb), region = 152 }
 0xcb2   :  { %3051 = vsyncpa [#allocation4], 1 }
 0xcb3   :  { %3053 = vsyncpa [#allocation4 + $0x1], 1 }
 0xcb4   :  { %3054 = vsyncpa [#allocation5], 1 }
 0xcb5   :  { %3056 = vsyncpa [#allocation5 + $0x1], 1 }

</bundles_post_ra>
